<compile_context>
chip_gen: v5e
topology: v5e:2x2
jax: 0.10.0
libtpu: 0.0.40
codegen_flags: <defaults>
</compile_context>

<pallas_src>
import functools

import jax
import jax.numpy as jnp
from jax.experimental import pallas as pl
from jax.experimental.pallas import tpu as pltpu

EPS = 1e-5


# ------------------------------ Pallas kernel -------------------------------

def _conv3x3_taps(x, wk_ref, H, W):
    """3x3 stride-1 'same' conv on one image as 3 K-packed MXU matmuls.

    x      : (H*W, Cin) bf16 value, channels-last (channels on lanes).
    wk_ref : (3, 3*Cin, Cout) bf16 ref; wk_ref[ky] = vstack over kx of W[ky,kx].
    Returns: (H*W, Cout) f32 accumulator (no bias / activation applied).
    """
    HW = H * W
    Cin = x.shape[-1]
    M = (H + 2) * W                                   # height-padded row count

    # Zero-pad one image row top and bottom (in-kernel, stays in VMEM).
    zpad = jnp.zeros((W, Cin), x.dtype)
    xp = jnp.concatenate([zpad, x, zpad], axis=0)     # (M, Cin)

    # Horizontally shifted copies (w-1 and w+1) with image-edge masking.
    zrow = jnp.zeros((1, Cin), x.dtype)
    up = jnp.concatenate([zrow, xp[:M - 1]], axis=0)  # row r -> xp[r-1]
    dn = jnp.concatenate([xp[1:], zrow], axis=0)      # row r -> xp[r+1]
    col = jax.lax.broadcasted_iota(jnp.int32, (M, 1), 0) % W
    xs0 = jnp.where(col != 0, up, jnp.zeros_like(up))        # x(h, w-1)
    xs2 = jnp.where(col != W - 1, dn, jnp.zeros_like(dn))    # x(h, w+1)

    # Pack kx taps into the K (lane) axis: (M, 3*Cin).
    xk = jnp.concatenate([xs0, xp, xs2], axis=1)

    # Three matmuls (one per ky) at sublane-aligned row offsets 0, W, 2W;
    # accumulate as register values (no scratch read-modify-write).
    acc = jnp.dot(xk[0:HW], wk_ref[0], preferred_element_type=jnp.float32)
    acc = acc + jnp.dot(xk[W:W + HW], wk_ref[1],
                        preferred_element_type=jnp.float32)
    acc = acc + jnp.dot(xk[2 * W:2 * W + HW], wk_ref[2],
                        preferred_element_type=jnp.float32)
    return acc


def resnet5_kernel(x_ref, w0_ref, b0_ref, w1_ref, s1_ref, t1_ref,
                   wa_ref, ba_ref, wb_ref, bb_ref, wfc_ref, bfc_ref,
                   o_ref, *, H, W):
    """Full ResNet5 forward for one image; all activations stay on-chip."""
    # ---- layer0: Conv(Cin->64) + BN(folded) + ReLU --------------------------
    x0 = x_ref[0]                                              # (H*W, Cin) bf16
    y0 = jnp.maximum(_conv3x3_taps(x0, w0_ref, H, W) + b0_ref[...], 0.0)

    # ---- layer1: Conv(64->128) -> MaxPool2x2 -> BN affine -> ReLU -----------
    a1 = _conv3x3_taps(y0.astype(jnp.bfloat16), w1_ref, H, W)  # (H*W, 128) f32
    H2, W2 = H // 2, W // 2
    C = a1.shape[-1]
    v = a1.reshape(H2, 2, W2, 2 * C)           # pairs of horizontal neighbors
    r0 = v[:, 0]                               # image rows with dy=0
    r1 = v[:, 1]                               # image rows with dy=1
    m = jnp.maximum(jnp.maximum(r0[..., :C], r0[..., C:]),
                    jnp.maximum(r1[..., :C], r1[..., C:]))     # (H2, W2, C)
    m = m.reshape(H2 * W2, C)
    x1 = jnp.maximum(m * s1_ref[...] + t1_ref[...], 0.0)       # (H2*W2, 128) f32

    # ---- layer2: resblock(128,128), identity shortcut (add+ReLU fused) ------
    yA = jnp.maximum(
        _conv3x3_taps(x1.astype(jnp.bfloat16), wa_ref, H2, W2) + ba_ref[...],
        0.0)
    yB = jnp.maximum(
        _conv3x3_taps(yA.astype(jnp.bfloat16), wb_ref, H2, W2) + bb_ref[...],
        0.0)
    yB = jnp.maximum(yB + x1, 0.0)                             # residual + ReLU

    # ---- GAP + FC (lane-padded, lane-dense output) ---------------------------
    pooled = jnp.sum(yB, axis=0, keepdims=True) * (1.0 / (H2 * W2))  # (1, 128)
    o_ref[0] = (jnp.dot(pooled, wfc_ref[...],
                        preferred_element_type=jnp.float32) + bfc_ref[...])


# ------------------------------ JAX wrapper ----------------------------------

def _fold_bn(conv_bias, gamma, beta, mean, var):
    scale = gamma / jnp.sqrt(var + EPS)
    bias = (conv_bias - mean) * scale + beta
    return scale, bias


def _pack_conv(w_hwio, scale=None):
    """HWIO (3,3,Cin,Cout) -> (3, 3*Cin, Cout) bf16, kx-major along K."""
    w = w_hwio if scale is None else w_hwio * scale
    kh, kw, ci, co = w.shape
    return w.reshape(kh, kw * ci, co).astype(jnp.bfloat16)


def resnet5_forward(p, x_nchw):
    x = jnp.transpose(x_nchw, (0, 2, 3, 1))                    # NCHW -> NHWC
    N, H, W, Cin = x.shape
    x_flat = x.reshape(N, H * W, Cin).astype(jnp.bfloat16)

    outputs = p['fc_w'].shape[1]
    OP = max(128, ((outputs + 127) // 128) * 128)               # lane-dense FC

    # layer0: BN folded into conv weights / bias.
    s0, b0 = _fold_bn(p['c0_b'], p['bn0_g'], p['bn0_b'], p['bn0_m'], p['bn0_v'])
    w0 = _pack_conv(p['c0_w'], s0)
    b0 = b0.reshape(1, 64).astype(jnp.float32)

    # layer1: BN comes after the pool -> keep affine separate; fold conv bias
    # into the post-pool bias (max-pool commutes with a per-channel constant).
    w1 = _pack_conv(p['c1_w'])
    s1 = p['bn1_g'] / jnp.sqrt(p['bn1_v'] + EPS)
    t1 = (p['c1_b'] - p['bn1_m']) * s1 + p['bn1_b']
    s1 = s1.reshape(1, 128).astype(jnp.float32)
    t1 = t1.reshape(1, 128).astype(jnp.float32)

    # resblock convs: BN folded.
    sA, bA = _fold_bn(p['r1_b'], p['rbn1_g'], p['rbn1_b'], p['rbn1_m'], p['rbn1_v'])
    wa = _pack_conv(p['r1_w'], sA)
    bA = bA.reshape(1, 128).astype(jnp.float32)
    sB, bB = _fold_bn(p['r2_b'], p['rbn2_g'], p['rbn2_b'], p['rbn2_m'], p['rbn2_v'])
    wb = _pack_conv(p['r2_w'], sB)
    bB = bB.reshape(1, 128).astype(jnp.float32)

    # FC padded to a 128-wide lane-dense output.
    wfc = jnp.zeros((128, OP), jnp.float32).at[:, :outputs].set(
        p['fc_w'].astype(jnp.float32))
    bfc = jnp.zeros((1, OP), jnp.float32).at[:, :outputs].set(
        p['fc_b'].reshape(1, -1).astype(jnp.float32))

    def const(*shape):
        return pl.BlockSpec(shape, lambda n, _s=shape: (0,) * len(_s))

    out = pl.pallas_call(
        functools.partial(resnet5_kernel, H=H, W=W),
        out_shape=jax.ShapeDtypeStruct((N, 1, OP), jnp.float32),
        grid=(N,),
        in_specs=[
            pl.BlockSpec((1, H * W, Cin), lambda n: (n, 0, 0)),   # input image
            const(3, 3 * Cin, 64), const(1, 64),                  # conv0
            const(3, 3 * 64, 128), const(1, 128), const(1, 128),  # conv1 + BN1
            const(3, 3 * 128, 128), const(1, 128),                # res conv1
            const(3, 3 * 128, 128), const(1, 128),                # res conv2
            const(128, OP), const(1, OP),                         # FC
        ],
        out_specs=pl.BlockSpec((1, 1, OP), lambda n: (n, 0, 0)),
        compiler_params=pltpu.CompilerParams(
            dimension_semantics=("parallel",)),
    )(x_flat, w0, b0, w1, s1, t1, wa, bA, wb, bB, wfc, bfc)

    return out[:, 0, :outputs]


# --------------------------- params / reference ------------------------------

def init_params(key, in_channels, outputs):
    keys = iter(jax.random.split(key, 40))
    nk = lambda: next(keys)

    def conv_init(cin, cout):
        fan_in = 9 * cin
        w = jax.random.normal(nk(), (3, 3, cin, cout), jnp.float32) / jnp.sqrt(fan_in)
        b = jax.random.normal(nk(), (cout,), jnp.float32) * 0.1
        return w, b

    def bn_init(c):
        g = jax.random.uniform(nk(), (c,), jnp.float32, 0.5, 1.5)
        b = jax.random.normal(nk(), (c,), jnp.float32) * 0.1
        m = jax.random.normal(nk(), (c,), jnp.float32) * 0.1
        v = jax.random.uniform(nk(), (c,), jnp.float32, 0.5, 1.5)
        return g, b, m, v

    p = {}
    p['c0_w'], p['c0_b'] = conv_init(in_channels, 64)
    p['bn0_g'], p['bn0_b'], p['bn0_m'], p['bn0_v'] = bn_init(64)
    p['c1_w'], p['c1_b'] = conv_init(64, 128)
    p['bn1_g'], p['bn1_b'], p['bn1_m'], p['bn1_v'] = bn_init(128)
    p['r1_w'], p['r1_b'] = conv_init(128, 128)
    p['rbn1_g'], p['rbn1_b'], p['rbn1_m'], p['rbn1_v'] = bn_init(128)
    p['r2_w'], p['r2_b'] = conv_init(128, 128)
    p['rbn2_g'], p['rbn2_b'], p['rbn2_m'], p['rbn2_v'] = bn_init(128)
    p['fc_w'] = jax.random.normal(nk(), (128, outputs), jnp.float32) / jnp.sqrt(128.0)
    p['fc_b'] = jax.random.normal(nk(), (outputs,), jnp.float32) * 0.1
    return p


def reference_forward(p, x_nchw):
    """Pure-JAX f32 reference (eval-mode BN) for numerical validation."""
    hi = jax.lax.Precision.HIGHEST
    x = jnp.transpose(x_nchw, (0, 2, 3, 1)).astype(jnp.float32)

    def conv(x, w, b):
        y = jax.lax.conv_general_dilated(
            x, w, (1, 1), 'SAME',
            dimension_numbers=('NHWC', 'HWIO', 'NHWC'), precision=hi)
        return y + b

    def bn(x, g, bta, m, v):
        return (x - m) * (g / jnp.sqrt(v + EPS)) + bta

    x = jax.nn.relu(bn(conv(x, p['c0_w'], p['c0_b']),
                       p['bn0_g'], p['bn0_b'], p['bn0_m'], p['bn0_v']))
    x = conv(x, p['c1_w'], p['c1_b'])
    x = jax.lax.reduce_window(x, -jnp.inf, jax.lax.max,
                              (1, 2, 2, 1), (1, 2, 2, 1), 'VALID')
    x = jax.nn.relu(bn(x, p['bn1_g'], p['bn1_b'], p['bn1_m'], p['bn1_v']))
    sc = x
    y = jax.nn.relu(bn(conv(x, p['r1_w'], p['r1_b']),
                       p['rbn1_g'], p['rbn1_b'], p['rbn1_m'], p['rbn1_v']))
    y = jax.nn.relu(bn(conv(y, p['r2_w'], p['r2_b']),
                       p['rbn2_g'], p['rbn2_b'], p['rbn2_m'], p['rbn2_v']))
    x = jax.nn.relu(y + sc)
    g = jnp.mean(x, axis=(1, 2))
    return jnp.dot(g, p['fc_w'], precision=hi) + p['fc_b']


# ---------------------------------- main --------------------------------------

if __name__ == "__main__":
    key = jax.random.PRNGKey(0)
    k_x, k_p = jax.random.split(key)

    N, C_IN, H, W = 2, 4, 16, 16        # small shapes consistent with the module
    x = jax.random.normal(k_x, (N, C_IN, H, W), jnp.float32)   # NCHW like PyTorch
    params = init_params(k_p, in_channels=C_IN, outputs=10)

    out = jax.block_until_ready(jax.jit(resnet5_forward)(params, x))
    ref = jax.block_until_ready(reference_forward(params, x))

    assert out.shape == (N, 10), out.shape
    max_diff = float(jnp.max(jnp.abs(out - ref)))
    assert jnp.allclose(out, ref, rtol=5e-2, atol=5e-2), (
        f"max abs diff {max_diff}")

    print("KERNEL_OK")
</pallas_src>

<mosaic_0001>
module attributes {stable_mosaic.version = 11 : i64} {
  func.func @resnet5_kernel(%arg0: i32, %arg1: memref<1x256x4xbf16, #tpu.memory_space<vmem>>, %arg2: memref<3x12x64xbf16, #tpu.memory_space<vmem>>, %arg3: memref<1x64xf32, #tpu.memory_space<vmem>>, %arg4: memref<3x192x128xbf16, #tpu.memory_space<vmem>>, %arg5: memref<1x128xf32, #tpu.memory_space<vmem>>, %arg6: memref<1x128xf32, #tpu.memory_space<vmem>>, %arg7: memref<3x384x128xbf16, #tpu.memory_space<vmem>>, %arg8: memref<1x128xf32, #tpu.memory_space<vmem>>, %arg9: memref<3x384x128xbf16, #tpu.memory_space<vmem>>, %arg10: memref<1x128xf32, #tpu.memory_space<vmem>>, %arg11: memref<128x128xf32, #tpu.memory_space<vmem>>, %arg12: memref<1x128xf32, #tpu.memory_space<vmem>>, %arg13: memref<1x1x128xf32, #tpu.memory_space<vmem>>) attributes {dimension_semantics = [#tpu.dimension_semantics<parallel>], iteration_bounds = array<i64: 2>, scalar_prefetch = 0 : i64, scratch_operands = 0 : i64, tpu.core_type = #tpu.core_type<tc>, window_params = [{transform_indices = @transform_0, window_bounds = array<i64: 1, 256, 4>}, {pipeline_mode = #tpu.pipeline_mode<synchronous>, transform_indices = @transform_1, window_bounds = array<i64: 3, 12, 64>}, {pipeline_mode = #tpu.pipeline_mode<synchronous>, transform_indices = @transform_2, window_bounds = array<i64: 1, 64>}, {pipeline_mode = #tpu.pipeline_mode<synchronous>, transform_indices = @transform_3, window_bounds = array<i64: 3, 192, 128>}, {pipeline_mode = #tpu.pipeline_mode<synchronous>, transform_indices = @transform_4, window_bounds = array<i64: 1, 128>}, {pipeline_mode = #tpu.pipeline_mode<synchronous>, transform_indices = @transform_5, window_bounds = array<i64: 1, 128>}, {pipeline_mode = #tpu.pipeline_mode<synchronous>, transform_indices = @transform_6, window_bounds = array<i64: 3, 384, 128>}, {pipeline_mode = #tpu.pipeline_mode<synchronous>, transform_indices = @transform_7, window_bounds = array<i64: 1, 128>}, {pipeline_mode = #tpu.pipeline_mode<synchronous>, transform_indices = @transform_8, window_bounds = array<i64: 3, 384, 128>}, {pipeline_mode = #tpu.pipeline_mode<synchronous>, transform_indices = @transform_9, window_bounds = array<i64: 1, 128>}, {pipeline_mode = #tpu.pipeline_mode<synchronous>, transform_indices = @transform_10, window_bounds = array<i64: 128, 128>}, {pipeline_mode = #tpu.pipeline_mode<synchronous>, transform_indices = @transform_11, window_bounds = array<i64: 1, 128>}, {transform_indices = @transform_12, window_bounds = array<i64: 1, 1, 128>}]} {
    %c0 = arith.constant 0 : index
    %c0_0 = arith.constant 0 : index
    %c0_1 = arith.constant 0 : index
    %0 = vector.load %arg1[%c0, %c0_0, %c0_1] : memref<1x256x4xbf16, #tpu.memory_space<vmem>>, vector<1x256x4xbf16>
    %1 = vector.shape_cast %0 : vector<1x256x4xbf16> to vector<256x4xbf16>
    %cst = arith.constant 0.000000e+00 : bf16
    %2 = vector.broadcast %cst : bf16 to vector<16x4xbf16>
    %3 = tpu.concatenate %2, %1, %2 in 0 : vector<16x4xbf16>, vector<256x4xbf16>, vector<16x4xbf16> -> vector<288x4xbf16>
    %cst_2 = arith.constant 0.000000e+00 : bf16
    %4 = vector.broadcast %cst_2 : bf16 to vector<1x4xbf16>
    %5 = vector.extract_strided_slice %3 {offsets = [0, 0], sizes = [287, 4], strides = [1, 1]} : vector<288x4xbf16> to vector<287x4xbf16>
    %6 = tpu.concatenate %4, %5 in 0 : vector<1x4xbf16>, vector<287x4xbf16> -> vector<288x4xbf16>
    %7 = vector.extract_strided_slice %3 {offsets = [1, 0], sizes = [287, 4], strides = [1, 1]} : vector<288x4xbf16> to vector<287x4xbf16>
    %8 = tpu.concatenate %7, %4 in 0 : vector<287x4xbf16>, vector<1x4xbf16> -> vector<288x4xbf16>
    %9 = tpu.iota {dimensions = array<i32: 0>} : vector<288x1xi32>
    %c16_i32 = arith.constant 16 : i32
    %c0_i32 = arith.constant 0 : i32
    %10 = arith.cmpi eq, %c16_i32, %c0_i32 : i32
    %c1_i32 = arith.constant 1 : i32
    %11 = arith.select %10, %c1_i32, %c16_i32 : i32
    %12 = vector.broadcast %11 : i32 to vector<288x1xi32>
    %13 = arith.remsi %9, %12 : vector<288x1xi32>
    %c0_i32_3 = arith.constant 0 : i32
    %14 = vector.broadcast %c0_i32_3 : i32 to vector<288x1xi32>
    %15 = arith.cmpi ne, %13, %14 : vector<288x1xi32>
    %c0_i32_4 = arith.constant 0 : i32
    %16 = vector.broadcast %c0_i32_4 : i32 to vector<288x1xi32>
    %17 = arith.cmpi slt, %13, %16 : vector<288x1xi32>
    %c0_i32_5 = arith.constant 0 : i32
    %18 = arith.cmpi slt, %11, %c0_i32_5 : i32
    %19 = vector.broadcast %18 : i1 to vector<288x1xi1>
    %20 = vector.broadcast %19 : vector<288x1xi1> to vector<288x1xi1>
    %21 = arith.xori %17, %20 : vector<288x1xi1>
    %22 = arith.andi %21, %15 : vector<288x1xi1>
    %23 = vector.broadcast %11 : i32 to vector<288x1xi32>
    %24 = arith.addi %13, %23 : vector<288x1xi32>
    %25 = arith.select %22, %24, %13 : vector<288x1xi1>, vector<288x1xi32>
    %c0_i32_6 = arith.constant 0 : i32
    %26 = vector.broadcast %c0_i32_6 : i32 to vector<288x1xi32>
    %27 = arith.cmpi ne, %25, %26 : vector<288x1xi32>
    %cst_7 = arith.constant 0.000000e+00 : bf16
    %28 = vector.broadcast %cst_7 : bf16 to vector<288x4xbf16>
    %29 = vector.shape_cast %27 : vector<288x1xi1> to vector<288x1xi1>
    %30 = vector.broadcast %29 : vector<288x1xi1> to vector<288x4xi1>
    %31 = arith.select %30, %6, %28 : vector<288x4xi1>, vector<288x4xbf16>
    %c15_i32 = arith.constant 15 : i32
    %32 = vector.broadcast %c15_i32 : i32 to vector<288x1xi32>
    %33 = arith.cmpi ne, %25, %32 : vector<288x1xi32>
    %cst_8 = arith.constant 0.000000e+00 : bf16
    %34 = vector.broadcast %cst_8 : bf16 to vector<288x4xbf16>
    %35 = vector.shape_cast %33 : vector<288x1xi1> to vector<288x1xi1>
    %36 = vector.broadcast %35 : vector<288x1xi1> to vector<288x4xi1>
    %37 = arith.select %36, %8, %34 : vector<288x4xi1>, vector<288x4xbf16>
    %38 = tpu.concatenate %31, %3, %37 in 1 : vector<288x4xbf16>, vector<288x4xbf16>, vector<288x4xbf16> -> vector<288x12xbf16>
    %39 = vector.extract_strided_slice %38 {offsets = [0, 0], sizes = [256, 12], strides = [1, 1]} : vector<288x12xbf16> to vector<256x12xbf16>
    %c0_9 = arith.constant 0 : index
    %c0_10 = arith.constant 0 : index
    %c0_11 = arith.constant 0 : index
    %40 = vector.load %arg2[%c0_9, %c0_10, %c0_11] : memref<3x12x64xbf16, #tpu.memory_space<vmem>>, vector<1x12x64xbf16>
    %41 = vector.shape_cast %40 : vector<1x12x64xbf16> to vector<12x64xbf16>
    %cst_12 = arith.constant dense<0.000000e+00> : vector<256x64xf32>
    %42 = tpu.matmul %39, %41, %cst_12 {dimension_numbers = #tpu.dot_dimension_numbers<[1], [0], [0], [1], [0, 0, 1, 1], [], []>} : vector<256x12xbf16>, vector<12x64xbf16>, vector<256x64xf32> -> vector<256x64xf32>
    %43 = vector.extract_strided_slice %38 {offsets = [16, 0], sizes = [256, 12], strides = [1, 1]} : vector<288x12xbf16> to vector<256x12xbf16>
    %c1 = arith.constant 1 : index
    %c0_13 = arith.constant 0 : index
    %c0_14 = arith.constant 0 : index
    %44 = vector.load %arg2[%c1, %c0_13, %c0_14] : memref<3x12x64xbf16, #tpu.memory_space<vmem>>, vector<1x12x64xbf16>
    %45 = vector.shape_cast %44 : vector<1x12x64xbf16> to vector<12x64xbf16>
    %cst_15 = arith.constant dense<0.000000e+00> : vector<256x64xf32>
    %46 = tpu.matmul %43, %45, %cst_15 {dimension_numbers = #tpu.dot_dimension_numbers<[1], [0], [0], [1], [0, 0, 1, 1], [], []>} : vector<256x12xbf16>, vector<12x64xbf16>, vector<256x64xf32> -> vector<256x64xf32>
    %47 = arith.addf %42, %46 : vector<256x64xf32>
    %48 = vector.extract_strided_slice %38 {offsets = [32, 0], sizes = [256, 12], strides = [1, 1]} : vector<288x12xbf16> to vector<256x12xbf16>
    %c2 = arith.constant 2 : index
    %c0_16 = arith.constant 0 : index
    %c0_17 = arith.constant 0 : index
    %49 = vector.load %arg2[%c2, %c0_16, %c0_17] : memref<3x12x64xbf16, #tpu.memory_space<vmem>>, vector<1x12x64xbf16>
    %50 = vector.shape_cast %49 : vector<1x12x64xbf16> to vector<12x64xbf16>
    %cst_18 = arith.constant dense<0.000000e+00> : vector<256x64xf32>
    %51 = tpu.matmul %48, %50, %cst_18 {dimension_numbers = #tpu.dot_dimension_numbers<[1], [0], [0], [1], [0, 0, 1, 1], [], []>} : vector<256x12xbf16>, vector<12x64xbf16>, vector<256x64xf32> -> vector<256x64xf32>
    %52 = arith.addf %47, %51 : vector<256x64xf32>
    %c0_19 = arith.constant 0 : index
    %c0_20 = arith.constant 0 : index
    %53 = vector.load %arg3[%c0_19, %c0_20] : memref<1x64xf32, #tpu.memory_space<vmem>>, vector<1x64xf32>
    %54 = vector.broadcast %53 : vector<1x64xf32> to vector<256x64xf32>
    %55 = arith.addf %52, %54 : vector<256x64xf32>
    %cst_21 = arith.constant 0.000000e+00 : f32
    %56 = vector.broadcast %cst_21 : f32 to vector<256x64xf32>
    %57 = arith.maximumf %55, %56 : vector<256x64xf32>
    %58 = arith.truncf %57 : vector<256x64xf32> to vector<256x64xbf16>
    %cst_22 = arith.constant 0.000000e+00 : bf16
    %59 = vector.broadcast %cst_22 : bf16 to vector<16x64xbf16>
    %60 = tpu.concatenate %59, %58, %59 in 0 : vector<16x64xbf16>, vector<256x64xbf16>, vector<16x64xbf16> -> vector<288x64xbf16>
    %cst_23 = arith.constant 0.000000e+00 : bf16
    %61 = vector.broadcast %cst_23 : bf16 to vector<1x64xbf16>
    %62 = vector.extract_strided_slice %60 {offsets = [0, 0], sizes = [287, 64], strides = [1, 1]} : vector<288x64xbf16> to vector<287x64xbf16>
    %63 = tpu.concatenate %61, %62 in 0 : vector<1x64xbf16>, vector<287x64xbf16> -> vector<288x64xbf16>
    %64 = vector.extract_strided_slice %60 {offsets = [1, 0], sizes = [287, 64], strides = [1, 1]} : vector<288x64xbf16> to vector<287x64xbf16>
    %65 = tpu.concatenate %64, %61 in 0 : vector<287x64xbf16>, vector<1x64xbf16> -> vector<288x64xbf16>
    %66 = tpu.iota {dimensions = array<i32: 0>} : vector<288x1xi32>
    %c16_i32_24 = arith.constant 16 : i32
    %c0_i32_25 = arith.constant 0 : i32
    %67 = arith.cmpi eq, %c16_i32_24, %c0_i32_25 : i32
    %c1_i32_26 = arith.constant 1 : i32
    %68 = arith.select %67, %c1_i32_26, %c16_i32_24 : i32
    %69 = vector.broadcast %68 : i32 to vector<288x1xi32>
    %70 = arith.remsi %66, %69 : vector<288x1xi32>
    %c0_i32_27 = arith.constant 0 : i32
    %71 = vector.broadcast %c0_i32_27 : i32 to vector<288x1xi32>
    %72 = arith.cmpi ne, %70, %71 : vector<288x1xi32>
    %c0_i32_28 = arith.constant 0 : i32
    %73 = vector.broadcast %c0_i32_28 : i32 to vector<288x1xi32>
    %74 = arith.cmpi slt, %70, %73 : vector<288x1xi32>
    %c0_i32_29 = arith.constant 0 : i32
    %75 = arith.cmpi slt, %68, %c0_i32_29 : i32
    %76 = vector.broadcast %75 : i1 to vector<288x1xi1>
    %77 = vector.broadcast %76 : vector<288x1xi1> to vector<288x1xi1>
    %78 = arith.xori %74, %77 : vector<288x1xi1>
    %79 = arith.andi %78, %72 : vector<288x1xi1>
    %80 = vector.broadcast %68 : i32 to vector<288x1xi32>
    %81 = arith.addi %70, %80 : vector<288x1xi32>
    %82 = arith.select %79, %81, %70 : vector<288x1xi1>, vector<288x1xi32>
    %c0_i32_30 = arith.constant 0 : i32
    %83 = vector.broadcast %c0_i32_30 : i32 to vector<288x1xi32>
    %84 = arith.cmpi ne, %82, %83 : vector<288x1xi32>
    %cst_31 = arith.constant 0.000000e+00 : bf16
    %85 = vector.broadcast %cst_31 : bf16 to vector<288x64xbf16>
    %86 = vector.shape_cast %84 : vector<288x1xi1> to vector<288x1xi1>
    %87 = vector.broadcast %86 : vector<288x1xi1> to vector<288x64xi1>
    %88 = arith.select %87, %63, %85 : vector<288x64xi1>, vector<288x64xbf16>
    %c15_i32_32 = arith.constant 15 : i32
    %89 = vector.broadcast %c15_i32_32 : i32 to vector<288x1xi32>
    %90 = arith.cmpi ne, %82, %89 : vector<288x1xi32>
    %cst_33 = arith.constant 0.000000e+00 : bf16
    %91 = vector.broadcast %cst_33 : bf16 to vector<288x64xbf16>
    %92 = vector.shape_cast %90 : vector<288x1xi1> to vector<288x1xi1>
    %93 = vector.broadcast %92 : vector<288x1xi1> to vector<288x64xi1>
    %94 = arith.select %93, %65, %91 : vector<288x64xi1>, vector<288x64xbf16>
    %95 = tpu.concatenate %88, %60, %94 in 1 : vector<288x64xbf16>, vector<288x64xbf16>, vector<288x64xbf16> -> vector<288x192xbf16>
    %96 = vector.extract_strided_slice %95 {offsets = [0, 0], sizes = [256, 192], strides = [1, 1]} : vector<288x192xbf16> to vector<256x192xbf16>
    %c0_34 = arith.constant 0 : index
    %c0_35 = arith.constant 0 : index
    %c0_36 = arith.constant 0 : index
    %97 = vector.load %arg4[%c0_34, %c0_35, %c0_36] : memref<3x192x128xbf16, #tpu.memory_space<vmem>>, vector<1x192x128xbf16>
    %98 = vector.shape_cast %97 : vector<1x192x128xbf16> to vector<192x128xbf16>
    %cst_37 = arith.constant dense<0.000000e+00> : vector<256x128xf32>
    %99 = tpu.matmul %96, %98, %cst_37 {dimension_numbers = #tpu.dot_dimension_numbers<[1], [0], [0], [1], [0, 0, 1, 1], [], []>} : vector<256x192xbf16>, vector<192x128xbf16>, vector<256x128xf32> -> vector<256x128xf32>
    %100 = vector.extract_strided_slice %95 {offsets = [16, 0], sizes = [256, 192], strides = [1, 1]} : vector<288x192xbf16> to vector<256x192xbf16>
    %c1_38 = arith.constant 1 : index
    %c0_39 = arith.constant 0 : index
    %c0_40 = arith.constant 0 : index
    %101 = vector.load %arg4[%c1_38, %c0_39, %c0_40] : memref<3x192x128xbf16, #tpu.memory_space<vmem>>, vector<1x192x128xbf16>
    %102 = vector.shape_cast %101 : vector<1x192x128xbf16> to vector<192x128xbf16>
    %cst_41 = arith.constant dense<0.000000e+00> : vector<256x128xf32>
    %103 = tpu.matmul %100, %102, %cst_41 {dimension_numbers = #tpu.dot_dimension_numbers<[1], [0], [0], [1], [0, 0, 1, 1], [], []>} : vector<256x192xbf16>, vector<192x128xbf16>, vector<256x128xf32> -> vector<256x128xf32>
    %104 = arith.addf %99, %103 : vector<256x128xf32>
    %105 = vector.extract_strided_slice %95 {offsets = [32, 0], sizes = [256, 192], strides = [1, 1]} : vector<288x192xbf16> to vector<256x192xbf16>
    %c2_42 = arith.constant 2 : index
    %c0_43 = arith.constant 0 : index
    %c0_44 = arith.constant 0 : index
    %106 = vector.load %arg4[%c2_42, %c0_43, %c0_44] : memref<3x192x128xbf16, #tpu.memory_space<vmem>>, vector<1x192x128xbf16>
    %107 = vector.shape_cast %106 : vector<1x192x128xbf16> to vector<192x128xbf16>
    %cst_45 = arith.constant dense<0.000000e+00> : vector<256x128xf32>
    %108 = tpu.matmul %105, %107, %cst_45 {dimension_numbers = #tpu.dot_dimension_numbers<[1], [0], [0], [1], [0, 0, 1, 1], [], []>} : vector<256x192xbf16>, vector<192x128xbf16>, vector<256x128xf32> -> vector<256x128xf32>
    %109 = arith.addf %104, %108 : vector<256x128xf32>
    %110 = vector.shape_cast %109 : vector<256x128xf32> to vector<8x2x8x256xf32>
    %111 = vector.extract_strided_slice %110 {offsets = [0, 0, 0, 0], sizes = [8, 1, 8, 256], strides = [1, 1, 1, 1]} : vector<8x2x8x256xf32> to vector<8x1x8x256xf32>
    %112 = vector.shape_cast %111 : vector<8x1x8x256xf32> to vector<8x8x256xf32>
    %113 = vector.extract_strided_slice %110 {offsets = [0, 1, 0, 0], sizes = [8, 1, 8, 256], strides = [1, 1, 1, 1]} : vector<8x2x8x256xf32> to vector<8x1x8x256xf32>
    %114 = vector.shape_cast %113 : vector<8x1x8x256xf32> to vector<8x8x256xf32>
    %115 = vector.extract_strided_slice %112 {offsets = [0, 0, 0], sizes = [8, 8, 128], strides = [1, 1, 1]} : vector<8x8x256xf32> to vector<8x8x128xf32>
    %116 = vector.extract_strided_slice %112 {offsets = [0, 0, 128], sizes = [8, 8, 128], strides = [1, 1, 1]} : vector<8x8x256xf32> to vector<8x8x128xf32>
    %117 = arith.maximumf %115, %116 : vector<8x8x128xf32>
    %118 = vector.extract_strided_slice %114 {offsets = [0, 0, 0], sizes = [8, 8, 128], strides = [1, 1, 1]} : vector<8x8x256xf32> to vector<8x8x128xf32>
    %119 = vector.extract_strided_slice %114 {offsets = [0, 0, 128], sizes = [8, 8, 128], strides = [1, 1, 1]} : vector<8x8x256xf32> to vector<8x8x128xf32>
    %120 = arith.maximumf %118, %119 : vector<8x8x128xf32>
    %121 = arith.maximumf %117, %120 : vector<8x8x128xf32>
    %122 = vector.shape_cast %121 : vector<8x8x128xf32> to vector<64x128xf32>
    %c0_46 = arith.constant 0 : index
    %c0_47 = arith.constant 0 : index
    %123 = vector.load %arg5[%c0_46, %c0_47] : memref<1x128xf32, #tpu.memory_space<vmem>>, vector<1x128xf32>
    %124 = vector.broadcast %123 : vector<1x128xf32> to vector<64x128xf32>
    %125 = arith.mulf %122, %124 : vector<64x128xf32>
    %c0_48 = arith.constant 0 : index
    %c0_49 = arith.constant 0 : index
    %126 = vector.load %arg6[%c0_48, %c0_49] : memref<1x128xf32, #tpu.memory_space<vmem>>, vector<1x128xf32>
    %127 = vector.broadcast %126 : vector<1x128xf32> to vector<64x128xf32>
    %128 = arith.addf %125, %127 : vector<64x128xf32>
    %cst_50 = arith.constant 0.000000e+00 : f32
    %129 = vector.broadcast %cst_50 : f32 to vector<64x128xf32>
    %130 = arith.maximumf %128, %129 : vector<64x128xf32>
    %131 = arith.truncf %130 : vector<64x128xf32> to vector<64x128xbf16>
    %cst_51 = arith.constant 0.000000e+00 : bf16
    %132 = vector.broadcast %cst_51 : bf16 to vector<8x128xbf16>
    %133 = tpu.concatenate %132, %131, %132 in 0 : vector<8x128xbf16>, vector<64x128xbf16>, vector<8x128xbf16> -> vector<80x128xbf16>
    %cst_52 = arith.constant 0.000000e+00 : bf16
    %134 = vector.broadcast %cst_52 : bf16 to vector<1x128xbf16>
    %135 = vector.extract_strided_slice %133 {offsets = [0, 0], sizes = [79, 128], strides = [1, 1]} : vector<80x128xbf16> to vector<79x128xbf16>
    %136 = tpu.concatenate %134, %135 in 0 : vector<1x128xbf16>, vector<79x128xbf16> -> vector<80x128xbf16>
    %137 = vector.extract_strided_slice %133 {offsets = [1, 0], sizes = [79, 128], strides = [1, 1]} : vector<80x128xbf16> to vector<79x128xbf16>
    %138 = tpu.concatenate %137, %134 in 0 : vector<79x128xbf16>, vector<1x128xbf16> -> vector<80x128xbf16>
    %139 = tpu.iota {dimensions = array<i32: 0>} : vector<80x1xi32>
    %c8_i32 = arith.constant 8 : i32
    %c0_i32_53 = arith.constant 0 : i32
    %140 = arith.cmpi eq, %c8_i32, %c0_i32_53 : i32
    %c1_i32_54 = arith.constant 1 : i32
    %141 = arith.select %140, %c1_i32_54, %c8_i32 : i32
    %142 = vector.broadcast %141 : i32 to vector<80x1xi32>
    %143 = arith.remsi %139, %142 : vector<80x1xi32>
    %c0_i32_55 = arith.constant 0 : i32
    %144 = vector.broadcast %c0_i32_55 : i32 to vector<80x1xi32>
    %145 = arith.cmpi ne, %143, %144 : vector<80x1xi32>
    %c0_i32_56 = arith.constant 0 : i32
    %146 = vector.broadcast %c0_i32_56 : i32 to vector<80x1xi32>
    %147 = arith.cmpi slt, %143, %146 : vector<80x1xi32>
    %c0_i32_57 = arith.constant 0 : i32
    %148 = arith.cmpi slt, %141, %c0_i32_57 : i32
    %149 = vector.broadcast %148 : i1 to vector<80x1xi1>
    %150 = vector.broadcast %149 : vector<80x1xi1> to vector<80x1xi1>
    %151 = arith.xori %147, %150 : vector<80x1xi1>
    %152 = arith.andi %151, %145 : vector<80x1xi1>
    %153 = vector.broadcast %141 : i32 to vector<80x1xi32>
    %154 = arith.addi %143, %153 : vector<80x1xi32>
    %155 = arith.select %152, %154, %143 : vector<80x1xi1>, vector<80x1xi32>
    %c0_i32_58 = arith.constant 0 : i32
    %156 = vector.broadcast %c0_i32_58 : i32 to vector<80x1xi32>
    %157 = arith.cmpi ne, %155, %156 : vector<80x1xi32>
    %cst_59 = arith.constant 0.000000e+00 : bf16
    %158 = vector.broadcast %cst_59 : bf16 to vector<80x128xbf16>
    %159 = vector.shape_cast %157 : vector<80x1xi1> to vector<80x1xi1>
    %160 = vector.broadcast %159 : vector<80x1xi1> to vector<80x128xi1>
    %161 = arith.select %160, %136, %158 : vector<80x128xi1>, vector<80x128xbf16>
    %c7_i32 = arith.constant 7 : i32
    %162 = vector.broadcast %c7_i32 : i32 to vector<80x1xi32>
    %163 = arith.cmpi ne, %155, %162 : vector<80x1xi32>
    %cst_60 = arith.constant 0.000000e+00 : bf16
    %164 = vector.broadcast %cst_60 : bf16 to vector<80x128xbf16>
    %165 = vector.shape_cast %163 : vector<80x1xi1> to vector<80x1xi1>
    %166 = vector.broadcast %165 : vector<80x1xi1> to vector<80x128xi1>
    %167 = arith.select %166, %138, %164 : vector<80x128xi1>, vector<80x128xbf16>
    %168 = tpu.concatenate %161, %133, %167 in 1 : vector<80x128xbf16>, vector<80x128xbf16>, vector<80x128xbf16> -> vector<80x384xbf16>
    %169 = vector.extract_strided_slice %168 {offsets = [0, 0], sizes = [64, 384], strides = [1, 1]} : vector<80x384xbf16> to vector<64x384xbf16>
    %c0_61 = arith.constant 0 : index
    %c0_62 = arith.constant 0 : index
    %c0_63 = arith.constant 0 : index
    %170 = vector.load %arg7[%c0_61, %c0_62, %c0_63] : memref<3x384x128xbf16, #tpu.memory_space<vmem>>, vector<1x384x128xbf16>
    %171 = vector.shape_cast %170 : vector<1x384x128xbf16> to vector<384x128xbf16>
    %cst_64 = arith.constant dense<0.000000e+00> : vector<64x128xf32>
    %172 = tpu.matmul %169, %171, %cst_64 {dimension_numbers = #tpu.dot_dimension_numbers<[1], [0], [0], [1], [0, 0, 1, 1], [], []>} : vector<64x384xbf16>, vector<384x128xbf16>, vector<64x128xf32> -> vector<64x128xf32>
    %173 = vector.extract_strided_slice %168 {offsets = [8, 0], sizes = [64, 384], strides = [1, 1]} : vector<80x384xbf16> to vector<64x384xbf16>
    %c1_65 = arith.constant 1 : index
    %c0_66 = arith.constant 0 : index
    %c0_67 = arith.constant 0 : index
    %174 = vector.load %arg7[%c1_65, %c0_66, %c0_67] : memref<3x384x128xbf16, #tpu.memory_space<vmem>>, vector<1x384x128xbf16>
    %175 = vector.shape_cast %174 : vector<1x384x128xbf16> to vector<384x128xbf16>
    %cst_68 = arith.constant dense<0.000000e+00> : vector<64x128xf32>
    %176 = tpu.matmul %173, %175, %cst_68 {dimension_numbers = #tpu.dot_dimension_numbers<[1], [0], [0], [1], [0, 0, 1, 1], [], []>} : vector<64x384xbf16>, vector<384x128xbf16>, vector<64x128xf32> -> vector<64x128xf32>
    %177 = arith.addf %172, %176 : vector<64x128xf32>
    %178 = vector.extract_strided_slice %168 {offsets = [16, 0], sizes = [64, 384], strides = [1, 1]} : vector<80x384xbf16> to vector<64x384xbf16>
    %c2_69 = arith.constant 2 : index
    %c0_70 = arith.constant 0 : index
    %c0_71 = arith.constant 0 : index
    %179 = vector.load %arg7[%c2_69, %c0_70, %c0_71] : memref<3x384x128xbf16, #tpu.memory_space<vmem>>, vector<1x384x128xbf16>
    %180 = vector.shape_cast %179 : vector<1x384x128xbf16> to vector<384x128xbf16>
    %cst_72 = arith.constant dense<0.000000e+00> : vector<64x128xf32>
    %181 = tpu.matmul %178, %180, %cst_72 {dimension_numbers = #tpu.dot_dimension_numbers<[1], [0], [0], [1], [0, 0, 1, 1], [], []>} : vector<64x384xbf16>, vector<384x128xbf16>, vector<64x128xf32> -> vector<64x128xf32>
    %182 = arith.addf %177, %181 : vector<64x128xf32>
    %c0_73 = arith.constant 0 : index
    %c0_74 = arith.constant 0 : index
    %183 = vector.load %arg8[%c0_73, %c0_74] : memref<1x128xf32, #tpu.memory_space<vmem>>, vector<1x128xf32>
    %184 = vector.broadcast %183 : vector<1x128xf32> to vector<64x128xf32>
    %185 = arith.addf %182, %184 : vector<64x128xf32>
    %cst_75 = arith.constant 0.000000e+00 : f32
    %186 = vector.broadcast %cst_75 : f32 to vector<64x128xf32>
    %187 = arith.maximumf %185, %186 : vector<64x128xf32>
    %188 = arith.truncf %187 : vector<64x128xf32> to vector<64x128xbf16>
    %cst_76 = arith.constant 0.000000e+00 : bf16
    %189 = vector.broadcast %cst_76 : bf16 to vector<8x128xbf16>
    %190 = tpu.concatenate %189, %188, %189 in 0 : vector<8x128xbf16>, vector<64x128xbf16>, vector<8x128xbf16> -> vector<80x128xbf16>
    %cst_77 = arith.constant 0.000000e+00 : bf16
    %191 = vector.broadcast %cst_77 : bf16 to vector<1x128xbf16>
    %192 = vector.extract_strided_slice %190 {offsets = [0, 0], sizes = [79, 128], strides = [1, 1]} : vector<80x128xbf16> to vector<79x128xbf16>
    %193 = tpu.concatenate %191, %192 in 0 : vector<1x128xbf16>, vector<79x128xbf16> -> vector<80x128xbf16>
    %194 = vector.extract_strided_slice %190 {offsets = [1, 0], sizes = [79, 128], strides = [1, 1]} : vector<80x128xbf16> to vector<79x128xbf16>
    %195 = tpu.concatenate %194, %191 in 0 : vector<79x128xbf16>, vector<1x128xbf16> -> vector<80x128xbf16>
    %196 = tpu.iota {dimensions = array<i32: 0>} : vector<80x1xi32>
    %c8_i32_78 = arith.constant 8 : i32
    %c0_i32_79 = arith.constant 0 : i32
    %197 = arith.cmpi eq, %c8_i32_78, %c0_i32_79 : i32
    %c1_i32_80 = arith.constant 1 : i32
    %198 = arith.select %197, %c1_i32_80, %c8_i32_78 : i32
    %199 = vector.broadcast %198 : i32 to vector<80x1xi32>
    %200 = arith.remsi %196, %199 : vector<80x1xi32>
    %c0_i32_81 = arith.constant 0 : i32
    %201 = vector.broadcast %c0_i32_81 : i32 to vector<80x1xi32>
    %202 = arith.cmpi ne, %200, %201 : vector<80x1xi32>
    %c0_i32_82 = arith.constant 0 : i32
    %203 = vector.broadcast %c0_i32_82 : i32 to vector<80x1xi32>
    %204 = arith.cmpi slt, %200, %203 : vector<80x1xi32>
    %c0_i32_83 = arith.constant 0 : i32
    %205 = arith.cmpi slt, %198, %c0_i32_83 : i32
    %206 = vector.broadcast %205 : i1 to vector<80x1xi1>
    %207 = vector.broadcast %206 : vector<80x1xi1> to vector<80x1xi1>
    %208 = arith.xori %204, %207 : vector<80x1xi1>
    %209 = arith.andi %208, %202 : vector<80x1xi1>
    %210 = vector.broadcast %198 : i32 to vector<80x1xi32>
    %211 = arith.addi %200, %210 : vector<80x1xi32>
    %212 = arith.select %209, %211, %200 : vector<80x1xi1>, vector<80x1xi32>
    %c0_i32_84 = arith.constant 0 : i32
    %213 = vector.broadcast %c0_i32_84 : i32 to vector<80x1xi32>
    %214 = arith.cmpi ne, %212, %213 : vector<80x1xi32>
    %cst_85 = arith.constant 0.000000e+00 : bf16
    %215 = vector.broadcast %cst_85 : bf16 to vector<80x128xbf16>
    %216 = vector.shape_cast %214 : vector<80x1xi1> to vector<80x1xi1>
    %217 = vector.broadcast %216 : vector<80x1xi1> to vector<80x128xi1>
    %218 = arith.select %217, %193, %215 : vector<80x128xi1>, vector<80x128xbf16>
    %c7_i32_86 = arith.constant 7 : i32
    %219 = vector.broadcast %c7_i32_86 : i32 to vector<80x1xi32>
    %220 = arith.cmpi ne, %212, %219 : vector<80x1xi32>
    %cst_87 = arith.constant 0.000000e+00 : bf16
    %221 = vector.broadcast %cst_87 : bf16 to vector<80x128xbf16>
    %222 = vector.shape_cast %220 : vector<80x1xi1> to vector<80x1xi1>
    %223 = vector.broadcast %222 : vector<80x1xi1> to vector<80x128xi1>
    %224 = arith.select %223, %195, %221 : vector<80x128xi1>, vector<80x128xbf16>
    %225 = tpu.concatenate %218, %190, %224 in 1 : vector<80x128xbf16>, vector<80x128xbf16>, vector<80x128xbf16> -> vector<80x384xbf16>
    %226 = vector.extract_strided_slice %225 {offsets = [0, 0], sizes = [64, 384], strides = [1, 1]} : vector<80x384xbf16> to vector<64x384xbf16>
    %c0_88 = arith.constant 0 : index
    %c0_89 = arith.constant 0 : index
    %c0_90 = arith.constant 0 : index
    %227 = vector.load %arg9[%c0_88, %c0_89, %c0_90] : memref<3x384x128xbf16, #tpu.memory_space<vmem>>, vector<1x384x128xbf16>
    %228 = vector.shape_cast %227 : vector<1x384x128xbf16> to vector<384x128xbf16>
    %cst_91 = arith.constant dense<0.000000e+00> : vector<64x128xf32>
    %229 = tpu.matmul %226, %228, %cst_91 {dimension_numbers = #tpu.dot_dimension_numbers<[1], [0], [0], [1], [0, 0, 1, 1], [], []>} : vector<64x384xbf16>, vector<384x128xbf16>, vector<64x128xf32> -> vector<64x128xf32>
    %230 = vector.extract_strided_slice %225 {offsets = [8, 0], sizes = [64, 384], strides = [1, 1]} : vector<80x384xbf16> to vector<64x384xbf16>
    %c1_92 = arith.constant 1 : index
    %c0_93 = arith.constant 0 : index
    %c0_94 = arith.constant 0 : index
    %231 = vector.load %arg9[%c1_92, %c0_93, %c0_94] : memref<3x384x128xbf16, #tpu.memory_space<vmem>>, vector<1x384x128xbf16>
    %232 = vector.shape_cast %231 : vector<1x384x128xbf16> to vector<384x128xbf16>
    %cst_95 = arith.constant dense<0.000000e+00> : vector<64x128xf32>
    %233 = tpu.matmul %230, %232, %cst_95 {dimension_numbers = #tpu.dot_dimension_numbers<[1], [0], [0], [1], [0, 0, 1, 1], [], []>} : vector<64x384xbf16>, vector<384x128xbf16>, vector<64x128xf32> -> vector<64x128xf32>
    %234 = arith.addf %229, %233 : vector<64x128xf32>
    %235 = vector.extract_strided_slice %225 {offsets = [16, 0], sizes = [64, 384], strides = [1, 1]} : vector<80x384xbf16> to vector<64x384xbf16>
    %c2_96 = arith.constant 2 : index
    %c0_97 = arith.constant 0 : index
    %c0_98 = arith.constant 0 : index
    %236 = vector.load %arg9[%c2_96, %c0_97, %c0_98] : memref<3x384x128xbf16, #tpu.memory_space<vmem>>, vector<1x384x128xbf16>
    %237 = vector.shape_cast %236 : vector<1x384x128xbf16> to vector<384x128xbf16>
    %cst_99 = arith.constant dense<0.000000e+00> : vector<64x128xf32>
    %238 = tpu.matmul %235, %237, %cst_99 {dimension_numbers = #tpu.dot_dimension_numbers<[1], [0], [0], [1], [0, 0, 1, 1], [], []>} : vector<64x384xbf16>, vector<384x128xbf16>, vector<64x128xf32> -> vector<64x128xf32>
    %239 = arith.addf %234, %238 : vector<64x128xf32>
    %c0_100 = arith.constant 0 : index
    %c0_101 = arith.constant 0 : index
    %240 = vector.load %arg10[%c0_100, %c0_101] : memref<1x128xf32, #tpu.memory_space<vmem>>, vector<1x128xf32>
    %241 = vector.broadcast %240 : vector<1x128xf32> to vector<64x128xf32>
    %242 = arith.addf %239, %241 : vector<64x128xf32>
    %cst_102 = arith.constant 0.000000e+00 : f32
    %243 = vector.broadcast %cst_102 : f32 to vector<64x128xf32>
    %244 = arith.maximumf %242, %243 : vector<64x128xf32>
    %245 = arith.addf %244, %130 : vector<64x128xf32>
    %cst_103 = arith.constant 0.000000e+00 : f32
    %246 = vector.broadcast %cst_103 : f32 to vector<64x128xf32>
    %247 = arith.maximumf %245, %246 : vector<64x128xf32>
    %cst_104 = arith.constant dense<0.000000e+00> : vector<128xf32>
    %248 = vector.multi_reduction <add>, %247, %cst_104 [0] : vector<64x128xf32> to vector<128xf32>
    %249 = vector.shape_cast %248 : vector<128xf32> to vector<1x128xf32>
    %cst_105 = arith.constant 1.562500e-02 : f32
    %250 = vector.broadcast %cst_105 : f32 to vector<1x128xf32>
    %251 = arith.mulf %249, %250 : vector<1x128xf32>
    %c0_106 = arith.constant 0 : index
    %c0_107 = arith.constant 0 : index
    %252 = vector.load %arg11[%c0_106, %c0_107] : memref<128x128xf32, #tpu.memory_space<vmem>>, vector<128x128xf32>
    %cst_108 = arith.constant dense<0.000000e+00> : vector<1x128xf32>
    %253 = tpu.matmul %251, %252, %cst_108 {dimension_numbers = #tpu.dot_dimension_numbers<[1], [0], [0], [1], [0, 0, 1, 1], [], []>} : vector<1x128xf32>, vector<128x128xf32>, vector<1x128xf32> -> vector<1x128xf32>
    %c0_109 = arith.constant 0 : index
    %c0_110 = arith.constant 0 : index
    %254 = vector.load %arg12[%c0_109, %c0_110] : memref<1x128xf32, #tpu.memory_space<vmem>>, vector<1x128xf32>
    %255 = arith.addf %253, %254 : vector<1x128xf32>
    %c0_111 = arith.constant 0 : index
    %c0_112 = arith.constant 0 : index
    %c0_113 = arith.constant 0 : index
    %256 = vector.load %arg13[%c0_111, %c0_112, %c0_113] : memref<1x1x128xf32, #tpu.memory_space<vmem>>, vector<1x1x128xf32>
    %257 = vector.shape_cast %256 : vector<1x1x128xf32> to vector<1x128xf32>
    %258 = vector.shape_cast %255 : vector<1x128xf32> to vector<1x1x128xf32>
    tpu.vector_store %arg13[%c0_111, %c0_112, %c0_113], %258 {strides = array<i32>} : memref<1x1x128xf32, #tpu.memory_space<vmem>>, vector<1x1x128xf32>,
    return
  }
  func.func @transform_0(%arg0: i32) -> (i32, i32, i32) {
    %c0_i32 = arith.constant 0 : i32
    %c0_i32_0 = arith.constant 0 : i32
    %c0_i32_1 = arith.constant 0 : i32
    return %arg0, %c0_i32, %c0_i32_0 : i32, i32, i32
  }
  func.func @transform_1(%arg0: i32) -> (i32, i32, i32) {
    %c0_i32 = arith.constant 0 : i32
    %c0_i32_0 = arith.constant 0 : i32
    %c0_i32_1 = arith.constant 0 : i32
    %c0_i32_2 = arith.constant 0 : i32
    return %c0_i32, %c0_i32_0, %c0_i32_1 : i32, i32, i32
  }
  func.func @transform_2(%arg0: i32) -> (i32, i32) {
    %c0_i32 = arith.constant 0 : i32
    %c0_i32_0 = arith.constant 0 : i32
    %c0_i32_1 = arith.constant 0 : i32
    return %c0_i32, %c0_i32_0 : i32, i32
  }
  func.func @transform_3(%arg0: i32) -> (i32, i32, i32) {
    %c0_i32 = arith.constant 0 : i32
    %c0_i32_0 = arith.constant 0 : i32
    %c0_i32_1 = arith.constant 0 : i32
    %c0_i32_2 = arith.constant 0 : i32
    return %c0_i32, %c0_i32_0, %c0_i32_1 : i32, i32, i32
  }
  func.func @transform_4(%arg0: i32) -> (i32, i32) {
    %c0_i32 = arith.constant 0 : i32
    %c0_i32_0 = arith.constant 0 : i32
    %c0_i32_1 = arith.constant 0 : i32
    return %c0_i32, %c0_i32_0 : i32, i32
  }
  func.func @transform_5(%arg0: i32) -> (i32, i32) {
    %c0_i32 = arith.constant 0 : i32
    %c0_i32_0 = arith.constant 0 : i32
    %c0_i32_1 = arith.constant 0 : i32
    return %c0_i32, %c0_i32_0 : i32, i32
  }
  func.func @transform_6(%arg0: i32) -> (i32, i32, i32) {
    %c0_i32 = arith.constant 0 : i32
    %c0_i32_0 = arith.constant 0 : i32
    %c0_i32_1 = arith.constant 0 : i32
    %c0_i32_2 = arith.constant 0 : i32
    return %c0_i32, %c0_i32_0, %c0_i32_1 : i32, i32, i32
  }
  func.func @transform_7(%arg0: i32) -> (i32, i32) {
    %c0_i32 = arith.constant 0 : i32
    %c0_i32_0 = arith.constant 0 : i32
    %c0_i32_1 = arith.constant 0 : i32
    return %c0_i32, %c0_i32_0 : i32, i32
  }
  func.func @transform_8(%arg0: i32) -> (i32, i32, i32) {
    %c0_i32 = arith.constant 0 : i32
    %c0_i32_0 = arith.constant 0 : i32
    %c0_i32_1 = arith.constant 0 : i32
    %c0_i32_2 = arith.constant 0 : i32
    return %c0_i32, %c0_i32_0, %c0_i32_1 : i32, i32, i32
  }
  func.func @transform_9(%arg0: i32) -> (i32, i32) {
    %c0_i32 = arith.constant 0 : i32
    %c0_i32_0 = arith.constant 0 : i32
    %c0_i32_1 = arith.constant 0 : i32
    return %c0_i32, %c0_i32_0 : i32, i32
  }
  func.func @transform_10(%arg0: i32) -> (i32, i32) {
    %c0_i32 = arith.constant 0 : i32
    %c0_i32_0 = arith.constant 0 : i32
    %c0_i32_1 = arith.constant 0 : i32
    return %c0_i32, %c0_i32_0 : i32, i32
  }
  func.func @transform_11(%arg0: i32) -> (i32, i32) {
    %c0_i32 = arith.constant 0 : i32
    %c0_i32_0 = arith.constant 0 : i32
    %c0_i32_1 = arith.constant 0 : i32
    return %c0_i32, %c0_i32_0 : i32, i32
  }
  func.func @transform_12(%arg0: i32) -> (i32, i32, i32) {
    %c0_i32 = arith.constant 0 : i32
    %c0_i32_0 = arith.constant 0 : i32
    %c0_i32_1 = arith.constant 0 : i32
    return %arg0, %c0_i32, %c0_i32_0 : i32, i32, i32
  }
}

</mosaic_0001>

<bundles_post_ra>
// kernel: resnet5_forward.1
= control target key start
LH: loop header
LB: loop body
LE: loop exit
PB: predicated region body
PF: predicated region fallthrough
CT: control target
= control target key end

     0   :  { %s12071_s0 = inlined_call_operand.vmem [shape: bf16[2,256,4], index: 0, kind: input, shape index: {}]   ;;  %s12072_s1 = inlined_call_operand.vmem [shape: bf16[3,12,64], index: 1, kind: input, shape index: {}]   ;;  %s12073_s2 = inlined_call_operand.vmem [shape: f32[1,64], index: 2, kind: input, shape index: {}]   ;;  %s12074_s3 = inlined_call_operand.vmem [shape: bf16[3,192,128], index: 3, kind: input, shape index: {}]   ;;  %s12075_s4 = inlined_call_operand.vmem [shape: f32[1,128], index: 4, kind: input, shape index: {}]   ;;  %s12076_s5 = inlined_call_operand.vmem [shape: f32[1,128], index: 5, kind: input, shape index: {}]   ;;  %s12077_s6 = inlined_call_operand.vmem [shape: bf16[3,384,128], index: 6, kind: input, shape index: {}]   ;;  %s12078_s7 = inlined_call_operand.vmem [shape: f32[1,128], index: 7, kind: input, shape index: {}]   ;;  %s12079_s8 = inlined_call_operand.vmem [shape: bf16[3,384,128], index: 8, kind: input, shape index: {}]   ;;  %s12080_s9 = inlined_call_operand.vmem [shape: f32[1,128], index: 9, kind: input, shape index: {}]   ;;  %s12081_s10 = inlined_call_operand.vmem [shape: f32[128,128], index: 10, kind: input, shape index: {}]   ;;  %s12082_s11 = inlined_call_operand.vmem [shape: f32[1,128], index: 11, kind: input, shape index: {}]   ;;  %s12083_s12 = inlined_call_operand.hbm [shape: f32[2,1,128], index: 12, kind: output, shape index: {}]  }
   0x1   :  { %12213 = sst [smem:[#allocation38_spill]] %s12071_s0 }
   0x2   :  { %12214 = sst [smem:[#allocation39_spill]] %s12072_s1 }
   0x3   :  { %12215 = sst [smem:[#allocation40_spill]] %s12073_s2 }
   0x4   :  { %17 = vsyncpa [#allocation3], 0 }
   0x5   :  { %19 = vsyncpa [#allocation3 + $0x1], 0  ;;  %s8560_s21 = smov 0   ;;  %s8562_s22 = smov 0  }
   0x6   :  { %s8564_s23 = smov 0   ;;  %s8566_s24 = smov 0  }
   0x7 LB: > { %s8581_s25 = sadd.s32 4294967295, %s8487_s24   ;;  %s6914_s26 = sadd.s32 4294967294, %s8487_s24   ;;  %s8487_s24 = sphi %s8566_s24, %s12675_s24   ;;  %s8483_s23 = sphi %s8564_s23, %s12674_s23   ;;  %s8479_s22 = sphi %s8562_s22, %s12673_s22   ;;  %s8475_s21 = sphi %s8560_s21, %s12672_s21  }
   0x8   : > { %s8585_s27 = sadd.s32 1, %s8487_s24   ;;  %s289_s28 = sadd.s32 1, %s8483_s23 }
   0x9   : > { %s286_s29 = ssub.s32 %s8487_s24, %s8585_s27  ;;  %p299_p0 = scmp.ne.s32.totalorder %s8483_s23, %s8479_s22 }
   0xa   : > { %p287_p1 = scmp.eq.s32.totalorder %s286_s29, 0  ;;  %p300_p2 = scmp.eq.s32.totalorder %s8581_s25, 1 }
   0xb   : > { %p305_p3 = scmp.ne.s32.totalorder %s8479_s22, %s8475_s21  ;;  %p306_p4 = scmp.eq.s32.totalorder %s6914_s26, 1 }
   0xc   : > { %s8596_s30 = scalar_select %p287_p1, %s8483_s23, %s289_s28  }
   0xd   : > { %p8598_p5 = por %p300_p2, %p299_p0  ;;  %p8602_p6 = por %p306_p4, %p305_p3 }
   0xe   : > { %p6917_p7 = scmp.ge.s32.totalorder %s8487_s24, 1  ;;  %p365_p8 = scmp.lt.s32.totalorder %s8487_s24, 3 }
  0x10   : > { %p366_p9 = pnand %p6917_p7, %p365_p8 }
  0x12   : > { %369 = sbr.rel (%p366_p9) target bundleno = 1861 (0x745), region = 68 }
  0x17   : > { %p406_p10 = scmp.lt.s32.totalorder %s8581_s25, 1  ;;  %v757_v0 = vlaneseq  ;;  %vm8489_vm0 = vmmov 1   ;;  %v12158_v2 = vmov 0   ;;  %s12221_s0 = sld [smem:[#allocation38_spill]]  ;;  %vm12093_vm2 = vsmask.f32 7424 }
  0x18   : > { %vm1335_vm1 = vmpackc.low %vm8489_vm0, %vm8489_vm0  ;;  %s12086_s20 = smov 4   ;;  %v8648_v18 = vunpack.c.l.b16 %v12158_v2  ;;  %v8666_v24 = vunpack.c.h.b16 %v12158_v2  ;;  %s12084_s26 = smov 8   ;;  %v8735_v60 = vrot.slane %v12158_v2, 1 }
  0x19   : > { %s407_s15 = scalar_select %p406_p10, %s8581_s25, 1  ;;  %v8610_v1 = vshrl.u32 %v757_v0, 7  ;;  %v1371_v3 = vsel %vm1335_vm1, 65537, %v12158_v2 }
  0x1a   : > { %v1407_v10 = vunpack.c.l.b16 %v1371_v3  ;;  %12223 = vst [vmem:[#allocation9_spill] sm:$0xff] %v8648_v18  ;;  %s12245_s1 = sld [smem:[#allocation39_spill]]  ;;  %s8493_s17 = smov 64  }
  0x1b   : > { %12218 = vst [vmem:[#allocation5_spill] sm:$0xff] %v8610_v1  ;;  %s8156_s16 = sshll.u32 %s407_s15, 7  ;;  %v8614_v4 = vadd.s32 40, %v8610_v1  ;;  %v8617_v5 = vadd.s32 24, %v8610_v1  ;;  %v8636_v12 = vadd.s32 72, %v8610_v1  ;;  %v8687_v36 = vadd.s32 8, %v8610_v1 }
  0x1c   : > { %v8657_v21 = vunpack.i.l.s16 %v1407_v10  ;;  %12224 = vst [vmem:[#allocation10_spill] sm:$0xff] %v8666_v24  ;;  %v8690_v37 = vadd.s32 56, %v8610_v1  ;;  %s12392_s2 = sld [smem:[#allocation40_spill]]  ;;  %s404_s28 = sand.u32 1, %s8479_s22  }
  0x1d   : > { %12219 = vst [vmem:[#allocation6_spill] sm:$0xff] %v8614_v4  ;;  %s8622_s19 = scalar_lea.vmem %s12221_s0, %s8156_s16  ;;  %v833_v9 = vand.u32 15, %v8614_v4  ;;  %v819_v11 = vand.u32 15, %v8617_v5  ;;  %v861_v26 = vand.u32 15, %v8636_v12  ;;  %v805_v47 = vand.u32 15, %v8687_v36  ;;  %s12257_s16 = smov 8  }
  0x1e   : > { %12220 = vst [vmem:[#allocation7_spill] sm:$0xff] %v8617_v5  ;;  %v8625_v6 = vld [vmem:[%s8622_s19 + $0x8] sm:$0xff]  ;;  %v8628_v7 = vld [vmem:[%s8622_s19] sm:$0xff]  ;;  %v8631_v8 = vld [vmem:[%s8622_s19 + $0x10] sm:$0xff]  ;;  %vm8682_vm7 = vcmp.ne.s32.totalorder %v8657_v21, %v8648_v18  ;;  %v847_v49 = vand.u32 15, %v8690_v37  ;;  %s8445_s15 = scalar_lea.hbm %s12083_s12, 2 }
  0x1f   : > { %12222 = vst [vmem:[#allocation8_spill] sm:$0xff] %v8636_v12  ;;  %1987 = vrot.lane.b32.xlu1 %v8625_v6, %s12086_s20  ;;  %v543_v13 = vshrl.u32 %v8625_v6, 16  ;;  %v546_v14 = vshll.u32 %v8625_v6, 16  ;;  %1985 = vrot.lane.b32.xlu0 %v8628_v7, %s12086_s20  ;;  %v535_v15 = vshrl.u32 %v8628_v7, 16  ;;  %v538_v16 = vshll.u32 %v8628_v7, 16  ;;  %v8651_v19 = vld [vmem:[%s8622_s19 + $0x18] sm:$0xff] }
  0x20   : > { %v554_v17 = vshll.u32 %v8631_v8, 16  ;;  %vm1609_vm3 = vcmp.ne.s32.totalorder %v833_v9, 15  ;;  %1989 = vrot.lane.b32.xlu2 %v8631_v8, %s12086_s20  ;;  %vm1607_vm5 = vcmp.ne.s32.totalorder %v819_v11, 15  ;;  %v8677_v31 = vld [vmem:[%s8622_s19 + $0x20] sm:$0xff]  ;;  %v562_v33 = vshll.u32 %v8651_v19, 16  ;;  %12227 = vst [vmem:[#allocation11_spill] sm:$0xff] %v8687_v36 }
  0x21   : > { %v690_v20 = vrot.slane %v546_v14, 1  ;;  %vm1717_vm4 = vmpackc.low %vm1609_vm3, %vm1609_vm3  ;;  %v8661_v22 = vrot.slane %v538_v16, 1  ;;  %12228 = vst [vmem:[#allocation12_spill] sm:$0xff] %v8690_v37  ;;  %v559_v41 = vshrl.u32 %v8651_v19, 16  ;;  %v570_v42 = vshll.u32 %v8677_v31, 16  ;;  %v8730_v56 = vld [vmem:[%s8622_s19 + $0x28] sm:$0xff] }
  0x22   : > { %v693_v23 = vrot.slane %v554_v17, 1  ;;  %v1753_v25 = vsel %vm1717_vm4, 65537, %v12158_v2  ;;  %vm1715_vm6 = vmpackc.low %vm1607_vm5, %vm1607_vm5  ;;  %v696_v43 = vrot.slane %v562_v33, 1  ;;  %vm1613_vm9 = vcmp.ne.s32.totalorder %v861_v26, 15  ;;  %v8742_v0 = vld [vmem:[%s8622_s19 + $0x30] sm:$0xff] }
  0x23   : > { %v692_v27 = vor.u32 %v690_v20, %v543_v13  ;;  %v1789_v28 = vunpack.c.l.b16 %v1753_v25  ;;  %v689_v29 = vor.u32 %v8661_v22, %v535_v15  ;;  %v1751_v30 = vsel %vm1715_vm6, 65537, %v12158_v2  ;;  %vm1721_vm13 = vmpackc.low %vm1613_vm9, %vm1613_vm9 }
  0x24   : > { %v1787_v32 = vunpack.c.l.b16 %v1751_v30  ;;  %v698_v50 = vor.u32 %v696_v43, %v559_v41  ;;  %v8724_v51 = vrot.slane %v570_v42, 1  ;;  %v1757_v52 = vsel %vm1721_vm13, 65537, %v12158_v2 }
  0x25   : > { %v7025_v35 = vunpack.i.l.s16 %v1789_v28  ;;  %v694_v38 = vsel %vm12093_vm2, %v692_v27, %v693_v23  ;;  %v691_v39 = vsel %vm12093_vm2, %v689_v29, %v690_v20  ;;  %vm1605_vm14 = vcmp.ne.s32.totalorder %v805_v47, 15 }
  0x26   : > { %v7023_v40 = vunpack.i.l.s16 %v1787_v32  ;;  %v1793_v53 = vunpack.c.l.b16 %v1757_v52  ;;  %vm1713_vm15 = vmpackc.low %vm1605_vm14, %vm1605_vm14  ;;  %v551_v54 = vshrl.u32 %v8631_v8, 16  ;;  %vm1611_vm0 = vcmp.ne.s32.totalorder %v847_v49, 15  ;;  %v8793_v52 = vld [vmem:[%s8622_s19 + $0x38] sm:$0xff]  ;;  %v7102_v8 = vld [vmem:[%s12245_s1 + $0x10] sm:$0xf] }
  0x27   : > { %vm1857_vm8 = vcmp.ne.s32.totalorder %v7025_v35, %v8666_v24  ;;  %v1749_v55 = vsel %vm1713_vm15, 65537, %v12158_v2  ;;  %v700_v59 = vsel %vm12093_vm2, %v698_v50, %v8724_v51  ;;  %vm1719_vm1 = vmpackc.low %vm1611_vm0, %vm1611_vm0  ;;  %v12109_v10 = vshll.u32 %v8730_v56, 16 }
  0x28   : > { %vm8701_vm10 = vmpackc.low %vm1857_vm8, %vm8682_vm7  ;;  %vm1850_vm11 = vcmp.ne.s32.totalorder %v7023_v40, %v8666_v24  ;;  %v7029_v57 = vunpack.i.l.s16 %v1793_v53  ;;  %v1785_v58 = vunpack.c.l.b16 %v1749_v55  ;;  %v695_v62 = vor.u32 %v693_v23, %v551_v54 }
  0x29   : > { %v1966_v45 = vsel %vm8701_vm10, %v694_v38, 0  ;;  %vm8710_vm12 = vmpackc.low %vm1850_vm11, %vm8682_vm7  ;;  %v1755_v63 = vsel %vm1719_vm1, 65537, %v12158_v2  ;;  %v771_v11 = vadd.s32 104, %v8610_v1  ;;  %v769_v23 = vadd.s32 88, %v8610_v1 }
  0x2a   : > { %2039 = vrot.lane.b32.xlu1 %v1966_v45, %s12084_s26  ;;  %v1965_v48 = vsel %vm8710_vm12, %v691_v39, 0  ;;  %vm1871_vm3 = vcmp.ne.s32.totalorder %v7029_v57, %v8666_v24  ;;  %v7021_v61 = vunpack.i.l.s16 %v1785_v58  ;;  %v1791_v9 = vunpack.c.l.b16 %v1755_v63 }
  0x2b   : > { %2037 = vrot.lane.b32.xlu0 %v1965_v48, %s12084_s26  ;;  %vm8746_vm4 = vmpackc.low %vm1871_vm3, %vm8682_vm7  ;;  %v889_v26 = vand.u32 15, %v771_v11  ;;  %v688_v27 = vsel %vm12093_vm2, %v8735_v60, %v8661_v22  ;;  %v697_v28 = vsel %vm12093_vm2, %v695_v62, %v696_v43  ;;  %v12107_v29 = vshll.u32 %v8742_v0, 16 }
  0x2c   : > { %v1968_v20 = vsel %vm8746_vm4, %v700_v59, 0  ;;  %vm1843_vm5 = vcmp.ne.s32.totalorder %v7021_v61, %v8666_v24  ;;  %v7027_v25 = vunpack.i.l.s16 %v1791_v9  ;;  %v875_v30 = vand.u32 15, %v769_v23 }
  0x2d   : > { %vm8766_vm6 = vmpackc.low %vm1843_vm5, %vm8682_vm7  ;;  %v12235_v32 = vmov 0  ;;  %v12112_v35 = vshrl.u32 %v8730_v56, 16  ;;  %v702_v38 = vrot.slane %v12109_v10, 1  ;;  %vm1617_vm9 = vcmp.ne.s32.totalorder %v889_v26, 15  ;;  %v9113_v10 = vld [vmem:[%s8622_s19 + $0x58] sm:$0xff] }
  0x2e   : > { %v12236_v32 = vsel %vm8766_vm6, 4294967295, %v12235_v32  ;;  %vm1864_vm8 = vcmp.ne.s32.totalorder %v7027_v25, %v8666_v24  ;;  %vm1615_vm13 = vcmp.ne.s32.totalorder %v875_v30, 15  ;;  %vm1725_vm14 = vmpackc.low %vm1617_vm9, %vm1617_vm9  ;;  %v773_v40 = vadd.s32 120, %v8610_v1 }
  0x2f   : > { %vm8776_vm11 = vmpackc.low %vm1864_vm8, %vm8682_vm7  ;;  %v1964_v43 = vsel %vm8766_vm6, %v688_v27, 0  ;;  %v705_v45 = vrot.slane %v12107_v29, 1  ;;  %v1761_v47 = vsel %vm1725_vm14, 65537, %v12158_v2  ;;  %v704_v48 = vor.u32 %v702_v38, %v12112_v35 }
  0x30   : > { %v1967_v39 = vsel %vm8776_vm11, %v697_v28, 0  ;;  %vm1723_vm15 = vmpackc.low %vm1615_vm13, %vm1615_vm13  ;;  %v1797_v49 = vunpack.c.l.b16 %v1761_v47  ;;  %v903_v53 = vand.u32 15, %v773_v40  ;;  %v567_v55 = vshrl.u32 %v8677_v31, 16 }
  0x31   : > { %2041 = vrot.lane.b32.xlu2 %v1967_v39, %s12084_s26  ;;  %v1759_v50 = vsel %vm1723_vm15, 65537, %v12158_v2  ;;  %v12108_v61 = vshrl.u32 %v8742_v0, 16  ;;  %v706_v62 = vsel %vm12093_vm2, %v704_v48, %v705_v45  ;;  %v12092_v63 = vshll.u32 %v8793_v52, 16 }
  0x32   : > { %2043 = vrot.lane.b32.xlu1 %v1968_v20, %s12084_s26  ;;  %v1795_v57 = vunpack.c.l.b16 %v1759_v50  ;;  %v7033_v58 = vunpack.i.l.s16 %v1797_v49  ;;  %vm1619_vm0 = vcmp.ne.s32.totalorder %v903_v53, 15  ;;  %v12239_v11 = vmov 0  ;;  %v7060_v50 = vld [vmem:[%s12245_s1 + $0x8] sm:$0xf] }
  0x33   : > { %1991 = vrot.lane.b32.xlu0 %v8651_v19, %s12086_s20  ;;  %vm1727_vm1 = vmpackc.low %vm1619_vm0, %vm1619_vm0  ;;  %v701_v20 = vor.u32 %v8724_v51, %v567_v55  ;;  %v707_v27 = vor.u32 %v705_v45, %v12108_v61  ;;  %v8822_v28 = vrot.slane %v12092_v63, 1  ;;  %v12241_v51 = vmov 0 }
  0x34   : > { %v7031_v59 = vunpack.i.l.s16 %v1795_v57  ;;  %vm1885_vm3 = vcmp.ne.s32.totalorder %v7033_v58, %v8666_v24  ;;  %v1763_v9 = vsel %vm1727_vm1, 65537, %v12158_v2  ;;  %v553_v45 = vrot.slane %v551_v54, 7  ;;  %v8174_v54 = vld [vmem:[%s12245_s1 + $0x8] sm:$0x30] }
  0x35   : > { %vm8806_vm5 = vmpackc.low %vm1885_vm3, %vm8682_vm7  ;;  %v1799_v23 = vunpack.c.l.b16 %v1763_v9  ;;  %v703_v30 = vsel %vm12093_vm2, %v701_v20, %v702_v38  ;;  %v709_v40 = vsel %vm12093_vm2, %v707_v27, %v8822_v28  ;;  %v12243_v38 = vmov 0 }
  0x36   : > { %v12240_v11 = vsel %vm8806_vm5, 4294967295, %v12239_v11  ;;  %vm1878_vm8 = vcmp.ne.s32.totalorder %v7031_v59, %v8666_v24  ;;  %v1970_v25 = vsel %vm8806_vm5, %v706_v62, 0  ;;  %v8857_v47 = vrot.slane %v543_v13, 7  ;;  %v8175_v13 = vld [vmem:[%s12245_s1 + $0x10] sm:$0x30] }
  0x37   : > { %v7035_v26 = vunpack.i.l.s16 %v1799_v23  ;;  %vm8827_vm9 = vmpackc.low %vm1878_vm8, %vm8682_vm7  ;;  %v556_v48 = vor.u32 %v554_v17, %v553_v45  ;;  %vm12088_vm15 = vsmask.f32 256  ;;  %v7061_v53 = vor.u32 %v8174_v54, %v7060_v50 }
  0x38   : > { %v12242_v51 = vsel %vm8827_vm9, 4294967295, %v12241_v51  ;;  %v1969_v39 = vsel %vm8827_vm9, %v703_v30, 0  ;;  %vm2205_vm0 = vcmask 1045504   ;;  %v7103_v57 = vor.u32 %v8175_v13, %v7102_v8 }
  0x39   : > { %1983 = vrot.lane.b32.xlu2 %v12158_v2, %s12086_s20  ;;  %vm1892_vm13 = vcmp.ne.s32.totalorder %v7035_v26, %v8666_v24  ;;  %v8863_v49 = vsel %vm12088_vm15, %v8857_v47, %v556_v48  ;;  %v2207_v17 = vsel %vm2205_vm0, %v7061_v53, 0  ;;  %v8879_v58 = vadd.s32 32, %v8610_v1  ;;  %v8892_v26 = vld [vmem:[%s8622_s19 + $0x40] sm:$0xff] }
  0x3a   : > { %1993 = vrot.lane.b32.xlu1 %v8677_v31, %s12086_s20  ;;  %vm8841_vm14 = vmpackc.low %vm1892_vm13, %vm8682_vm7  ;;  %2216 = vmatpush.bf16.msra.mxu0 %v2207_v17  ;;  %v2408_v59 = vsel %vm2205_vm0, %v7103_v57, 0  ;;  %v777_v62 = vadd.s32 152, %v8610_v1  ;;  %v8884_v9 = vadd.s32 16, %v8610_v1  ;;  %v8888_v20 = vrot.slane %v559_v41, 7 }
  0x3b   : > { %2035 = vrot.lane.b32.xlu0 %v1964_v43, %s12084_s26  ;;  %v12244_v38 = vsel %vm8841_vm14, 4294967295, %v12243_v38  ;;  %v1971_v43 = vsel %vm8841_vm14, %v709_v40, 0  ;;  %12246 = vst [vmem:[#allocation13_spill] sm:$0xff] %v8879_v58  ;;  %2417 = vmatpush.bf16.msra.mxu2 %v2408_v59  ;;  %v826_v23 = vand.u32 15, %v8879_v58  ;;  %v12090_v41 = vshll.u32 %v8892_v26, 16  ;;  %v8906_v40 = vld [vmem:[%s8622_s19 + $0x48] sm:$0xff] }
  0x3c   : > { %12247 = vst [vmem:[#allocation14_spill] sm:$0xff] %v8884_v9  ;;  %v812_v27 = vand.u32 15, %v8884_v9  ;;  %v12091_v50 = vshrl.u32 %v8892_v26, 16  ;;  %v12089_v54 = vshll.u32 %v8906_v40, 16  ;;  %v775_v8 = vadd.s32 136, %v8610_v1 }
  0x3d   : > { %vm8895_vm8 = vcmp.ne.s32.totalorder %v826_v23, 0  ;;  %v12254_v30 = vmov 0  ;;  %vm12269_vm14 = vsmask.f32 7424  ;;  %v770_v58 = vadd.s32 96, %v8610_v1 }
  0x3e   : > { %vm1338_vm13 = vmpackc.low %vm8895_vm8, %vm8895_vm8  ;;  %v917_v59 = vand.u32 15, %v775_v8  ;;  %v791_v36 = vadd.s32 264, %v8610_v1 }
  0x3f   : > { %v1374_v57 = vsel %vm1338_vm13, 65537, %v12158_v2 }
  0x41   : > { %2045 = vrot.lane.b32.xlu2 %v1969_v39, %s12084_s26  ;;  %v564_v39 = vor.u32 %v562_v33, %v8888_v20  ;;  %v711_v33 = vrot.slane %v12090_v41, 1 }
  0x42   : > { %2047 = vrot.lane.b32.xlu1 %v1970_v25, %s12084_s26  ;;  %v931_v25 = vand.u32 15, %v777_v62  ;;  %v8933_v62 = vadd.s32 48, %v8610_v1 }
  0x43   : > { %1995 = vrot.lane.b32.xlu0 %v8730_v56, %s12086_s20  ;;  %v8910_v48 = vsel %vm12088_vm15, %v553_v45, %v564_v39  ;;  %v714_v45 = vrot.slane %v12089_v54, 1  ;;  %v713_v13 = vor.u32 %v711_v33, %v12091_v50  ;;  %v9013_v50 = vrot.slane %v12158_v2, 7 }
  0x44   : > { %vm1623_vm1 = vcmp.ne.s32.totalorder %v931_v25, 15  ;;  %12253 = vst [vmem:[#allocation15_spill] sm:$0xff] %v8933_v62  ;;  %v7080_v25 = vld [vmem:[%s12245_s1] sm:$0xf] }
  0x45   : > { %vm1731_vm3 = vmpackc.low %vm1623_vm1, %vm1623_vm1  ;;  %vm8917_vm1 = vcmp.ne.s32.totalorder %v812_v27, 0  ;;  %v715_v23 = vsel %vm12093_vm2, %v713_v13, %v714_v45  ;;  %v8173_v27 = vld [vmem:[%s12245_s1] sm:$0x30]  ;;  %v12106_v13 = vshrl.u32 %v8793_v52, 16 }
  0x46   : > { %v7081_v39 = vor.u32 %v8173_v27, %v7080_v25 }
  0x48   : > { %v2306_v8 = vsel %vm2205_vm0, %v7081_v39, 0  ;;  %v798_v39 = vand.u32 15, %v8610_v1 }
  0x49   : > { %1997 = vrot.lane.b32.xlu2 %v8742_v0, %s12086_s20  ;;  %2315 = vmatpush.bf16.msra.mxu1 %v2306_v8 }
  0x4a   : > { %1999 = vrot.lane.b32.xlu1 %v8793_v52, %s12086_s20  ;;  %s12250_s20 = smov 4  }
  0x4b   : > { %2049 = vrot.lane.b32.xlu0 %v1971_v43, %s12084_s26  ;;  %v1767_v43 = vsel %vm1731_vm3, 65537, %v12158_v2  ;;  %vm1336_vm3 = vmpackc.low %vm8917_vm1, %vm8917_vm1  ;;  %vm1621_vm1 = vcmp.ne.s32.totalorder %v917_v59, 15  ;;  %v710_v59 = vor.u32 %v8822_v28, %v12106_v13  ;;  %v8971_v28 = vld [vmem:[%s8622_s19 + $0x50] sm:$0xff] }
  0x4c   : > { %v1803_v53 = vunpack.c.l.b16 %v1767_v43  ;;  %v1410_v43 = vunpack.c.l.b16 %v1374_v57  ;;  %v1372_v19 = vsel %vm1336_vm3, 65537, %v12158_v2  ;;  %vm1729_vm15 = vmpackc.low %vm1621_vm1, %vm1621_vm1  ;;  %v779_v57 = vadd.s32 168, %v8610_v1 }
  0x4d   : > { %v1765_v25 = vsel %vm1729_vm15, 65537, %v12158_v2  ;;  %v1408_v27 = vunpack.c.l.b16 %v1372_v19  ;;  %v712_v8 = vsel %vm12093_vm2, %v710_v59, %v711_v33  ;;  %v537_v19 = vrot.slane %v535_v15, 7 }
  0x4e   : > { %v7039_v17 = vunpack.i.l.s16 %v1803_v53  ;;  %v945_v54 = vand.u32 15, %v779_v57 }
  0x4f   : > { %v6986_v63 = vunpack.i.l.s16 %v1408_v27 }
  0x50   : > { %vm1906_vm8 = vcmp.ne.s32.totalorder %v7039_v17, %v8666_v24  ;;  %v840_v17 = vand.u32 15, %v8933_v62  ;;  %vm1625_vm15 = vcmp.ne.s32.totalorder %v945_v54, 15  ;;  %v12260_v54 = vmov 0 }
  0x51   : > { %vm8945_vm13 = vmpackc.low %vm1906_vm8, %vm8682_vm7  ;;  %v12298_v62 = vshrl.u32 %v8730_v56, 16 }
  0x52   : > { %v12255_v30 = vsel %vm8945_vm13, 4294967295, %v12254_v30  ;;  %v1973_v53 = vsel %vm8945_vm13, %v715_v23, 0  ;;  %v1801_v23 = vunpack.c.l.b16 %v1765_v25  ;;  %vm8962_vm0 = vcmp.ne.s32.totalorder %v840_v17, 0  ;;  %vm1733_vm8 = vmpackc.low %vm1625_vm15, %vm1625_vm15 }
  0x53   : > { %2001 = vrot.lane.b32.xlu0 %v8892_v26, %s12250_s20  ;;  %12256 = vst [vmem:[#allocation16_spill] sm:$0xff] %v12255_v30  ;;  %2053 = vrot.lane.b32.xlu1 %v1973_v53, %s12257_s16  ;;  %v6988_v53 = vunpack.i.l.s16 %v1410_v43  ;;  %v12100_v43 = vshrl.u32 %v8906_v40, 16  ;;  %v548_v17 = vor.u32 %v546_v14, %v8857_v47  ;;  %v1769_v15 = vsel %vm1733_vm8, 65537, %v12158_v2  ;;  %vm1340_vm15 = vmpackc.low %vm8962_vm0, %vm8962_vm0 }
  0x54   : > { %v7037_v41 = vunpack.i.l.s16 %v1801_v23  ;;  %vm8985_vm13 = vcmp.ne.s32.totalorder %v798_v39, 0  ;;  %v12099_v25 = vshll.u32 %v8971_v28, 16  ;;  %v1805_v57 = vunpack.c.l.b16 %v1769_v15 }
  0x55   : > { %vm1478_vm1 = vcmp.ne.s32.totalorder %v6988_v53, %v8648_v18  ;;  %v716_v6 = vor.u32 %v714_v45, %v12100_v43  ;;  %vm1471_vm0 = vcmp.ne.s32.totalorder %v6986_v63, %v8648_v18  ;;  %v1376_v63 = vsel %vm1340_vm15, 65537, %v12158_v2 }
  0x56   : > { %vm1899_vm3 = vcmp.ne.s32.totalorder %v7037_v41, %v8666_v24  ;;  %v9020_v59 = vrot.slane %v12099_v25, 1  ;;  %v7041_v53 = vunpack.i.l.s16 %v1805_v57  ;;  %v12272_v15 = vmov 0 }
  0x57   : > { %vm8980_vm2 = vmpackc.low %vm1899_vm3, %vm8682_vm7  ;;  %vm9001_vm3 = vcmp.ne.s32.totalorder %v8657_v21, %v8666_v24  ;;  %v540_v21 = vor.u32 %v538_v16, %v537_v19  ;;  %v9048_v41 = vadd.s32 64, %v8610_v1  ;;  %vm12102_vm15 = vcmask 64512  }
  0x58   : > { %v12261_v54 = vsel %vm8980_vm2, 4294967295, %v12260_v54  ;;  %v1972_v33 = vsel %vm8980_vm2, %v712_v8, 0  ;;  %vm9008_vm8 = vmpackc.low %vm9001_vm3, %vm1478_vm1  ;;  %vm12268_vm2 = vsmask.f32 256  ;;  %v718_v39 = vsel %vm12269_vm14, %v716_v6, %v9020_v59 }
  0x59   : > { %2051 = vrot.lane.b32.xlu2 %v1972_v33, %s12257_s16  ;;  %v549_v23 = vsel %vm12268_vm2, %v537_v19, %v548_v17  ;;  %vm1334_vm1 = vmpackc.low %vm8985_vm13, %vm8985_vm13  ;;  %vm1913_vm9 = vcmp.ne.s32.totalorder %v7041_v53, %v8666_v24  ;;  %v541_v19 = vsel %vm12268_vm2, %v9013_v50, %v540_v21  ;;  %12275 = vst [vmem:[#allocation18_spill] sm:$0xff] %v9048_v41  ;;  %v1412_v6 = vunpack.c.l.b16 %v1376_v63 }
  0x5a   : > { %vm9031_vm5 = vmpackc.low %vm9001_vm3, %vm1471_vm0  ;;  %v1588_v16 = vsel %vm9008_vm8, %v549_v23, 0  ;;  %v1370_v17 = vsel %vm1334_vm1, 65537, %v12158_v2  ;;  %vm12101_vm13 = vcmask 31744   ;;  %v854_v25 = vand.u32 15, %v9048_v41 }
  0x5b   : > { %2005 = vrot.lane.b32.xlu1 %v8971_v28, %s12250_s20  ;;  %vm9043_vm14 = vmpackc.low %vm1913_vm9, %vm8682_vm7  ;;  %v1587_v21 = vsel %vm9031_vm5, %v541_v19, 0  ;;  %v1406_v23 = vunpack.c.l.b16 %v1370_v17  ;;  %vm12105_vm9 = vcmask 97280   ;;  %v6990_v43 = vunpack.i.l.s16 %v1412_v6  ;;  %v8199_v19 = vld [vmem:[%s12074_s3 + $0xb8] sm:$0xff] }
  0x5c   : > { %v12273_v15 = vsel %vm9043_vm14, 4294967295, %v12272_v15  ;;  %v1974_v33 = vsel %vm9043_vm14, %v718_v39, 0  ;;  %vm681_vm0 = vcmask 1040384   ;;  %vm1234_vm1 = vcmp.ne.s32.totalorder %v854_v25, 0  ;;  %3324 = vmatpush.bf16.msrb.mxu0 %v8199_v19 }
  0x5d   : > { %12274 = vst [vmem:[#allocation17_spill] sm:$0xff] %v12273_v15  ;;  %2055 = vrot.lane.b32.xlu0 %v1974_v33, %s12257_s16  ;;  %vm1485_vm2 = vcmp.ne.s32.totalorder %v6990_v43, %v8648_v18  ;;  %v12277_v17 = vmov 0  ;;  %vm1342_vm6 = vmpackc.low %vm1234_vm1, %vm1234_vm1  ;;  %v12280_v6 = vmov 0  ;;  %v9103_v19 = vrot.slane %v567_v55, 7 }
  0x5e   : > { %v1378_v25 = vsel %vm1342_vm6, 65537, %v12158_v2 }
  0x61   : > { %2003 = vrot.lane.b32.xlu2 %v8906_v40, %s12250_s20 }
  0x65   : > { %2007 = vrot.lane.b32.xlu0 %v9113_v10, %s12250_s20 }
  0x7a   : > { %v1990_v8 = vpop.permute.xlu2 %1989 }
  0x91   : > { %v1988_v47 = vpop.permute.xlu1 %1987  ;;  %v1986_v27 = vpop.permute.xlu0 %1985 }
  0x92   : > { %v2080_v57 = vsel %vm12101_vm13, %v1588_v16, %v1988_v47  ;;  %v2077_v39 = vsel %vm12101_vm13, %v1587_v21, %v1986_v27  ;;  %v6984_v16 = vunpack.i.l.s16 %v1406_v23  ;;  %v2042_v27 = vpop.permute.xlu2 %2041  ;;  %vm12276_vm13 = vsmask.f32 256 }
  0x94   : > { %vm1464_vm14 = vcmp.ne.s32.totalorder %v6984_v16, %v8648_v18 }
  0x9c   : > { %v2040_v53 = vpop.permute.xlu1 %2039 }
  0x9d   : > { %v2038_v63 = vpop.permute.xlu0 %2037  ;;  %v9061_v33 = vsel %vm12102_vm15, %v2080_v57, %v2040_v53  ;;  %v9097_v53 = vpop.permute.xlu2 %1983 }
  0x9e   : > { %v9064_v47 = vsel %vm12102_vm15, %v2077_v39, %v2038_v63  ;;  %7104 = vmatmul.msk.bf16.vlgmr.msra.gmra.mxu2 %vm12105_vm9, %v9061_v33  ;;  %vm9075_vm15 = vmand %vm681_vm0, %vm12276_vm13  ;;  %v1414_v39 = vunpack.c.l.b16 %v1378_v25  ;;  %v783_v63 = vadd.s32 200, %v8610_v1  ;;  %vm12283_vm0 = vcmask 31744  }
  0x9f   : > { %7062 = vmatmul.msk.bf16.vlgmr.msra.gmra.mxu0 %vm12105_vm9, %v9064_v47  ;;  %v12278_v17 = vsel %vm9075_vm15, 4294967295, %v12277_v17  ;;  %vm9082_vm9 = vmpackc.low %vm9001_vm3, %vm1485_vm2  ;;  %v683_v43 = vsel %vm9075_vm15, 0, %v9013_v50 }
  0xa0   : > { %12279 = vst [vmem:[#allocation19_spill] sm:$0xff] %v12278_v17  ;;  %v12281_v6 = vsel %vm9082_vm9, 4294967295, %v12280_v6  ;;  %vm1466_vm13 = vmpackc.low %vm9001_vm3, %vm1464_vm14  ;;  %v1589_v21 = vsel %vm9082_vm9, %v8863_v49, 0  ;;  %v973_v29 = vand.u32 15, %v783_v63  ;;  %v768_v49 = vadd.s32 80, %v8610_v1 }
  0xa1   : > { %v9095_v23 = vsel %vm1466_vm13, %v683_v43, 0  ;;  %v2083_v16 = vsel %vm12283_vm0, %v1589_v21, %v1990_v8  ;;  %vm12284_vm6 = vmmov %vm12283_vm0  ;;  %v6992_v43 = vunpack.i.l.s16 %v1414_v39  ;;  %vm12285_vm14 = vcmask 64512   ;;  %v9124_v39 = vld [vmem:[%s8622_s19 + $0x60] sm:$0xff] }
  0xa2   : > { %12282 = vst [vmem:[#allocation20_spill] sm:$0xff] %v9095_v23  ;;  %v2074_v13 = vsel %vm12284_vm6, %v9095_v23, %v9097_v53  ;;  %v9110_v25 = vsel %vm12285_vm14, %v2083_v16, %v2042_v27  ;;  %vm1629_vm1 = vcmp.ne.s32.totalorder %v973_v29, 15  ;;  %v868_v8 = vand.u32 15, %v768_v49  ;;  %vm12286_vm2 = vmmov %vm12285_vm14 }
  0xa3   : > { %vm12287_vm13 = vcmask 97280   ;;  %vm1737_vm0 = vmpackc.low %vm1629_vm1, %vm1629_vm1  ;;  %v12115_v21 = vshrl.u32 %v9113_v10, 16  ;;  %v12113_v27 = vshll.u32 %v9113_v10, 16  ;;  %v781_v63 = vadd.s32 184, %v8610_v1 }
  0xa4   : > { %vm12288_vm6 = vmmov %vm12287_vm13  ;;  %v1773_v29 = vsel %vm1737_vm0, 65537, %v12158_v2  ;;  %vm1236_vm14 = vcmp.ne.s32.totalorder %v868_v8, 0  ;;  %v12114_v16 = vshll.u32 %v9124_v39, 16  ;;  %vm12290_vm1 = vsmask.f32 256 }
  0xa5   : > { %v1992_v57 = vpop.permute.xlu0 %1991  ;;  %vm12289_vm15 = vmmov %vm12288_vm6  ;;  %v720_v49 = vrot.slane %v12113_v27, 1  ;;  %v959_v35 = vand.u32 15, %v781_v63  ;;  %v12291_v27 = vmov 0  ;;  %v1029_v23 = vand.u32 15, %v791_v36 }
  0xa7   : > { %v722_v8 = vor.u32 %v720_v49, %v12115_v21 }
  0xad   : > { %v2036_v61 = vpop.permute.xlu0 %2035 }
  0xae   : > { %v2127_v55 = vsel %vm12286_vm2, %v2074_v13, %v2036_v61  ;;  %7105 = vmatmul.msk.bf16.gmra.mxu2 %vm12287_vm13, %v9110_v25  ;;  %v572_v61 = vor.u32 %v570_v42, %v9103_v19  ;;  %v1809_v13 = vunpack.c.l.b16 %v1773_v29  ;;  %vm1344_vm2 = vmpackc.low %vm1236_vm14, %vm1236_vm14  ;;  %v12133_v42 = vshrl.u32 %v8971_v28, 16 }
  0xaf   : > { %7063 = vmatmul.msk.bf16.gmra.mxu0 %vm12288_vm6, %v9061_v33  ;;  %7082 = vmatmul.msk.bf16.vlgmr.msra.gmra.mxu1 %vm12289_vm15, %v2127_v55  ;;  %vm1492_vm15 = vcmp.ne.s32.totalorder %v6992_v43, %v8648_v18  ;;  %v723_v29 = vrot.slane %v12114_v16, 1  ;;  %v1380_v43 = vsel %vm1344_vm2, 65537, %v12158_v2  ;;  %vm12293_vm6 = vsmask.f32 7424 }
  0xb0   : > { %v9139_v55 = vsel %vm12290_vm1, %v8888_v20, %v572_v61  ;;  %v7045_v31 = vunpack.i.l.s16 %v1809_v13  ;;  %vm9149_vm13 = vmpackc.low %vm9001_vm3, %vm1492_vm15  ;;  %v12294_v61 = vmov 0  ;;  %vm1627_vm1 = vcmp.ne.s32.totalorder %v959_v35, 15 }
  0xb1   : > { %v12292_v27 = vsel %vm9149_vm13, 4294967295, %v12291_v27  ;;  %v724_v20 = vsel %vm12293_vm6, %v722_v8, %v723_v29  ;;  %v1416_v63 = vunpack.c.l.b16 %v1380_v43  ;;  %vm1735_vm2 = vmpackc.low %vm1627_vm1, %vm1627_vm1  ;;  %v1590_v16 = vsel %vm9149_vm13, %v8910_v48, 0 }
  0xb2   : > { %vm1927_vm0 = vcmp.ne.s32.totalorder %v7045_v31, %v8666_v24  ;;  %v719_v31 = vor.u32 %v9020_v59, %v12133_v42  ;;  %v1771_v8 = vsel %vm1735_vm2, 65537, %v12158_v2  ;;  %v785_v35 = vadd.s32 216, %v8610_v1 }
  0xb3   : > { %vm9157_vm14 = vmpackc.low %vm1927_vm0, %vm8682_vm7  ;;  %v1807_v21 = vunpack.c.l.b16 %v1771_v8  ;;  %vm12297_vm15 = vcmask 31744   ;;  %v6994_v43 = vunpack.i.l.s16 %v1416_v63  ;;  %v577_v48 = vrot.slane %v12298_v62, 7 }
  0xb4   : > { %v12295_v61 = vsel %vm9157_vm14, 4294967295, %v12294_v61  ;;  %v1976_v13 = vsel %vm9157_vm14, %v724_v20, 0  ;;  %v2086_v41 = vsel %vm12297_vm15, %v1590_v16, %v1992_v57  ;;  %v2044_v20 = vpop.permute.xlu1 %2043  ;;  %vm12299_vm0 = vmmov %vm12293_vm6  ;;  %v987_v37 = vand.u32 15, %v785_v35 }
  0xb5   : > { %12296 = vst [vmem:[#allocation21_spill] sm:$0xff] %v12295_v61  ;;  %2059 = vrot.lane.b32.xlu1 %v1976_v13, %s12257_s16  ;;  %v7043_v12 = vunpack.i.l.s16 %v1807_v21  ;;  %v721_v13 = vsel %vm12299_vm0, %v719_v31, %v720_v49  ;;  %vm12300_vm1 = vcmask 64512   ;;  %v12301_v57 = vmov 0 }
  0xb6   : > { %v9179_v59 = vsel %vm12300_vm1, %v2086_v41, %v2044_v20  ;;  %vm1631_vm15 = vcmp.ne.s32.totalorder %v987_v37, 15  ;;  %v882_v21 = vand.u32 15, %v770_v58  ;;  %vm12304_vm14 = vcmask 97280  }
  0xb7   : > { %vm1920_vm6 = vcmp.ne.s32.totalorder %v7043_v12, %v8666_v24  ;;  %vm1499_vm0 = vcmp.ne.s32.totalorder %v6994_v43, %v8648_v18  ;;  %vm1739_vm13 = vmpackc.low %vm1631_vm15, %vm1631_vm15  ;;  %v9197_v12 = vld [vmem:[%s8622_s19 + $0x68] sm:$0xff]  ;;  %v12132_v37 = vshrl.u32 %v9124_v39, 16  ;;  %v12307_v41 = vshll.u32 %v8730_v56, 16 }
  0xb8   : > { %vm9183_vm2 = vmpackc.low %vm1920_vm6, %vm8682_vm7  ;;  %v1775_v58 = vsel %vm1739_vm13, 65537, %v12158_v2  ;;  %v12129_v63 = vshll.u32 %v9197_v12, 16  ;;  %v12309_v56 = vmov 0  ;;  %v787_v42 = vadd.s32 232, %v8610_v1 }
  0xb9   : > { %v12302_v57 = vsel %vm9183_vm2, 4294967295, %v12301_v57  ;;  %v1975_v62 = vsel %vm9183_vm2, %v721_v13, 0  ;;  %vm12305_vm1 = vmmov %vm12304_vm14  ;;  %v580_v16 = vor.u32 %v12307_v41, %v577_v48  ;;  %v1811_v49 = vunpack.c.l.b16 %v1775_v58  ;;  %v2046_v41 = vpop.permute.xlu2 %2045 }
  0xba   : > { %12303 = vst [vmem:[#allocation22_spill] sm:$0xff] %v12302_v57  ;;  %vm12306_vm9 = vmmov %vm12305_vm1  ;;  %2057 = vrot.lane.b32.xlu2 %v1975_v62, %s12257_s16  ;;  %v725_v31 = vor.u32 %v723_v29, %v12132_v37  ;;  %v9221_v35 = vrot.slane %v12129_v63, 1  ;;  %v12312_v13 = vmov 0  ;;  %vm12322_vm2 = vsmask.f32 256  ;;  %v9278_v37 = vld [vmem:[%s8622_s19 + $0x78] sm:$0xff] }
  0xbb   : > { %vm9215_vm13 = vmpackc.low %vm9001_vm3, %vm1499_vm0  ;;  %v7047_v8 = vunpack.i.l.s16 %v1811_v49 }
  0xbc   : > { %v12310_v56 = vsel %vm9215_vm13, 4294967295, %v12309_v56  ;;  %v1591_v29 = vsel %vm9215_vm13, %v9139_v55, 0  ;;  %v1994_v20 = vpop.permute.xlu1 %1993  ;;  %v12316_v55 = vshrl.u32 %v8742_v0, 16 }
  0xbd   : > { %2011 = vrot.lane.b32.xlu1 %v9197_v12, %s12250_s20  ;;  %vm1934_vm15 = vcmp.ne.s32.totalorder %v7047_v8, %v8666_v24  ;;  %v772_v8 = vadd.s32 112, %v8610_v1 }
  0xbe   : > { %7106 = vmatmul.msk.bf16.gmra.mxu2 %vm12304_vm14, %v9179_v59  ;;  %vm1238_vm14 = vcmp.ne.s32.totalorder %v882_v21, 0  ;;  %vm9232_vm0 = vmpackc.low %vm1934_vm15, %vm8682_vm7 }
  0xbf   : > { %7064 = vmatmul.msk.bf16.gmra.mxu0 %vm12305_vm1, %v9110_v25  ;;  %7083 = vmatmul.msk.bf16.gmra.mxu1 %vm12306_vm9, %v9064_v47  ;;  %vm12308_vm9 = vsmask.f32 256  ;;  %vm1346_vm6 = vmpackc.low %vm1238_vm14, %vm1238_vm14  ;;  %vm12311_vm1 = vsmask.f32 7424  ;;  %v12313_v13 = vsel %vm9232_vm0, 4294967295, %v12312_v13  ;;  %vm12315_vm14 = vcmask 31744  }
  0xc0   : > { %v581_v47 = vsel %vm12308_vm9, %v9103_v19, %v580_v16  ;;  %v1382_v19 = vsel %vm1346_vm6, 65537, %v12158_v2  ;;  %v727_v43 = vsel %vm12311_vm1, %v725_v31, %v9221_v35  ;;  %12314 = vst [vmem:[#allocation23_spill] sm:$0xff] %v12313_v13  ;;  %v2089_v58 = vsel %vm12315_vm14, %v1591_v29, %v1994_v20 }
  0xc1   : > { %v1977_v21 = vsel %vm9232_vm0, %v727_v43, 0  ;;  %v1418_v62 = vunpack.c.l.b16 %v1382_v19  ;;  %v585_v16 = vrot.slane %v12316_v55, 7  ;;  %vm12317_vm9 = vcmask 64512   ;;  %v1998_v4 = vpop.permute.xlu2 %1997 }
  0xc2   : > { %2061 = vrot.lane.b32.xlu0 %v1977_v21, %s12257_s16  ;;  %2009 = vrot.lane.b32.xlu2 %v9124_v39, %s12250_s20  ;;  %v9245_v49 = vsel %vm12317_vm9, %v2089_v58, %v2046_v41  ;;  %v896_v63 = vand.u32 15, %v772_v8  ;;  %vm12318_vm6 = vcmask 97280   ;;  %v12321_v19 = vshll.u32 %v8742_v0, 16 }
  0xc3   : > { %v6996_v31 = vunpack.i.l.s16 %v1418_v62  ;;  %vm12319_vm15 = vmmov %vm12318_vm6  ;;  %v12323_v43 = vmov 0  ;;  %v1996_v62 = vpop.permute.xlu0 %1995  ;;  %v789_v41 = vadd.s32 248, %v8610_v1  ;;  %v774_v8 = vadd.s32 128, %v8610_v1 }
  0xc4   : > { %vm12320_vm1 = vmmov %vm12318_vm6  ;;  %v588_v29 = vor.u32 %v12321_v19, %v585_v16  ;;  %vm1240_vm9 = vcmp.ne.s32.totalorder %v896_v63, 0  ;;  %v2048_v58 = vpop.permute.xlu1 %2047  ;;  %v12327_v19 = vshrl.u32 %v8793_v52, 16 }
  0xc5   : > { %vm1506_vm14 = vcmp.ne.s32.totalorder %v6996_v31, %v8648_v18  ;;  %vm1348_vm0 = vmpackc.low %vm1240_vm9, %vm1240_vm9  ;;  %v1015_v31 = vand.u32 15, %v789_v41 }
  0xc6   : > { %v589_v20 = vsel %vm12322_vm2, %v577_v48, %v588_v29  ;;  %v1384_v21 = vsel %vm1348_vm0, 65537, %v12158_v2  ;;  %vm12326_vm2 = vcmask 64512   ;;  %v9275_v29 = vrot.slane %v12327_v19, 7 }
  0xc7   : > { %v1420_v0 = vunpack.c.l.b16 %v1384_v21  ;;  %vm1635_vm0 = vcmp.ne.s32.totalorder %v1015_v31, 15  ;;  %v910_v21 = vand.u32 15, %v774_v8  ;;  %v12330_v31 = vshll.u32 %v8793_v52, 16 }
  0xc8   : > { %vm1743_vm9 = vmpackc.low %vm1635_vm0, %vm1635_vm0 }
  0xc9   : > { %v6998_v55 = vunpack.i.l.s16 %v1420_v0  ;;  %v12134_v0 = vshll.u32 %v9278_v37, 16  ;;  %vm1242_vm0 = vcmp.ne.s32.totalorder %v910_v21, 0 }
  0xcb   : > { %v732_v19 = vrot.slane %v12134_v0, 1 }
  0xce   : > { %7107 = vmatmul.msk.bf16.gmra.mxu2 %vm12318_vm6, %v9245_v49  ;;  %vm9260_vm6 = vmpackc.low %vm9001_vm3, %vm1506_vm14  ;;  %vm1513_vm14 = vcmp.ne.s32.totalorder %v6998_v55, %v8648_v18 }
  0xcf   : > { %7065 = vmatmul.msk.bf16.gmra.mxu0 %vm12319_vm15, %v9179_v59  ;;  %7084 = vmatmul.msk.bf16.gmra.mxu1 %vm12320_vm1, %v9061_v33  ;;  %v12324_v43 = vsel %vm9260_vm6, 4294967295, %v12323_v43  ;;  %v1592_v33 = vsel %vm9260_vm6, %v581_v47, 0  ;;  %vm12325_vm15 = vcmask 31744   ;;  %v9281_v47 = vld [vmem:[%s8622_s19 + $0x70] sm:$0xff]  ;;  %s405_s19 = scalar_lea.vmem [#allocation2], %s404_s28 }
  0xd0   : > { %v2092_v63 = vsel %vm12325_vm15, %v1592_v33, %v1996_v62  ;;  %vm12328_vm15 = vmmov %vm12320_vm1  ;;  %v12140_v33 = vshrl.u32 %v9281_v47, 16  ;;  %v12135_v62 = vshll.u32 %v9281_v47, 16  ;;  %2013 = vrot.lane.b32.xlu0 %v9281_v47, %s12250_s20 }
  0xd1   : > { %v9270_v48 = vsel %vm12326_vm2, %v2092_v63, %v2048_v58  ;;  %vm12329_vm2 = vmmov %vm12320_vm1  ;;  %v1779_v63 = vsel %vm1743_vm9, 65537, %v12158_v2  ;;  %v8198_v58 = vld [vmem:[%s12074_s3 + $0xb0] sm:$0xff] }
  0xd2   : > { %v1815_v41 = vunpack.c.l.b16 %v1779_v63  ;;  %v729_v8 = vrot.slane %v12135_v62, 1  ;;  %3325 = vmatpush.bf16.msrb.mxu0 %v8198_v58  ;;  %vm9311_vm9 = vmpackc.low %vm9001_vm3, %vm1513_vm14  ;;  %v12331_v63 = vmov 0  ;;  %v12157_v58 = vshrl.u32 %v9197_v12, 16 }
  0xd3   : > { %v12332_v63 = vsel %vm9311_vm9, 4294967295, %v12331_v63  ;;  %v1001_v62 = vand.u32 15, %v787_v42  ;;  %v1593_v55 = vsel %vm9311_vm9, %v589_v20, 0  ;;  %vm12334_vm14 = vsmask.f32 7424 }
  0xd4   : > { %v7051_v52 = vunpack.i.l.s16 %v1815_v41  ;;  %v728_v42 = vor.u32 %v9221_v35, %v12157_v58  ;;  %v776_v35 = vadd.s32 144, %v8610_v1 }
  0xde   : > { %7108 = vmatmul.msk.bf16.gmra.mxu2 %vm12320_vm1, %v9270_v48  ;;  %vm1350_vm1 = vmpackc.low %vm1242_vm0, %vm1242_vm0 }
  0xdf   : > { %7066 = vmatmul.msk.bf16.gmra.mxu0 %vm12328_vm15, %v9245_v49  ;;  %7085 = vmatmul.msk.bf16.gmra.mxu1 %vm12329_vm2, %v9110_v25  ;;  %v596_v25 = vor.u32 %v12330_v31, %v9275_v29  ;;  %vm12333_vm15 = vsmask.f32 256  ;;  %v731_v31 = vor.u32 %v729_v8, %v12140_v33  ;;  %v1386_v0 = vsel %vm1350_vm1, 65537, %v12158_v2 }
  0xe0   : > { %vm1948_vm2 = vcmp.ne.s32.totalorder %v7051_v52, %v8666_v24 }
  0xe1   : > { %v597_v21 = vsel %vm12333_vm15, %v585_v16, %v596_v25  ;;  %v733_v17 = vsel %vm12334_vm14, %v731_v31, %v732_v19  ;;  %vm9326_vm0 = vmpackc.low %vm1948_vm2, %vm8682_vm7  ;;  %v12335_v16 = vmov 0  ;;  %vm1633_vm15 = vcmp.ne.s32.totalorder %v1001_v62, 15  ;;  %v2050_v31 = vpop.permute.xlu0 %2049 }
  0xe2   : > { %v12336_v16 = vsel %vm9326_vm0, 4294967295, %v12335_v16  ;;  %v1979_v41 = vsel %vm9326_vm0, %v733_v17, 0  ;;  %v1422_v25 = vunpack.c.l.b16 %v1386_v0  ;;  %vm1741_vm1 = vmpackc.low %vm1633_vm15, %vm1633_vm15  ;;  %vm12338_vm14 = vcmask 31744  }
  0xe3   : > { %12337 = vst [vmem:[#allocation24_spill] sm:$0xff] %v12336_v16  ;;  %2065 = vrot.lane.b32.xlu1 %v1979_v41, %s12257_s16  ;;  %v1777_v20 = vsel %vm1741_vm1, 65537, %v12158_v2  ;;  %v2095_v52 = vsel %vm12338_vm14, %v1593_v55, %v1998_v4  ;;  %v12339_v62 = vshrl.u32 %v8892_v26, 16  ;;  %vm12340_vm2 = vcmask 64512  }
  0xe4   : > { %v1813_v33 = vunpack.c.l.b16 %v1777_v20  ;;  %v7000_v17 = vunpack.i.l.s16 %v1422_v25  ;;  %v9342_v5 = vsel %vm12340_vm2, %v2095_v52, %v2050_v31  ;;  %vm12341_vm15 = vsmask.f32 7424 }
  0xe5   : > { %v601_v9 = vrot.slane %v12339_v62, 7  ;;  %v730_v41 = vsel %vm12341_vm15, %v728_v42, %v729_v8  ;;  %v12156_v4 = vshrl.u32 %v9278_v37, 16  ;;  %v12342_v55 = vmov 0 }
  0xe6   : > { %v7049_v0 = vunpack.i.l.s16 %v1813_v33  ;;  %vm1637_vm0 = vcmp.ne.s32.totalorder %v1029_v23, 15  ;;  %v924_v33 = vand.u32 15, %v776_v35  ;;  %vm12345_vm2 = vcmask 97280  }
  0xe7   : > { %vm1520_vm15 = vcmp.ne.s32.totalorder %v7000_v17, %v8648_v18  ;;  %vm1745_vm9 = vmpackc.low %vm1637_vm0, %vm1637_vm0  ;;  %v734_v8 = vor.u32 %v732_v19, %v12156_v4  ;;  %v12348_v25 = vshll.u32 %v8892_v26, 16  ;;  %vm12349_vm0 = vsmask.f32 256  ;;  %v2000_v17 = vpop.permute.xlu1 %1999 }
  0xe8   : > { %vm1941_vm1 = vcmp.ne.s32.totalorder %v7049_v0, %v8666_v24  ;;  %vm12346_vm6 = vmmov %vm12345_vm2  ;;  %v1781_v23 = vsel %vm1745_vm9, 65537, %v12158_v2 }
  0xe9   : > { %vm9350_vm14 = vmpackc.low %vm1941_vm1, %vm8682_vm7  ;;  %v604_v42 = vor.u32 %v12348_v25, %v601_v9  ;;  %vm1244_vm1 = vcmp.ne.s32.totalorder %v924_v33, 0  ;;  %v1817_v20 = vunpack.c.l.b16 %v1781_v23  ;;  %v2052_v33 = vpop.permute.xlu2 %2051  ;;  %v12362_v25 = vshrl.u32 %v8906_v40, 16 }
  0xea   : > { %v12343_v55 = vsel %vm9350_vm14, 4294967295, %v12342_v55  ;;  %v1978_v36 = vsel %vm9350_vm14, %v730_v41, 0  ;;  %vm12347_vm13 = vmmov %vm12345_vm2 }
  0xeb   : > { %12344 = vst [vmem:[#allocation25_spill] sm:$0xff] %v12343_v55  ;;  %2063 = vrot.lane.b32.xlu2 %v1978_v36, %s12257_s16  ;;  %v605_v52 = vsel %vm12349_vm0, %v9275_v29, %v604_v42  ;;  %v7053_v19 = vunpack.i.l.s16 %v1817_v20  ;;  %v12354_v29 = vmov 0  ;;  %vm12358_vm0 = vcmask 64512  }
  0xec   : > { %v609_v42 = vrot.slane %v12362_v25, 7  ;;  %v12363_v20 = vmov 0 }
  0xed   : > { %vm1955_vm9 = vcmp.ne.s32.totalorder %v7053_v19, %v8666_v24  ;;  %v12366_v19 = vshll.u32 %v8906_v40, 16 }
  0xee   : > { %7109 = vmatmul.msk.bf16.gmra.mxu2 %vm12345_vm2, %v9342_v5  ;;  %vm1352_vm2 = vmpackc.low %vm1244_vm1, %vm1244_vm1 }
  0xef   : > { %7067 = vmatmul.msk.bf16.gmra.mxu0 %vm12346_vm6, %v9270_v48  ;;  %7086 = vmatmul.msk.bf16.gmra.mxu1 %vm12347_vm13, %v9179_v59  ;;  %vm9373_vm6 = vmpackc.low %vm9001_vm3, %vm1520_vm15  ;;  %v12350_v59 = vmov 0  ;;  %vm12353_vm13 = vsmask.f32 7424  ;;  %v1388_v26 = vsel %vm1352_vm2, 65537, %v12158_v2  ;;  %vm12357_vm15 = vcmask 31744  }
  0xf0   : > { %v12351_v59 = vsel %vm9373_vm6, 4294967295, %v12350_v59  ;;  %v735_v31 = vsel %vm12353_vm13, %v734_v8, %v8735_v60  ;;  %v1594_v62 = vsel %vm9373_vm6, %v597_v21, 0  ;;  %vm9385_vm1 = vmpackc.low %vm1955_vm9, %vm8682_vm7  ;;  %v1424_v41 = vunpack.c.l.b16 %v1388_v26 }
  0xf1   : > { %12352 = vst [vmem:[#allocation26_spill] sm:$0xff] %v12351_v59  ;;  %v12355_v29 = vsel %vm9385_vm1, 4294967295, %v12354_v29  ;;  %v1980_v0 = vsel %vm9385_vm1, %v735_v31, 0  ;;  %v2098_v35 = vsel %vm12357_vm15, %v1594_v62, %v2000_v17  ;;  %v778_v8 = vadd.s32 160, %v8610_v1  ;;  %v2002_v62 = vpop.permute.xlu0 %2001 }
  0xf2   : > { %12356 = vst [vmem:[#allocation27_spill] sm:$0xff] %v12355_v29  ;;  %2067 = vrot.lane.b32.xlu0 %v1980_v0, %s12257_s16  ;;  %v9396_v21 = vsel %vm12358_vm0, %v2098_v35, %v2052_v33  ;;  %v7002_v36 = vunpack.i.l.s16 %v1424_v41  ;;  %vm12359_vm2 = vcmask 97280   ;;  %v612_v31 = vor.u32 %v12366_v19, %v609_v42  ;;  %v2054_v35 = vpop.permute.xlu1 %2053 }
  0xf3   : > { %2015 = vrot.lane.b32.xlu2 %v9278_v37, %s12250_s20  ;;  %v938_v23 = vand.u32 15, %v778_v8  ;;  %vm12360_vm13 = vmmov %vm12359_vm2  ;;  %v780_v8 = vadd.s32 176, %v8610_v1  ;;  %s6847_s20 = scalar_lea.sflag [#allocation3], %s404_s28 }
  0xf4   : > { %vm12361_vm9 = vmmov %vm12359_vm2  ;;  %vm1527_vm15 = vcmp.ne.s32.totalorder %v7002_v36, %v8648_v18 }
  0xf5   : > { %vm1246_vm1 = vcmp.ne.s32.totalorder %v938_v23, 0  ;;  %vm9410_vm14 = vmpackc.low %vm9001_vm3, %vm1527_vm15  ;;  %v952_v40 = vand.u32 15, %v780_v8  ;;  %v12373_v23 = vmov 0  ;;  %v782_v8 = vadd.s32 192, %v8610_v1 }
  0xf6   : > { %vm1354_vm0 = vmpackc.low %vm1246_vm1, %vm1246_vm1  ;;  %v12364_v20 = vsel %vm9410_vm14, 4294967295, %v12363_v20  ;;  %vm12369_vm1 = vcmask 64512  }
  0xf7   : > { %12365 = vst [vmem:[#allocation28_spill] sm:$0xff] %v12364_v20  ;;  %v1390_v26 = vsel %vm1354_vm0, 65537, %v12158_v2  ;;  %vm12370_vm15 = vmmov %vm12361_vm9 }
  0xf8   : > { %v1426_v0 = vunpack.c.l.b16 %v1390_v26  ;;  %vm12371_vm0 = vmmov %vm12361_vm9 }
  0xfa   : > { %v7004_v36 = vunpack.i.l.s16 %v1426_v0 }
  0xfe   : > { %7110 = vmatmul.msk.bf16.gmra.mxu2 %vm12359_vm2, %v9396_v21  ;;  %vm12367_vm2 = vsmask.f32 256 }
  0xff   : > { %7068 = vmatmul.msk.bf16.gmra.mxu0 %vm12360_vm13, %v9342_v5  ;;  %7087 = vmatmul.msk.bf16.gmra.mxu1 %vm12361_vm9, %v9245_v49  ;;  %v1595_v49 = vsel %vm9410_vm14, %v605_v52, 0  ;;  %v613_v17 = vsel %vm12367_vm2, %v601_v9, %v612_v31  ;;  %vm12368_vm13 = vcmask 31744   ;;  %vm1534_vm2 = vcmp.ne.s32.totalorder %v7004_v36, %v8648_v18  ;;  %v2004_v31 = vpop.permute.xlu2 %2003 }
 0x100   : > { %v2101_v41 = vsel %vm12368_vm13, %v1595_v49, %v2002_v62  ;;  %vm1248_vm13 = vcmp.ne.s32.totalorder %v952_v40, 0  ;;  %v12372_v9 = vshrl.u32 %v8971_v28, 16  ;;  %vm9436_vm14 = vmpackc.low %vm9001_vm3, %vm1534_vm2  ;;  %vm12380_vm2 = vcmask 97280  }
 0x101   : > { %v9422_v33 = vsel %vm12369_vm1, %v2101_v41, %v2054_v35  ;;  %vm1356_vm1 = vmpackc.low %vm1248_vm13, %vm1248_vm13  ;;  %v12374_v23 = vsel %vm9436_vm14, 4294967295, %v12373_v23  ;;  %v1596_v19 = vsel %vm9436_vm14, %v613_v17, 0  ;;  %v2056_v41 = vpop.permute.xlu0 %2055 }
 0x102   : > { %v617_v52 = vrot.slane %v12372_v9, 7  ;;  %12375 = vst [vmem:[#allocation29_spill] sm:$0xff] %v12374_v23  ;;  %v1392_v25 = vsel %vm1356_vm1, 65537, %v12158_v2  ;;  %v966_v9 = vand.u32 15, %v782_v8  ;;  %vm12381_vm13 = vmmov %vm12380_vm2 }
 0x103   : > { %v1428_v62 = vunpack.c.l.b16 %v1392_v25  ;;  %vm12382_vm1 = vmmov %vm12380_vm2  ;;  %v12384_v25 = vmov 0 }
 0x105   : > { %v7006_v36 = vunpack.i.l.s16 %v1428_v62 }
 0x10e   : > { %7111 = vmatmul.msk.bf16.gmra.mxu2 %vm12361_vm9, %v9422_v33  ;;  %vm12377_vm9 = vsmask.f32 256 }
 0x10f   : > { %7069 = vmatmul.msk.bf16.gmra.mxu0 %vm12370_vm15, %v9396_v21  ;;  %7088 = vmatmul.msk.bf16.gmra.mxu1 %vm12371_vm0, %v9270_v48  ;;  %v12376_v48 = vshll.u32 %v8971_v28, 16  ;;  %vm12378_vm15 = vcmask 31744   ;;  %vm12379_vm0 = vcmask 64512   ;;  %v12383_v28 = vshrl.u32 %v9113_v10, 16 }
 0x110   : > { %v2104_v0 = vsel %vm12378_vm15, %v1596_v19, %v2004_v31  ;;  %vm1250_vm15 = vcmp.ne.s32.totalorder %v966_v9, 0 }
 0x111   : > { %v620_v26 = vor.u32 %v12376_v48, %v617_v52  ;;  %v9448_v35 = vsel %vm12379_vm0, %v2104_v0, %v2056_v41  ;;  %vm1358_vm0 = vmpackc.low %vm1250_vm15, %vm1250_vm15  ;;  %v2006_v48 = vpop.permute.xlu1 %2005 }
 0x112   : > { %v1394_v31 = vsel %vm1358_vm0, 65537, %v12158_v2 }
 0x113   : > { %v621_v49 = vsel %vm12377_vm9, %v609_v42, %v620_v26  ;;  %vm1541_vm9 = vcmp.ne.s32.totalorder %v7006_v36, %v8648_v18  ;;  %v625_v42 = vrot.slane %v12383_v28, 7  ;;  %v12387_v26 = vshll.u32 %v9113_v10, 16 }
 0x114   : > { %vm9462_vm14 = vmpackc.low %vm9001_vm3, %vm1541_vm9  ;;  %v1430_v41 = vunpack.c.l.b16 %v1394_v31  ;;  %v2058_v8 = vpop.permute.xlu2 %2057  ;;  %v793_v28 = vadd.s32 280, %v8610_v1  ;;  %v784_v10 = vadd.s32 208, %v8610_v1  ;;  %vm12391_vm9 = vcmask 97280  }
 0x115   : > { %v12385_v25 = vsel %vm9462_vm14, 4294967295, %v12384_v25  ;;  %v628_v62 = vor.u32 %v12387_v26, %v625_v42  ;;  %vm12393_vm15 = vmmov %vm12391_vm9 }
 0x116   : > { %12386 = vst [vmem:[#allocation30_spill] sm:$0xff] %v12385_v25  ;;  %v7008_v58 = vunpack.i.l.s16 %v1430_v41  ;;  %v1043_v31 = vand.u32 15, %v793_v28  ;;  %vm12394_vm0 = vmmov %vm12391_vm9  ;;  %v12396_v41 = vmov 0 }
 0x11c   : > { %v2218_v40 = vpop.f32.mrf.mxu0 }
 0x11e   : > { %7112 = vmatmul.msk.bf16.gmra.mxu2 %vm12380_vm2, %v9448_v35  ;;  %vm12388_vm2 = vsmask.f32 256 }
 0x11f   : > { %7070 = vmatmul.msk.bf16.gmra.mxu0 %vm12381_vm13, %v9422_v33  ;;  %7089 = vmatmul.msk.bf16.gmra.mxu1 %vm12382_vm1, %v9342_v5  ;;  %v1597_v5 = vsel %vm9462_vm14, %v621_v49, 0  ;;  %v629_v0 = vsel %vm12388_vm2, %v617_v52, %v628_v62  ;;  %vm12389_vm13 = vcmask 31744   ;;  %vm12390_vm1 = vcmask 64512   ;;  %v8197_v49 = vld [vmem:[%s12074_s3 + $0xa8] sm:$0xff]  ;;  %v9486_v62 = vld [vmem:[%s12392_s2] ss:$0 sm:$0xff] }
 0x120   : > { %v2107_v36 = vsel %vm12389_vm13, %v1597_v5, %v2006_v48  ;;  %3326 = vmatpush.bf16.msrb.mxu0 %v8197_v49  ;;  %v980_v5 = vand.u32 15, %v784_v10  ;;  %vm1548_vm2 = vcmp.ne.s32.totalorder %v7008_v58, %v8648_v18 }
 0x121   : > { %v2419_v17 = vpop.f32.mrf.mxu2  ;;  %v9475_v4 = vsel %vm12390_vm1, %v2107_v36, %v2058_v8  ;;  %vm9499_vm14 = vmpackc.low %vm9001_vm3, %vm1548_vm2  ;;  %v12399_v8 = vmov 0   ;;  %vm12402_vm2 = vcmask 31744  }
 0x122   : > { %vm1252_vm13 = vcmp.ne.s32.totalorder %v980_v5, 0  ;;  %v12397_v41 = vsel %vm9499_vm14, 4294967295, %v12396_v41  ;;  %v1598_v10 = vsel %vm9499_vm14, %v629_v0, 0 }
 0x123   : > { %vm1360_vm1 = vmpackc.low %vm1252_vm13, %vm1252_vm13  ;;  %12398 = vst [vmem:[#allocation31_spill] sm:$0xff] %v12397_v41  ;;  %vm12403_vm13 = vcmask 64512  }
 0x124   : > { %v2220_v19 = vpop.f32.mrf.mxu0 }
 0x127   : > { %v2060_v25 = vpop.permute.xlu1 %2059 }
 0x129   : > { %v2421_v9 = vpop.f32.mrf.mxu2 }
 0x12c   : > { %v2223_v26 = vpop.f32.mrf.mxu0  ;;  %v2317_v2 = vpop.f32.mrf.mxu1 }
 0x12d   : > { %v2318_v52 = vadd.f32 %v2317_v2, %v2218_v40  ;;  %v12395_v2 = vshrl.u32 %v9124_v39, 16 }
 0x12e   : > { %7113 = vmatmul.msk.bf16.gmra.mxu2 %vm12391_vm9, %v9475_v4  ;;  %vm1639_vm9 = vcmp.ne.s32.totalorder %v1043_v31, 15  ;;  %v12400_v31 = vshll.u32 %v9124_v39, 16 }
 0x12f   : > { %v2499_v48 = vadd.f32 %v2419_v17, %v2318_v52  ;;  %7071 = vmatmul.msk.bf16.gmra.mxu0 %vm12393_vm15, %v9448_v35  ;;  %7090 = vmatmul.msk.bf16.gmra.mxu1 %vm12394_vm0, %v9396_v21  ;;  %v9495_v40 = vrot.slane %v12395_v2, 7  ;;  %v1396_v21 = vsel %vm1360_vm1, 65537, %v12399_v8  ;;  %vm1747_vm15 = vmpackc.low %vm1639_vm9, %vm1639_vm9  ;;  %v2008_v52 = vpop.permute.xlu0 %2007  ;;  %vm12401_vm0 = vsmask.f32 256 }
 0x130   : > { %v1432_v2 = vunpack.c.l.b16 %v1396_v21  ;;  %v1783_v55 = vsel %vm1747_vm15, 65537, %v12399_v8  ;;  %v2110_v13 = vsel %vm12402_vm2, %v1598_v10, %v2008_v52  ;;  %vm12404_vm1 = vcmask 97280  }
 0x131   : > { %v2424_v17 = vpop.f32.mrf.mxu2  ;;  %v2535_v36 = vadd.f32 %v9486_v62, %v2499_v48  ;;  %v636_v5 = vor.u32 %v12400_v31, %v9495_v40  ;;  %v1819_v41 = vunpack.c.l.b16 %v1783_v55  ;;  %v9515_v39 = vsel %vm12403_vm13, %v2110_v13, %v2060_v25 }
 0x132   : > { %v7010_v0 = vunpack.i.l.s16 %v1432_v2  ;;  %vm754_vm9 = vcmask 1047552  }
 0x133   : > { %v2567_v29 = vmax.f32 %v2535_v36, 0.0  ;;  %v637_v48 = vsel %vm12401_vm0, %v625_v42, %v636_v5  ;;  %v786_v36 = vadd.s32 224, %v8610_v1  ;;  %vm12405_vm0 = vmmov %vm12404_vm1 }
 0x134   : > { %v2225_v28 = vpop.f32.mrf.mxu0  ;;  %v2319_v58 = vpop.f32.mrf.mxu1  ;;  %vm1555_vm15 = vcmp.ne.s32.totalorder %v7010_v0, %v8648_v18  ;;  %vm12406_vm2 = vmmov %vm12405_vm0 }
 0x135   : > { %v2320_v49 = vadd.f32 %v2319_v58, %v2220_v19  ;;  %v2599_v61 = vpack.c.bf16 %v2567_v29, %v2567_v29  ;;  %v994_v42 = vand.u32 15, %v786_v36  ;;  %v2010_v36 = vpop.permute.xlu2 %2009 }
 0x137   : > { %v2500_v16 = vadd.f32 %v2421_v9, %v2320_v49  ;;  %v2663_v13 = vunpack.c.l.b16 %v2599_v61  ;;  %vm1254_vm13 = vcmp.ne.s32.totalorder %v994_v42, 0  ;;  %v12412_v61 = vmov 0  ;;  %v2062_v34 = vpop.permute.xlu0 %2061 }
 0x138   : > { %vm1362_vm14 = vmpackc.low %vm1254_vm13, %vm1254_vm13  ;;  %vm12420_vm13 = vcmask 97280  }
 0x139   : > { %v2536_v19 = vadd.f32 %v9486_v62, %v2500_v16  ;;  %v2426_v58 = vpop.f32.mrf.mxu2  ;;  %v7055_v16 = vunpack.i.l.s16 %v1819_v41  ;;  %v1398_v41 = vsel %vm1362_vm14, 65537, %v12399_v8  ;;  %vm12416_vm14 = vsmask.f32 256 }
 0x13b   : > { %v2568_v23 = vmax.f32 %v2536_v19, 0.0 }
 0x13c   : > { %v2228_v9 = vpop.f32.mrf.mxu0  ;;  %v2322_v21 = vpop.f32.mrf.mxu1 }
 0x13d   : > { %v2323_v49 = vadd.f32 %v2322_v21, %v2223_v26  ;;  %v2600_v31 = vpack.c.bf16 %v2568_v23, %v2568_v23  ;;  %v12407_v23 = vshrl.u32 %v9197_v12, 16  ;;  %v12415_v21 = vshll.u32 %v9197_v12, 16 }
 0x13e   : > { %7114 = vmatmul.msk.bf16.gmra.mxu2 %vm12404_vm1, %v9515_v39  ;;  %vm12408_vm1 = vsmask.f32 7424 }
 0x13f   : > { %v2501_v55 = vadd.f32 %v2424_v17, %v2323_v49  ;;  %7072 = vmatmul.msk.bf16.gmra.mxu0 %vm12405_vm0, %v9475_v4  ;;  %7091 = vmatmul.msk.bf16.gmra.mxu1 %vm12406_vm2, %v9422_v33  ;;  %v2664_v29 = vunpack.c.l.b16 %v2600_v31  ;;  %v9527_v25 = vrot.slane %v12407_v23, 7  ;;  %vm9532_vm6 = vmand %vm754_vm9, %vm12408_vm1  ;;  %v12409_v17 = vmov 0 }
 0x140   : > { %v12410_v17 = vsel %vm9532_vm6, 4294967295, %v12409_v17  ;;  %vm1962_vm0 = vcmp.ne.s32.totalorder %v7055_v16, %v8666_v24  ;;  %vm9539_vm2 = vmpackc.low %vm9001_vm3, %vm1555_vm15  ;;  %v756_v19 = vsel %vm9532_vm6, %v8735_v60, 0  ;;  %v1434_v31 = vunpack.c.l.b16 %v1398_v41 }
 0x141   : > { %v2429_v26 = vpop.f32.mrf.mxu2  ;;  %v9529_v10 = vpack.c.b16 %v2664_v29, %v2663_v13  ;;  %12411 = vst [vmem:[#allocation32_spill] sm:$0xff] %v12410_v17  ;;  %v12413_v61 = vsel %vm9539_vm2, 4294967295, %v12412_v61  ;;  %v2537_v33 = vadd.f32 %v9486_v62, %v2501_v55  ;;  %vm1963_vm9 = vmpackc.low %vm1962_vm0, %vm8682_vm7  ;;  %v1599_v0 = vsel %vm9539_vm2, %v637_v48, 0 }
 0x142   : > { %12414 = vst [vmem:[#allocation33_spill] sm:$0xff] %v12413_v61  ;;  %v644_v49 = vor.u32 %v12415_v21, %v9527_v25  ;;  %v9559_v55 = vsel %vm1963_vm9, %v756_v19, 0  ;;  %vm12418_vm15 = vcmask 31744   ;;  %v7012_v48 = vunpack.i.l.s16 %v1434_v31  ;;  %vm12421_vm0 = vmmov %vm12420_vm13 }
 0x143   : > { %2959 = vrot.lane.b32.xlu1 %v9529_v10, %s8493_s17  ;;  %v2569_v42 = vmax.f32 %v2537_v33, 0.0  ;;  %12417 = vst [vmem:[#allocation34_spill] sm:$0xff] %v9559_v55  ;;  %v2113_v13 = vsel %vm12418_vm15, %v1599_v0, %v2010_v36  ;;  %vm12419_vm7 = vcmask 64512   ;;  %vm12422_vm9 = vmmov %vm12421_vm0 }
 0x144   : > { %v2230_v52 = vpop.f32.mrf.mxu0  ;;  %v2324_v5 = vpop.f32.mrf.mxu1  ;;  %v9566_v12 = vsel %vm12419_vm7, %v2113_v13, %v2062_v34  ;;  %vm1562_vm1 = vcmp.ne.s32.totalorder %v7012_v48, %v8648_v18 }
 0x145   : > { %v2325_v2 = vadd.f32 %v2324_v5, %v2225_v28  ;;  %v645_v28 = vsel %vm12416_vm14, %v9495_v40, %v644_v49  ;;  %v2601_v5 = vpack.c.bf16 %v2569_v42, %v2569_v42  ;;  %v12173_v40 = vshll.u32 %v9529_v10, 16  ;;  %vm9590_vm7 = vmpackc.low %vm9001_vm3, %vm1562_vm1  ;;  %v2064_v57 = vpop.permute.xlu2 %2063 }
 0x146   : > { %v12423_v42 = vshrl.u32 %v9281_v47, 16  ;;  %vm12429_vm1 = vcmask 31744  }
 0x147   : > { %v2502_v16 = vadd.f32 %v2426_v58, %v2325_v2  ;;  %v788_v58 = vadd.s32 240, %v8610_v1  ;;  %v2665_v21 = vunpack.c.l.b16 %v2601_v5 }
 0x149   : > { %v2538_v29 = vadd.f32 %v9486_v62, %v2502_v16  ;;  %v2431_v23 = vpop.f32.mrf.mxu2  ;;  %v1008_v0 = vand.u32 15, %v788_v58  ;;  %v2712_v16 = vshrl.u32 %v9529_v10, 16 }
 0x14b   : > { %v2570_v17 = vmax.f32 %v2538_v29, 0.0  ;;  %2069 = vrot.lane.b32.xlu1 %v9559_v55, %s12257_s16  ;;  %vm1256_vm14 = vcmp.ne.s32.totalorder %v1008_v0, 0  ;;  %s6855_s16 = scalar_lea.hbm %s12083_s12, %s8581_s25 }
 0x14c   : > { %v2233_v33 = vpop.f32.mrf.mxu0  ;;  %v2327_v41 = vpop.f32.mrf.mxu1  ;;  %vm1364_vm15 = vmpackc.low %vm1256_vm14, %vm1256_vm14  ;;  %vm12432_vm14 = vcmask 64512   ;;  %s6859_s26 = sshll.u32 %s6855_s16, 4  ;;  %s6860_s26 = int_to_ptr.hbm [resolvable:$true] %s6859_s26 }
 0x14d   : > { %v2328_v2 = vadd.f32 %v2327_v41, %v2228_v9  ;;  %v2602_v19 = vpack.c.bf16 %v2570_v17, %v2570_v17  ;;  %v9579_v9 = vrot.slane %v12173_v40, 1  ;;  %v1400_v48 = vsel %vm1364_vm15, 65537, %v12399_v8  ;;  %s8439_s1 = sshra.s32 %s6860_s26, 4  ;;  %s8440_s1 = int_to_ptr.hbm [resolvable:$true] %s8439_s1 }
 0x14e   : > { %7115 = vmatmul.msk.bf16.gmra.mxu2 %vm12420_vm13, %v9566_v12  ;;  %v1436_v40 = vunpack.c.l.b16 %v1400_v48  ;;  %vm12428_vm13 = vsmask.f32 7424  ;;  %vm12433_vm15 = vcmask 97280   ;;  %p8446_p0 = scmp.lt.s32.totalorder %s8440_s1, %s12083_s12 }
 0x14f   : > { %v2503_v36 = vadd.f32 %v2429_v26, %v2328_v2  ;;  %7073 = vmatmul.msk.bf16.gmra.mxu0 %vm12421_vm0, %v9515_v39  ;;  %7092 = vmatmul.msk.bf16.gmra.mxu1 %vm12422_vm9, %v9448_v35  ;;  %v2666_v49 = vunpack.c.l.b16 %v2602_v19  ;;  %v9585_v26 = vrot.slane %v12423_v42, 7  ;;  %v12424_v35 = vmov 0 }
 0x150   : > { %v12425_v35 = vsel %vm9590_vm7, 4294967295, %v12424_v35  ;;  %v2859_v5 = vor.u32 %v9579_v9, %v2712_v16  ;;  %vm12430_vm0 = vsmask.f32 256 }
 0x151   : > { %v9581_v17 = vpack.c.b16 %v2666_v49, %v2665_v21  ;;  %v2434_v31 = vpop.f32.mrf.mxu2  ;;  %12426 = vst [vmem:[#allocation35_spill] sm:$0xff] %v12425_v35  ;;  %v2539_v13 = vadd.f32 %v9486_v62, %v2503_v36  ;;  %v1600_v36 = vsel %vm9590_vm7, %v645_v28, 0  ;;  %v2012_v21 = vpop.permute.xlu1 %2011  ;;  %v12427_v49 = vshll.u32 %v9281_v47, 16  ;;  %vm12431_vm9 = vmmov %vm12430_vm0 }
 0x152   : > { %v2116_v61 = vsel %vm12429_vm1, %v1600_v36, %v2012_v21  ;;  %vm12434_vm1 = vmmov %vm12433_vm15 }
 0x153   : > { %2961 = vrot.lane.b32.xlu2 %v9581_v17, %s8493_s17  ;;  %v2720_v34 = vshrl.u32 %v9581_v17, 16  ;;  %v2723_v29 = vshll.u32 %v9581_v17, 16  ;;  %v652_v42 = vor.u32 %v12427_v49, %v9585_v26  ;;  %v2571_v17 = vmax.f32 %v2539_v13, 0.0 }
 0x154   : > { %v2235_v58 = vpop.f32.mrf.mxu0  ;;  %v2329_v41 = vpop.f32.mrf.mxu1  ;;  %v7014_v49 = vunpack.i.l.s16 %v1436_v40 }
 0x155   : > { %v9601_v2 = vrot.slane %v2720_v34, 7  ;;  %v2860_v19 = vrot.slane %v2723_v29, 1  ;;  %v2330_v0 = vadd.f32 %v2329_v41, %v2230_v52  ;;  %v653_v52 = vsel %vm12430_vm0, %v9527_v25, %v652_v42  ;;  %vm12435_vm0 = vmmov %vm12434_vm1 }
 0x156   : > { %v9614_v41 = vrot.slane %v2712_v16, 7  ;;  %v2603_v13 = vpack.c.bf16 %v2571_v17, %v2571_v17 }
 0x157   : > { %v2504_v24 = vadd.f32 %v2431_v23, %v2330_v0  ;;  %v9609_v55 = vsel %vm12428_vm13, %v2859_v5, %v2860_v19  ;;  %v2725_v28 = vor.u32 %v2723_v29, %v9601_v2  ;;  %v9623_v5 = vsel %vm12432_vm14, %v2116_v61, %v2064_v57 }
 0x158   : > { %v790_v0 = vadd.s32 256, %v8610_v1  ;;  %vm1569_vm13 = vcmp.ne.s32.totalorder %v7014_v49, %v8648_v18  ;;  %v2667_v57 = vunpack.c.l.b16 %v2603_v13 }
 0x159   : > { %v2540_v35 = vadd.f32 %v9486_v62, %v2504_v24  ;;  %v2436_v47 = vpop.f32.mrf.mxu2  ;;  %v9620_v23 = vsel %vm12431_vm9, %v9614_v41, %v2725_v28  ;;  %vm9635_vm6 = vmpackc.low %vm9001_vm3, %vm1569_vm13  ;;  %v2066_v20 = vpop.permute.xlu1 %2065  ;;  %vm12440_vm13 = vsmask.f32 7424 }
 0x15a   : > { %v1022_v29 = vand.u32 15, %v790_v0  ;;  %v1601_v0 = vsel %vm9635_vm6, %v653_v52, 0 }
 0x15b   : > { %v2572_v48 = vmax.f32 %v2540_v35, 0.0  ;;  %v12436_v35 = vmov 0 }
 0x15c   : > { %v2238_v25 = vpop.f32.mrf.mxu0  ;;  %v2332_v16 = vpop.f32.mrf.mxu1  ;;  %vm1258_vm9 = vcmp.ne.s32.totalorder %v1022_v29, 0  ;;  %v12437_v35 = vsel %vm9635_vm6, 4294967295, %v12436_v35 }
 0x15d   : > { %v2333_v36 = vadd.f32 %v2332_v16, %v2233_v33  ;;  %v2604_v21 = vpack.c.bf16 %v2572_v48, %v2572_v48  ;;  %vm1366_vm14 = vmpackc.low %vm1258_vm9, %vm1258_vm9  ;;  %12438 = vst [vmem:[#allocation36_spill] sm:$0xff] %v12437_v35  ;;  %v2014_v16 = vpop.permute.xlu0 %2013  ;;  %vm12445_vm9 = vcmask 97280  }
 0x15e   : > { %7116 = vmatmul.msk.bf16.gmra.mxu2 %vm12433_vm15, %v9623_v5  ;;  %vm12439_vm15 = vcmask 31744  }
 0x15f   : > { %v2505_v24 = vadd.f32 %v2434_v31, %v2333_v36  ;;  %7074 = vmatmul.msk.bf16.gmra.mxu0 %vm12434_vm1, %v9566_v12  ;;  %7093 = vmatmul.msk.bf16.gmra.mxu1 %vm12435_vm0, %v9475_v4  ;;  %v2668_v61 = vunpack.c.l.b16 %v2604_v21  ;;  %v1402_v4 = vsel %vm1366_vm14, 65537, %v12399_v8  ;;  %v2862_v21 = vor.u32 %v2860_v19, %v2720_v34 }
 0x160   : > { %v1438_v36 = vunpack.c.l.b16 %v1402_v4  ;;  %vm12441_vm1 = vsmask.f32 256  ;;  %v12442_v34 = vshrl.u32 %v9278_v37, 16  ;;  %vm12443_vm0 = vcmask 64512  }
 0x161   : > { %v2697_v40 = vpack.c.b16 %v2668_v61, %v2667_v57  ;;  %v2439_v33 = vpop.f32.mrf.mxu2  ;;  %v2541_v31 = vadd.f32 %v9486_v62, %v2505_v24 }
 0x162   : > { %v7016_v4 = vunpack.i.l.s16 %v1438_v36  ;;  %v9658_v19 = vrot.slane %v12442_v34, 7 }
 0x163   : > { %2963 = vrot.lane.b32.xlu0 %v2697_v40, %s8493_s17  ;;  %v2728_v42 = vshrl.u32 %v2697_v40, 16  ;;  %v2731_v17 = vshll.u32 %v2697_v40, 16  ;;  %v2573_v57 = vmax.f32 %v2541_v31, 0.0  ;;  %v2119_v40 = vsel %vm12439_vm15, %v1601_v0, %v2014_v16  ;;  %vm12446_vm15 = vmmov %vm12445_vm9 }
 0x164   : > { %v2240_v28 = vpop.f32.mrf.mxu0  ;;  %v2334_v49 = vpop.f32.mrf.mxu1  ;;  %vm1576_vm14 = vcmp.ne.s32.totalorder %v7016_v4, %v8648_v18 }
 0x165   : > { %v9642_v13 = vrot.slane %v2728_v42, 7  ;;  %v2335_v48 = vadd.f32 %v2334_v49, %v2235_v58  ;;  %v2863_v29 = vrot.slane %v2731_v17, 1 }
 0x167   : > { %v2506_v24 = vadd.f32 %v2436_v47, %v2335_v48  ;;  %v2733_v61 = vor.u32 %v2731_v17, %v9642_v13  ;;  %v9649_v15 = vsel %vm12440_vm13, %v2862_v21, %v2863_v29  ;;  %v2605_v47 = vpack.c.bf16 %v2573_v57, %v2573_v57  ;;  %vm12447_vm13 = vmmov %vm12445_vm9 }
 0x168   : > { %v9661_v17 = vsel %vm12443_vm0, %v2119_v40, %v2066_v20  ;;  %v12444_v21 = vshll.u32 %v9278_v37, 16  ;;  %vm9680_vm0 = vmpackc.low %vm9001_vm3, %vm1576_vm14  ;;  %vm12452_vm14 = vcmask 31744  }
 0x169   : > { %v2542_v59 = vadd.f32 %v9486_v62, %v2506_v24  ;;  %v2441_v58 = vpop.f32.mrf.mxu2  ;;  %v9654_v52 = vsel %vm12441_vm1, %v9601_v2, %v2733_v61  ;;  %v2669_v2 = vunpack.c.l.b16 %v2605_v47  ;;  %v12448_v61 = vmov 0 }
 0x16a   : > { %v660_v24 = vor.u32 %v12444_v21, %v9658_v19  ;;  %v12449_v61 = vsel %vm9680_vm0, 4294967295, %v12448_v61  ;;  %v8195_v21 = vld [vmem:[%s12074_s3 + $0x98] sm:$0xff] }
 0x16b   : > { %v2574_v31 = vmax.f32 %v2542_v59, 0.0  ;;  %v8196_v59 = vld [vmem:[%s12074_s3 + $0xa0] sm:$0xff]  ;;  %12450 = vst [vmem:[#allocation37_spill] sm:$0xff] %v12449_v61  ;;  %3231 = vmatpush.bf16.msra.mxu3 %v8195_v21 }
 0x16c   : > { %v2243_v49 = vpop.f32.mrf.mxu0  ;;  %v2337_v48 = vpop.f32.mrf.mxu1  ;;  %3327 = vmatpush.bf16.msrb.mxu0 %v8196_v59 }
 0x16d   : > { %v2606_v0 = vpack.c.bf16 %v2574_v31, %v2574_v31  ;;  %v2338_v16 = vadd.f32 %v2337_v48, %v2238_v25  ;;  %v661_v25 = vsel %vm12441_vm1, %v9585_v26, %v660_v24  ;;  %v2016_v48 = vpop.permute.xlu2 %2015  ;;  %v2068_v59 = vpop.permute.xlu0 %2067 }
 0x16e   : > { %7117 = vmatmul.msk.bf16.gmra.mxu2 %vm12445_vm9, %v9661_v17  ;;  %v1602_v47 = vsel %vm9680_vm0, %v661_v25, 0  ;;  %vm12451_vm9 = vsmask.f32 7424 }
 0x16f   : > { %v2670_v36 = vunpack.c.l.b16 %v2606_v0  ;;  %v2507_v57 = vadd.f32 %v2439_v33, %v2338_v16  ;;  %7075 = vmatmul.msk.bf16.gmra.mxu0 %vm12446_vm15, %v9623_v5  ;;  %7094 = vmatmul.msk.bf16.gmra.mxu1 %vm12447_vm13, %v9515_v39  ;;  %v2865_v0 = vor.u32 %v2863_v29, %v2728_v42  ;;  %v8194_v42 = vld [vmem:[%s12074_s3 + $0x90] sm:$0xff]  ;;  %vm12453_vm15 = vmmov %vm12441_vm1  ;;  %vm12454_vm13 = vcmask 64512  }
 0x170   : > { %3232 = vmatpush.bf16.msra.mxu3 %v8194_v42  ;;  %vm12455_vm1 = vcmask 97280  }
 0x171   : > { %v2698_v37 = vpack.c.b16 %v2670_v36, %v2669_v2  ;;  %v2444_v20 = vpop.f32.mrf.mxu2  ;;  %v2543_v33 = vadd.f32 %v9486_v62, %v2507_v57  ;;  %v2122_v57 = vsel %vm12452_vm14, %v1602_v47, %v2016_v48  ;;  %vm12457_vm14 = vmmov %vm12455_vm1 }
 0x173   : > { %2965 = vrot.lane.b32.xlu2 %v2698_v37, %s8493_s17  ;;  %v2736_v39 = vshrl.u32 %v2698_v37, 16  ;;  %v2739_v40 = vshll.u32 %v2698_v37, 16  ;;  %v2575_v24 = vmax.f32 %v2543_v33, 0.0 }
 0x174   : > { %v2245_v4 = vpop.f32.mrf.mxu0  ;;  %v2339_v34 = vpop.f32.mrf.mxu1 }
 0x175   : > { %v2738_v31 = vrot.slane %v2736_v39, 7  ;;  %v2340_v26 = vadd.f32 %v2339_v34, %v2240_v28  ;;  %v2866_v16 = vrot.slane %v2739_v40, 1  ;;  %v2159_v34 = vsel %vm12454_vm13, %v2122_v57, %v2068_v59 }
 0x176   : > { %vm12459_vm13 = vsmask.f32 256 }
 0x177   : > { %v2508_v2 = vadd.f32 %v2441_v58, %v2340_v26  ;;  %v9692_v36 = vsel %vm12451_vm9, %v2865_v0, %v2866_v16  ;;  %v2741_v37 = vor.u32 %v2739_v40, %v2738_v31  ;;  %v2607_v58 = vpack.c.bf16 %v2575_v24, %v2575_v24  ;;  %v8193_v0 = vld [vmem:[%s12074_s3 + $0x88] sm:$0xff]  ;;  %vm12456_vm9 = vmmov %vm12455_vm1 }
 0x178   : > { %3233 = vmatpush.bf16.msra.mxu3 %v8193_v0 }
 0x179   : > { %v2544_v25 = vadd.f32 %v9486_v62, %v2508_v2  ;;  %v2446_v28 = vpop.f32.mrf.mxu2  ;;  %v9701_v29 = vsel %vm12453_vm15, %v9642_v13, %v2741_v37  ;;  %v2671_v21 = vunpack.c.l.b16 %v2607_v58  ;;  %vm12458_vm15 = vsmask.f32 7424 }
 0x17b   : > { %v2576_v33 = vmax.f32 %v2544_v25, 0.0 }
 0x17c   : > { %v2248_v26 = vpop.f32.mrf.mxu0  ;;  %v2342_v47 = vpop.f32.mrf.mxu1 }
 0x17d   : > { %v2608_v48 = vpack.c.bf16 %v2576_v33, %v2576_v33  ;;  %v2343_v40 = vadd.f32 %v2342_v47, %v2243_v49  ;;  %v8192_v49 = vld [vmem:[%s12074_s3 + $0x80] sm:$0xff]  ;;  %v2868_v33 = vor.u32 %v2866_v16, %v2736_v39  ;;  %v8191_v47 = vld [vmem:[%s12074_s3 + $0x78] sm:$0xff] }
 0x17e   : > { %7118 = vmatmul.msk.bf16.gmra.mxu2 %vm12455_vm1, %v2159_v34  ;;  %3234 = vmatpush.bf16.msra.mxu3 %v8192_v49 }
 0x17f   : > { %v2672_v2 = vunpack.c.l.b16 %v2608_v48  ;;  %v2509_v61 = vadd.f32 %v2444_v20, %v2343_v40  ;;  %7076 = vmatmul.msk.bf16.gmra.mxu0 %vm12456_vm9, %v9661_v17  ;;  %7095 = vmatmul.msk.bf16.gmra.mxu1 %vm12457_vm14, %v9566_v12  ;;  %vm12460_vm9 = vmmov %vm12455_vm1 }
 0x180   : > { %vm12461_vm14 = vmmov %vm12458_vm15 }
 0x181   : > { %v2699_v13 = vpack.c.b16 %v2672_v2, %v2671_v21  ;;  %v2449_v24 = vpop.f32.mrf.mxu2  ;;  %v2545_v57 = vadd.f32 %v9486_v62, %v2509_v61 }
 0x182   : > { %3235 = vmatpush.bf16.msra.mxu3 %v8191_v47 }
 0x183   : > { %2967 = vrot.lane.b32.xlu0 %v2699_v13, %s8493_s17  ;;  %v2744_v59 = vshrl.u32 %v2699_v13, 16  ;;  %v2747_v37 = vshll.u32 %v2699_v13, 16  ;;  %v2577_v48 = vmax.f32 %v2545_v57, 0.0 }
 0x184   : > { %v2250_v20 = vpop.f32.mrf.mxu0  ;;  %v2344_v25 = vpop.f32.mrf.mxu1 }
 0x185   : > { %v2746_v42 = vrot.slane %v2744_v59, 7  ;;  %v2345_v58 = vadd.f32 %v2344_v25, %v2245_v4  ;;  %v2869_v12 = vrot.slane %v2747_v37, 1  ;;  %v8190_v4 = vld [vmem:[%s12074_s3 + $0x70] sm:$0xff]  ;;  %v2609_v16 = vpack.c.bf16 %v2577_v48, %v2577_v48 }
 0x186   : > { %3236 = vmatpush.bf16.msra.mxu3 %v8190_v4 }
 0x187   : > { %v2510_v40 = vadd.f32 %v2446_v28, %v2345_v58  ;;  %v9721_v0 = vsel %vm12458_vm15, %v2868_v33, %v2869_v12  ;;  %v2749_v61 = vor.u32 %v2747_v37, %v2746_v42  ;;  %v2673_v58 = vunpack.c.l.b16 %v2609_v16  ;;  %vm12462_vm15 = vmmov %vm12459_vm13 }
 0x188   : > { %v2871_v16 = vor.u32 %v2869_v12, %v2744_v59 }
 0x189   : > { %v2546_v21 = vadd.f32 %v9486_v62, %v2510_v40  ;;  %v2451_v2 = vpop.f32.mrf.mxu2  ;;  %v9728_v39 = vsel %vm12459_vm13, %v2738_v31, %v2749_v61  ;;  %v8189_v31 = vld [vmem:[%s12074_s3 + $0x68] sm:$0xff]  ;;  %vm2991_vm13 = vcmask 523264  }
 0x18a   : > { %3237 = vmatpush.bf16.msra.mxu3 %v8189_v31 }
 0x18b   : > { %v2578_v13 = vmax.f32 %v2546_v21, 0.0 }
 0x18c   : > { %v2253_v49 = vpop.f32.mrf.mxu0  ;;  %v2347_v57 = vpop.f32.mrf.mxu1 }
 0x18d   : > { %v2610_v28 = vpack.c.bf16 %v2578_v13, %v2578_v13  ;;  %v2348_v25 = vadd.f32 %v2347_v57, %v2248_v26 }
 0x18f   : > { %v2674_v33 = vunpack.c.l.b16 %v2610_v28  ;;  %v2511_v37 = vadd.f32 %v2449_v24, %v2348_v25  ;;  %7077 = vmatmul.msk.bf16.gmra.mxu0 %vm12455_vm1, %v2159_v34  ;;  %7096 = vmatmul.msk.bf16.gmra.mxu1 %vm12460_vm9, %v9623_v5  ;;  %v8188_v34 = vld [vmem:[%s12074_s3 + $0x60] sm:$0xff] }
 0x190   : > { %3238 = vmatpush.bf16.msra.mxu3 %v8188_v34 }
 0x191   : > { %v2700_v47 = vpack.c.b16 %v2674_v33, %v2673_v58  ;;  %v2454_v48 = vpop.f32.mrf.mxu2  ;;  %v2547_v40 = vadd.f32 %v9486_v62, %v2511_v37 }
 0x193   : > { %2969 = vrot.lane.b32.xlu1 %v2700_v47, %s8493_s17  ;;  %v2752_v26 = vshrl.u32 %v2700_v47, 16  ;;  %v2755_v61 = vshll.u32 %v2700_v47, 16  ;;  %v2579_v57 = vmax.f32 %v2547_v40, 0.0  ;;  %v792_v47 = vadd.s32 272, %v8610_v1 }
 0x194   : > { %v2255_v24 = vpop.f32.mrf.mxu0  ;;  %v2349_v21 = vpop.f32.mrf.mxu1 }
 0x195   : > { %v2754_v5 = vrot.slane %v2752_v26, 7  ;;  %v2350_v4 = vadd.f32 %v2349_v21, %v2250_v20  ;;  %v2872_v13 = vrot.slane %v2755_v61, 1  ;;  %v2611_v35 = vpack.c.bf16 %v2579_v57, %v2579_v57 }
 0x196   : > { %v1036_v40 = vand.u32 15, %v792_v47 }
 0x197   : > { %v2512_v28 = vadd.f32 %v2451_v2, %v2350_v4  ;;  %v9742_v25 = vsel %vm12461_vm14, %v2871_v16, %v2872_v13  ;;  %v2757_v58 = vor.u32 %v2755_v61, %v2754_v5  ;;  %v9752_v2 = vsel %vm8710_vm12, %v9609_v55, 0 }
 0x198   : > { %v2675_v61 = vunpack.c.l.b16 %v2611_v35  ;;  %vm9763_vm12 = vcmp.ne.s32.totalorder %v1036_v40, 0  ;;  %v8185_v40 = vld [vmem:[%s12074_s3 + $0x48] sm:$0xff] }
 0x199   : > { %v2548_v33 = vadd.f32 %v9486_v62, %v2512_v28  ;;  %v2456_v37 = vpop.f32.mrf.mxu2  ;;  %v9746_v31 = vsel %vm12462_vm15, %v2746_v42, %v2757_v58  ;;  %vm1368_vm9 = vmpackc.low %vm9763_vm12, %vm9763_vm12 }
 0x19b   : > { %v2580_v30 = vmax.f32 %v2548_v33, 0.0  ;;  %v2874_v33 = vor.u32 %v2872_v13, %v2752_v26 }
 0x19c   : > { %v2258_v20 = vpop.f32.mrf.mxu0  ;;  %v2352_v34 = vpop.f32.mrf.mxu1 }
 0x19d   : > { %v2612_v59 = vpack.c.bf16 %v2580_v30, %v2580_v30  ;;  %v2353_v12 = vadd.f32 %v2352_v34, %v2253_v49  ;;  %v8187_v30 = vld [vmem:[%s12074_s3 + $0x58] sm:$0xff] }
 0x19e   : > { %3577 = vmatpush.bf16.msrb.mxu2 %v8187_v30 }
 0x19f   : > { %v2676_v21 = vunpack.c.l.b16 %v2612_v59  ;;  %v2513_v4 = vadd.f32 %v2454_v48, %v2353_v12  ;;  %7097 = vmatmul.msk.bf16.gmra.mxu1 %vm12455_vm1, %v9661_v17  ;;  %7192 = vmatmul.msk.bf16.vlgmr.msrb.gmra.mxu0 %vm2991_vm13, %v9752_v2  ;;  %v8186_v48 = vld [vmem:[%s12074_s3 + $0x50] sm:$0xff]  ;;  %v8207_v12 = vld [vmem:[%s12074_s3 + $0xf8] sm:$0xff]  ;;  %vm12466_vm1 = vmmov %vm12462_vm15 }
 0x1a0   : > { %3762 = vmatpush.bf16.msrb.mxu3 %v8207_v12  ;;  %vm12467_vm12 = vmmov %vm12466_vm1 }
 0x1a1   : > { %v9761_v42 = vpack.c.b16 %v2676_v21, %v2675_v61  ;;  %v2459_v49 = vpop.f32.mrf.mxu2  ;;  %v2549_v55 = vadd.f32 %v9486_v62, %v2513_v4 }
 0x1a2   : > { %3578 = vmatpush.bf16.msrb.mxu2 %v8186_v48 }
 0x1a3   : > { %2971 = vrot.lane.b32.xlu2 %v9761_v42, %s8493_s17  ;;  %v2760_v35 = vshrl.u32 %v9761_v42, 16  ;;  %v2763_v17 = vshll.u32 %v9761_v42, 16  ;;  %v2581_v34 = vmax.f32 %v2549_v55, 0.0  ;;  %v8184_v42 = vld [vmem:[%s12074_s3 + $0x40] sm:$0xff] }
 0x1a4   : > { %v2260_v16 = vpop.f32.mrf.mxu0  ;;  %v2354_v57 = vpop.f32.mrf.mxu1 }
 0x1a5   : > { %v9775_v28 = vrot.slane %v2760_v35, 7  ;;  %v2355_v58 = vadd.f32 %v2354_v57, %v2255_v24  ;;  %v2875_v47 = vrot.slane %v2763_v17, 1  ;;  %v1404_v24 = vsel %vm1368_vm9, 65537, %v12399_v8 }
 0x1a6   : > { %3579 = vmatpush.bf16.msrb.mxu2 %v8185_v40  ;;  %v2613_v4 = vpack.c.bf16 %v2581_v34, %v2581_v34  ;;  %v1440_v46 = vunpack.c.l.b16 %v1404_v24 }
 0x1a7   : > { %v2514_v59 = vadd.f32 %v2456_v37, %v2355_v58  ;;  %v9787_v61 = vsel %vm12461_vm14, %v2874_v33, %v2875_v47  ;;  %v2765_v26 = vor.u32 %v2763_v17, %v9775_v28  ;;  %v12465_v58 = vshll.u32 %v9529_v10, 16  ;;  %v8211_v10 = vld [vmem:[%s12074_s3 + $0x118] sm:$0xff] }
 0x1a8   : > { %v2677_v34 = vunpack.c.l.b16 %v2613_v4  ;;  %3855 = vmatpush.bf16.msra.mxu0 %v8211_v10 }
 0x1a9   : > { %v2550_v13 = vadd.f32 %v9486_v62, %v2514_v59  ;;  %v2461_v21 = vpop.f32.mrf.mxu2  ;;  %v9793_v37 = vsel %vm12462_vm15, %v2754_v5, %v2765_v26  ;;  %v2717_v33 = vor.u32 %v12465_v58, %v9614_v41  ;;  %v9804_v5 = vsel %vm8701_vm10, %v9649_v15, 0 }
 0x1aa   : > { %3580 = vmatpush.bf16.msrb.mxu2 %v8184_v42  ;;  %v7018_v41 = vunpack.i.l.s16 %v1440_v46  ;;  %vm12473_vm15 = vcmask 64512  }
 0x1ab   : > { %v2582_v30 = vmax.f32 %v2550_v13, 0.0  ;;  %v2718_v44 = vsel %vm12466_vm1, %v9013_v50, %v2717_v33  ;;  %v662_v33 = vsel %vm12467_vm12, %v9658_v19, %v9013_v50 }
 0x1ac   : > { %v2263_v55 = vpop.f32.mrf.mxu0  ;;  %v2357_v48 = vpop.f32.mrf.mxu1  ;;  %vm1583_vm10 = vcmp.ne.s32.totalorder %v7018_v41, %v8648_v18 }
 0x1ad   : > { %v2614_v17 = vpack.c.bf16 %v2582_v30, %v2582_v30  ;;  %v2358_v57 = vadd.f32 %v2357_v48, %v2258_v20  ;;  %v8183_v20 = vld [vmem:[%s12074_s3 + $0x38] sm:$0xff]  ;;  %v2923_v30 = vsel %vm9031_vm5, %v2718_v44, 0  ;;  %vm9829_vm9 = vmpackc.low %vm9001_vm3, %vm1583_vm10  ;;  %vm12472_vm3 = vcmask 31744  }
 0x1ae   : > { %3484 = vmatpush.bf16.msrb.mxu1 %v8183_v20  ;;  %vm12470_vm5 = vmmov %vm12461_vm14  ;;  %v1603_v19 = vsel %vm9829_vm9, %v662_v33, 0  ;;  %v2962_v33 = vpop.permute.xlu2 %2961 }
 0x1af   : > { %v2678_v59 = vunpack.c.l.b16 %v2614_v17  ;;  %v2515_v12 = vadd.f32 %v2459_v49, %v2358_v57  ;;  %7193 = vmatmul.msk.bf16.gmra.mxu0 %vm2991_vm13, %v9804_v5  ;;  %v2877_v17 = vor.u32 %v2875_v47, %v2760_v35  ;;  %vm12471_vm14 = vmmov %vm12466_vm1  ;;  %vm12474_vm1 = vcmask 97280  }
 0x1b0   : > { %vm12477_vm10 = vmmov %vm12470_vm5 }
 0x1b1   : > { %v2702_v40 = vpack.c.b16 %v2678_v59, %v2677_v34  ;;  %v2464_v15 = vpop.f32.mrf.mxu2  ;;  %v2551_v49 = vadd.f32 %v9486_v62, %v2515_v12 }
 0x1b3   : > { %2973 = vrot.lane.b32.xlu0 %v2702_v40, %s8493_s17  ;;  %v2768_v26 = vshrl.u32 %v2702_v40, 16  ;;  %v2771_v24 = vshll.u32 %v2702_v40, 16  ;;  %v2583_v7 = vmax.f32 %v2551_v49, 0.0  ;;  %v2124_v40 = vsel %vm12472_vm3, %v1603_v19, %v9097_v53 }
 0x1b4   : > { %v2265_v13 = vpop.f32.mrf.mxu0  ;;  %v2359_v4 = vpop.f32.mrf.mxu1  ;;  %vm12481_vm3 = vnez %v12242_v51 }
 0x1b5   : > { %v2770_v42 = vrot.slane %v2768_v26, 7  ;;  %v2360_v46 = vadd.f32 %v2359_v4, %v2260_v16  ;;  %v2960_v48 = vpop.permute.xlu1 %2959  ;;  %v2878_v57 = vrot.slane %v2771_v24, 1  ;;  %v2615_v20 = vpack.c.bf16 %v2583_v7, %v2583_v7 }
 0x1b6   : > { %v9822_v58 = vsel %vm2991_vm13, %v2923_v30, %v2960_v48  ;;  %v9850_v30 = vsel %vm8776_vm11, %v9692_v36, 0  ;;  %vm12475_vm11 = vmmov %vm12470_vm5 }
 0x1b7   : > { %v2516_v59 = vadd.f32 %v2461_v21, %v2360_v46  ;;  %3239 = vmatmul.bf16.vlgmr.msra.gmra.mxu3 %v9822_v58  ;;  %v9835_v35 = vsel %vm12470_vm5, %v2877_v17, %v2878_v57  ;;  %v2773_v16 = vor.u32 %v2771_v24, %v2770_v42  ;;  %v2679_v46 = vunpack.c.l.b16 %v2615_v20 }
 0x1b8   : > { %v2880_v19 = vor.u32 %v2878_v57, %v2768_v26 }
 0x1b9   : > { %v2552_v47 = vadd.f32 %v9486_v62, %v2516_v59  ;;  %v2466_v12 = vpop.f32.mrf.mxu2  ;;  %v9842_v14 = vsel %vm12471_vm14, %v9775_v28, %v2773_v16 }
 0x1bb   : > { %v2584_v10 = vmax.f32 %v2552_v47, 0.0 }
 0x1bc   : > { %v2268_v41 = vpop.f32.mrf.mxu0  ;;  %v2362_v21 = vpop.f32.mrf.mxu1 }
 0x1bd   : > { %v2616_v44 = vpack.c.bf16 %v2584_v10, %v2584_v10  ;;  %v2363_v49 = vadd.f32 %v2362_v21, %v2263_v55  ;;  %v2070_v24 = vpop.permute.xlu1 %2069 }
 0x1be   : > { %v2161_v4 = vsel %vm12473_vm15, %v2124_v40, %v2070_v24  ;;  %vm12482_vm15 = vnez %v12292_v27 }
 0x1bf   : > { %v2680_v28 = vunpack.c.l.b16 %v2616_v44  ;;  %v2517_v48 = vadd.f32 %v2464_v15, %v2363_v49  ;;  %7119 = vmatmul.msk.bf16.gmra.mxu2 %vm12474_vm1, %v2161_v4  ;;  %7194 = vmatmul.msk.bf16.gmra.mxu0 %vm2991_vm13, %v9850_v30  ;;  %v2924_v15 = vsel %vm9008_vm8, %v9620_v23, 0  ;;  %v8206_v44 = vld [vmem:[%s12074_s3 + $0xf0] sm:$0xff]  ;;  %vm12476_vm8 = vmmov %vm12467_vm12  ;;  %vm12478_vm12 = vnez %v12236_v32 }
 0x1c0   : > { %v9861_v10 = vsel %vm2991_vm13, %v2924_v15, %v2962_v33  ;;  %3763 = vmatpush.bf16.msrb.mxu3 %v8206_v44  ;;  %vm12480_vm14 = vmmov %vm12476_vm8 }
 0x1c1   : > { %v2703_v17 = vpack.c.b16 %v2680_v28, %v2679_v46  ;;  %v2469_v53 = vpop.f32.mrf.mxu2  ;;  %v2553_v55 = vadd.f32 %v9486_v62, %v2517_v48  ;;  %vm12483_vm1 = vmmov %vm12470_vm5 }
 0x1c3   : > { %2975 = vrot.lane.b32.xlu1 %v2703_v17, %s8493_s17  ;;  %v2776_v7 = vshrl.u32 %v2703_v17, 16  ;;  %v2779_v59 = vshll.u32 %v2703_v17, 16  ;;  %v2585_v21 = vmax.f32 %v2553_v55, 0.0  ;;  %v9880_v17 = vsel %vm8746_vm4, %v9721_v0, 0 }
 0x1c4   : > { %v2270_v22 = vpop.f32.mrf.mxu0  ;;  %v2364_v36 = vpop.f32.mrf.mxu1  ;;  %vm12479_vm4 = vnez %v12281_v6 }
 0x1c5   : > { %v2778_v16 = vrot.slane %v2776_v7, 7  ;;  %v2365_v47 = vadd.f32 %v2364_v36, %v2265_v13  ;;  %v2881_v20 = vrot.slane %v2779_v59, 1  ;;  %v2617_v57 = vpack.c.bf16 %v2585_v21, %v2585_v21 }
 0x1c7   : > { %v2518_v40 = vadd.f32 %v2466_v12, %v2365_v47  ;;  %3244 = vmatmul.bf16.gmra.mxu3 %v9861_v10  ;;  %v9868_v49 = vsel %vm12475_vm11, %v2880_v19, %v2881_v20  ;;  %v2781_v45 = vor.u32 %v2779_v59, %v2778_v16  ;;  %v2858_v12 = vsel %vm12477_vm10, %v8735_v60, %v9579_v9  ;;  %v8182_v9 = vld [vmem:[%s12074_s3 + $0x30] sm:$0xff]  ;;  %vm12484_vm11 = vmmov %vm12476_vm8 }
 0x1c8   : > { %v2940_v33 = vsel %vm12478_vm12, %v2858_v12, 0  ;;  %3485 = vmatpush.bf16.msrb.mxu1 %v8182_v9  ;;  %v2925_v47 = vsel %vm12479_vm4, %v9654_v52, 0  ;;  %v2883_v44 = vor.u32 %v2881_v20, %v2776_v7  ;;  %vm12486_vm10 = vnez %v12310_v56  ;;  %vm12487_vm12 = vmmov %vm12483_vm1 }
 0x1c9   : > { %v2554_v23 = vadd.f32 %v9486_v62, %v2518_v40  ;;  %v2471_v13 = vpop.f32.mrf.mxu2  ;;  %v9872_v26 = vsel %vm12476_vm8, %v2770_v42, %v2781_v45  ;;  %v2681_v42 = vunpack.c.l.b16 %v2617_v57  ;;  %vm12485_vm8 = vnez %v12240_v11  ;;  %vm12488_vm4 = vmmov %vm12484_vm11 }
 0x1cb   : > { %v2586_v24 = vmax.f32 %v2554_v23, 0.0 }
 0x1cc   : > { %v2273_v4 = vpop.f32.mrf.mxu0  ;;  %v2367_v46 = vpop.f32.mrf.mxu1 }
 0x1cd   : > { %v2618_v28 = vpack.c.bf16 %v2586_v24, %v2586_v24  ;;  %v2368_v48 = vadd.f32 %v2367_v46, %v2268_v41 }
 0x1cf   : > { %v2682_v55 = vunpack.c.l.b16 %v2618_v28  ;;  %v2519_v59 = vadd.f32 %v2469_v53, %v2368_v48  ;;  %7195 = vmatmul.msk.bf16.gmra.mxu0 %vm2991_vm13, %v9880_v17  ;;  %7256 = vmatmul.msk.bf16.vlgmr.msrb.gmra.mxu2 %vm2991_vm13, %v2940_v33 }
 0x1d1   : > { %v2704_v41 = vpack.c.b16 %v2682_v55, %v2681_v42  ;;  %v2474_v36 = vpop.f32.mrf.mxu2  ;;  %v2555_v3 = vadd.f32 %v9486_v62, %v2519_v59 }
 0x1d3   : > { %2977 = vrot.lane.b32.xlu2 %v2704_v41, %s8493_s17  ;;  %v2784_v32 = vshrl.u32 %v2704_v41, 16  ;;  %v2787_v0 = vshll.u32 %v2704_v41, 16  ;;  %v2587_v57 = vmax.f32 %v2555_v3, 0.0  ;;  %v2966_v3 = vpop.permute.xlu2 %2965 }
 0x1d4   : > { %v2275_v15 = vpop.f32.mrf.mxu0  ;;  %v2369_v53 = vpop.f32.mrf.mxu1 }
 0x1d5   : > { %v2786_v19 = vrot.slane %v2784_v32, 7  ;;  %v2370_v21 = vadd.f32 %v2369_v53, %v2270_v22  ;;  %v2964_v40 = vpop.permute.xlu0 %2963  ;;  %v2884_v45 = vrot.slane %v2787_v0, 1  ;;  %v2619_v22 = vpack.c.bf16 %v2587_v57, %v2587_v57 }
 0x1d6   : > { %v9896_v23 = vsel %vm2991_vm13, %v2925_v47, %v2964_v40 }
 0x1d7   : > { %v2520_v24 = vadd.f32 %v2471_v13, %v2370_v21  ;;  %3249 = vmatmul.bf16.gmra.mxu3 %v9896_v23  ;;  %v9900_v12 = vsel %vm12470_vm5, %v2883_v44, %v2884_v45  ;;  %v2789_v46 = vor.u32 %v2787_v0, %v2786_v19  ;;  %v9909_v13 = vsel %vm12481_vm3, %v9742_v25, 0  ;;  %vm12491_vm3 = vmmov %vm12483_vm1 }
 0x1d8   : > { %v2683_v55 = vunpack.c.l.b16 %v2619_v22  ;;  %v2886_v40 = vor.u32 %v2884_v45, %v2784_v32  ;;  %vm12489_vm5 = vnez %v12244_v38 }
 0x1d9   : > { %v2556_v28 = vadd.f32 %v9486_v62, %v2520_v24  ;;  %v2476_v6 = vpop.f32.mrf.mxu2  ;;  %v9904_v52 = vsel %vm12480_vm14, %v2778_v16, %v2789_v46  ;;  %v8205_v46 = vld [vmem:[%s12074_s3 + $0xe8] sm:$0xff]  ;;  %vm12490_vm14 = vnez %v12324_v43 }
 0x1da   : > { %3764 = vmatpush.bf16.msrb.mxu3 %v8205_v46 }
 0x1db   : > { %v2588_v7 = vmax.f32 %v2556_v28, 0.0 }
 0x1dc   : > { %v2278_v20 = vpop.f32.mrf.mxu0  ;;  %v2372_v48 = vpop.f32.mrf.mxu1 }
 0x1dd   : > { %v2620_v33 = vpack.c.bf16 %v2588_v7, %v2588_v7  ;;  %v2373_v42 = vadd.f32 %v2372_v48, %v2273_v4 }
 0x1df   : > { %v2684_v59 = vunpack.c.l.b16 %v2620_v33  ;;  %v2521_v9 = vadd.f32 %v2474_v36, %v2373_v42  ;;  %7196 = vmatmul.msk.bf16.gmra.mxu0 %vm2991_vm13, %v9909_v13  ;;  %7257 = vmatmul.msk.bf16.gmra.mxu2 %vm2991_vm13, %v9752_v2  ;;  %v2926_v36 = vsel %vm12482_vm15, %v9701_v29, 0  ;;  %v9937_v42 = vsel %vm12485_vm8, %v9787_v61, 0  ;;  %v9952_v61 = vld [vmem:[%s12392_s2] ss:$0 sm:$0xff]  ;;  %vm12492_vm15 = vmmov %vm12488_vm4  ;;  %s8441_s2 = scalar_lea.hbm %s8440_s1, 1 }
 0x1e0   : > { %v9921_v2 = vsel %vm2991_vm13, %v2926_v36, %v2966_v3  ;;  %vm12495_vm8 = vmmov %vm12491_vm3  ;;  %p8442_p11 = scmp.ne.s32.totalorder %s8440_s1, %s8441_s2  ;;  %p8447_p1 = scmp.lt.s32.totalorder %s8445_s15, %s8441_s2 }
 0x1e1   : > { %v2705_v16 = vpack.c.b16 %v2684_v59, %v2683_v55  ;;  %v2479_v41 = vpop.f32.mrf.mxu2  ;;  %v2557_v0 = vadd.f32 %v9486_v62, %v2521_v9 }
 0x1e2   : > { %p8443_p12 = pnand %p8442_p11, %p8598_p5  ;;  %p8448_p2 = por %p8447_p1, %p8446_p0 }
 0x1e3   : > { %2979 = vrot.lane.b32.xlu0 %v2705_v16, %s8493_s17  ;;  %v2792_v4 = vshrl.u32 %v2705_v16, 16  ;;  %v2795_v51 = vshll.u32 %v2705_v16, 16  ;;  %v2589_v57 = vmax.f32 %v2557_v0, 0.0 }
 0x1e4   : > { %v2280_v25 = vpop.f32.mrf.mxu0  ;;  %v2374_v53 = vpop.f32.mrf.mxu1  ;;  %p8444_p13 = pneg %p8443_p12 }
 0x1e5   : > { %v2794_v47 = vrot.slane %v2792_v4, 7  ;;  %v2375_v21 = vadd.f32 %v2374_v53, %v2275_v15  ;;  %v2887_v44 = vrot.slane %v2795_v51, 1  ;;  %v2621_v15 = vpack.c.bf16 %v2589_v57, %v2589_v57 }
 0x1e6   : > { %p8449_p3 = pnand %p8448_p2, %p8444_p13 }
 0x1e7   : > { %v2522_v24 = vadd.f32 %v2476_v6, %v2375_v21  ;;  %3254 = vmatmul.bf16.gmra.mxu3 %v9921_v2  ;;  %v9928_v28 = vsel %vm12483_vm1, %v2886_v40, %v2887_v44  ;;  %v2797_v27 = vor.u32 %v2795_v51, %v2794_v47  ;;  %v2685_v55 = vunpack.c.l.b16 %v2621_v15 }
 0x1e8   : > { %v2927_v51 = vsel %vm12486_vm10, %v9728_v39, 0  ;;  %v2889_v57 = vor.u32 %v2887_v44, %v2792_v4  ;;  %vm12493_vm1 = vnez %v12261_v54  ;;  %vm12496_vm10 = vmmov %vm12488_vm4 }
 0x1e9   : > { %v2558_v29 = vadd.f32 %v9486_v62, %v2522_v24  ;;  %v9932_v32 = vsel %vm12484_vm11, %v2786_v19, %v2797_v27  ;;  %v2481_v22 = vpop.f32.mrf.mxu2  ;;  %v8181_v62 = vld [vmem:[%s12074_s3 + $0x28] sm:$0xff]  ;;  %v8210_v19 = vld [vmem:[%s12074_s3 + $0x110] sm:$0xff]  ;;  %vm12494_vm11 = vnez %v12332_v63 }
 0x1ea   : > { %3486 = vmatpush.bf16.msrb.mxu1 %v8181_v62  ;;  %3856 = vmatpush.bf16.msra.mxu0 %v8210_v19  ;;  %v8204_v62 = vld [vmem:[%s12074_s3 + $0xe0] sm:$0xff] }
 0x1eb   : > { %v2590_v45 = vmax.f32 %v2558_v29, 0.0  ;;  %3765 = vmatpush.bf16.msrb.mxu3 %v8204_v62 }
 0x1ec   : > { %v2283_v6 = vpop.f32.mrf.mxu0  ;;  %v2377_v7 = vpop.f32.mrf.mxu1 }
 0x1ed   : > { %v2622_v48 = vpack.c.bf16 %v2590_v45, %v2590_v45  ;;  %v2378_v33 = vadd.f32 %v2377_v7, %v2278_v20 }
 0x1ef   : > { %v2686_v59 = vunpack.c.l.b16 %v2622_v48  ;;  %v2523_v9 = vadd.f32 %v2479_v41, %v2378_v33  ;;  %7197 = vmatmul.msk.bf16.gmra.mxu0 %vm2991_vm13, %v9937_v42  ;;  %7258 = vmatmul.msk.bf16.gmra.mxu2 %vm2991_vm13, %v9804_v5 }
 0x1f1   : > { %v2706_v11 = vpack.c.b16 %v2686_v59, %v2685_v55  ;;  %v2559_v20 = vadd.f32 %v9952_v61, %v2523_v9  ;;  %v2484_v40 = vpop.f32.mrf.mxu2 }
 0x1f3   : > { %2981 = vrot.lane.b32.xlu1 %v2706_v11, %s8493_s17  ;;  %v2800_v16 = vshrl.u32 %v2706_v11, 16  ;;  %v2803_v41 = vshll.u32 %v2706_v11, 16  ;;  %v2591_v27 = vmax.f32 %v2559_v20, 0.0 }
 0x1f4   : > { %v2285_v3 = vpop.f32.mrf.mxu0  ;;  %v2379_v0 = vpop.f32.mrf.mxu1 }
 0x1f5   : > { %v2802_v53 = vrot.slane %v2800_v16, 7  ;;  %v2380_v36 = vadd.f32 %v2379_v0, %v2280_v25  ;;  %v2968_v21 = vpop.permute.xlu0 %2967  ;;  %v2890_v24 = vrot.slane %v2803_v41, 1  ;;  %v2623_v25 = vpack.c.bf16 %v2591_v27, %v2591_v27 }
 0x1f6   : > { %v9960_v46 = vsel %vm2991_vm13, %v2927_v51, %v2968_v21 }
 0x1f7   : > { %v2524_v29 = vadd.f32 %v2481_v22, %v2380_v36  ;;  %3259 = vmatmul.bf16.gmra.mxu3 %v9960_v46  ;;  %v9964_v15 = vsel %vm12487_vm12, %v2889_v57, %v2890_v24  ;;  %v2805_v45 = vor.u32 %v2803_v41, %v2802_v53  ;;  %v9973_v22 = vsel %vm12489_vm5, %v9835_v35, 0  ;;  %vm12501_vm5 = vmmov %vm12491_vm3 }
 0x1f8   : > { %v2687_v55 = vunpack.c.l.b16 %v2623_v25  ;;  %v2928_v41 = vsel %vm12490_vm14, %v9746_v31, 0  ;;  %v2892_v21 = vor.u32 %v2890_v24, %v2800_v16  ;;  %vm12502_vm14 = vmmov %vm12496_vm10 }
 0x1f9   : > { %v2560_v56 = vadd.f32 %v9952_v61, %v2524_v29  ;;  %v9968_v39 = vsel %vm12488_vm4, %v2794_v47, %v2805_v45  ;;  %v2486_v47 = vpop.f32.mrf.mxu2  ;;  %v8180_v45 = vld [vmem:[%s12074_s3 + $0x20] sm:$0xff] }
 0x1fa   : > { %3487 = vmatpush.bf16.msrb.mxu1 %v8180_v45 }
 0x1fb   : > { %v2592_v7 = vmax.f32 %v2560_v56, 0.0 }
 0x1fc   : > { %v2288_v4 = vpop.f32.mrf.mxu0  ;;  %v2382_v44 = vpop.f32.mrf.mxu1 }
 0x1fd   : > { %v2624_v48 = vpack.c.bf16 %v2592_v7, %v2592_v7  ;;  %v2383_v33 = vadd.f32 %v2382_v44, %v2283_v6  ;;  %v2972_v62 = vpop.permute.xlu2 %2971 }
 0x1ff   : > { %v2688_v59 = vunpack.c.l.b16 %v2624_v48  ;;  %v2525_v9 = vadd.f32 %v2484_v40, %v2383_v33  ;;  %7198 = vmatmul.msk.bf16.gmra.mxu0 %vm2991_vm13, %v9973_v22  ;;  %7259 = vmatmul.msk.bf16.gmra.mxu2 %vm2991_vm13, %v9850_v30 }
 0x201   : > { %v2707_v6 = vpack.c.b16 %v2688_v59, %v2687_v55  ;;  %v2561_v38 = vadd.f32 %v9952_v61, %v2525_v9  ;;  %v10006_v55 = vsel %vm12493_vm1, %v9868_v49, 0 }
 0x203   : > { %2983 = vrot.lane.b32.xlu2 %v2707_v6, %s8493_s17  ;;  %v2808_v35 = vshrl.u32 %v2707_v6, 16  ;;  %v2811_v19 = vshll.u32 %v2707_v6, 16  ;;  %v2593_v27 = vmax.f32 %v2561_v38, 0.0 }
 0x204   : > { %v2290_v11 = vpop.f32.mrf.mxu0  ;;  %v2384_v20 = vpop.f32.mrf.mxu1 }
 0x205   : > { %v2810_v0 = vrot.slane %v2808_v35, 7  ;;  %v2385_v51 = vadd.f32 %v2384_v20, %v2285_v3  ;;  %v2970_v36 = vpop.permute.xlu1 %2969  ;;  %v2893_v40 = vrot.slane %v2811_v19, 1  ;;  %v2489_v3 = vpop.f32.mrf.mxu2  ;;  %v2625_v24 = vpack.c.bf16 %v2593_v27, %v2593_v27 }
 0x206   : > { %v9988_v57 = vsel %vm2991_vm13, %v2928_v41, %v2970_v36  ;;  %v2929_v20 = vsel %vm12494_vm11, %v9793_v37, 0 }
 0x207   : > { %v2526_v29 = vadd.f32 %v2486_v47, %v2385_v51  ;;  %3264 = vmatmul.bf16.gmra.mxu3 %v9988_v57  ;;  %v9995_v56 = vsel %vm12491_vm3, %v2892_v21, %v2893_v40  ;;  %v2813_v43 = vor.u32 %v2811_v19, %v2810_v0  ;;  %v2689_v59 = vunpack.c.l.b16 %v2625_v24  ;;  %v12497_v24 = vld [vmem:[#allocation16_spill] sm:$0xff] }
 0x208   : > { %v2895_v36 = vor.u32 %v2893_v40, %v2808_v35  ;;  %v10020_v27 = vsel %vm2991_vm13, %v2929_v20, %v2972_v62  ;;  %vm12498_vm12 = vnez %v12497_v24 }
 0x209   : > { %v2562_v31 = vadd.f32 %v9952_v61, %v2526_v29  ;;  %v9999_v16 = vsel %vm12492_vm15, %v2802_v53, %v2813_v43 }
 0x20b   : > { %v2594_v25 = vmax.f32 %v2562_v31, 0.0 }
 0x20c   : > { %v10001_v7 = vpop.f32.mrf.mxu0  ;;  %v2387_v44 = vpop.f32.mrf.mxu1 }
 0x20d   : > { %v2626_v48 = vpack.c.bf16 %v2594_v25, %v2594_v25  ;;  %v2388_v33 = vadd.f32 %v2387_v44, %v2288_v4  ;;  %v2491_v54 = vpop.f32.mrf.mxu2  ;;  %v10035_v25 = vsel %vm12498_vm12, %v9900_v12, 0 }
 0x20f   : > { %v2690_v9 = vunpack.c.l.b16 %v2626_v48  ;;  %v2527_v47 = vadd.f32 %v2489_v3, %v2388_v33  ;;  %7199 = vmatmul.msk.bf16.gmra.mxu0 %vm2991_vm13, %v10006_v55  ;;  %7260 = vmatmul.msk.bf16.gmra.mxu2 %vm2991_vm13, %v9880_v17 }
 0x211   : > { %v2708_v53 = vpack.c.b16 %v2690_v9, %v2689_v59  ;;  %v2563_v6 = vadd.f32 %v9952_v61, %v2527_v47 }
 0x213   : > { %2985 = vrot.lane.b32.xlu0 %v2708_v53, %s8493_s17  ;;  %v2816_v4 = vshrl.u32 %v2708_v53, 16  ;;  %v2819_v38 = vshll.u32 %v2708_v53, 16  ;;  %v2595_v29 = vmax.f32 %v2563_v6, 0.0  ;;  %v12499_v53 = vld [vmem:[#allocation26_spill] sm:$0xff] }
 0x214   : > { %v10014_v49 = vpop.f32.mrf.mxu0  ;;  %v2389_v19 = vpop.f32.mrf.mxu1  ;;  %vm12500_vm4 = vnez %v12499_v53 }
 0x215   : > { %v2818_v41 = vrot.slane %v2816_v4, 7  ;;  %v2390_v51 = vadd.f32 %v2389_v19, %v2290_v11  ;;  %v2896_v21 = vrot.slane %v2819_v38, 1  ;;  %v2627_v37 = vpack.c.bf16 %v2595_v29, %v2595_v29  ;;  %v12503_v29 = vld [vmem:[#allocation17_spill] sm:$0xff] }
 0x216   : > { %v2930_v62 = vsel %vm12500_vm4, %v9842_v14, 0  ;;  %v8203_v14 = vld [vmem:[%s12074_s3 + $0xd8] sm:$0xff]  ;;  %vm12504_vm3 = vnez %v12503_v29 }
 0x217   : > { %v2528_v45 = vadd.f32 %v2491_v54, %v2390_v51  ;;  %3269 = vmatmul.bf16.gmra.mxu3 %v10020_v27  ;;  %v10024_v43 = vsel %vm12495_vm8, %v2895_v36, %v2896_v21  ;;  %v2821_v31 = vor.u32 %v2819_v38, %v2818_v41  ;;  %v2691_v44 = vunpack.c.l.b16 %v2627_v37  ;;  %v8209_v36 = vld [vmem:[%s12074_s3 + $0x108] sm:$0xff] }
 0x218   : > { %v2898_v6 = vor.u32 %v2896_v21, %v2816_v4  ;;  %v8179_v4 = vld [vmem:[%s12074_s3 + $0x18] sm:$0xff]  ;;  %3766 = vmatpush.bf16.msrb.mxu3 %v8203_v14  ;;  %3857 = vmatpush.bf16.msra.mxu0 %v8209_v36  ;;  %v12509_v14 = vld [vmem:[#allocation29_spill] sm:$0xff] }
 0x219   : > { %v2564_v3 = vadd.f32 %v9952_v61, %v2528_v45  ;;  %v10028_v63 = vsel %vm12496_vm10, %v2810_v0, %v2821_v31  ;;  %3488 = vmatpush.bf16.msrb.mxu1 %v8179_v4  ;;  %vm12510_vm11 = vnez %v12509_v14 }
 0x21a   : > { %v2932_v4 = vsel %vm12510_vm11, %v9904_v52, 0 }
 0x21b   : > { %v2596_v11 = vmax.f32 %v2564_v3, 0.0  ;;  %2957 = vrot.lane.b32.xlu0 %v12399_v8, %s8493_s17  ;;  %v12505_v3 = vld [vmem:[#allocation28_spill] sm:$0xff] }
 0x21c   : > { %v3329_v35 = vpop.f32.mrf.mxu0  ;;  %vm12506_vm15 = vnez %v12505_v3  ;;  %v2392_v24 = vpop.f32.mrf.mxu1 }
 0x21d   : > { %v2628_v40 = vpack.c.bf16 %v2596_v11, %v2596_v11  ;;  %v2931_v37 = vsel %vm12506_vm15, %v9872_v26, 0  ;;  %v2393_v26 = vadd.f32 %v2392_v24, %v10001_v7 }
 0x21f   : > { %v2692_v48 = vunpack.c.l.b16 %v2628_v40  ;;  %7200 = vmatmul.msk.bf16.gmra.mxu0 %vm2991_vm13, %v10035_v25  ;;  %7261 = vmatmul.msk.bf16.gmra.mxu2 %vm2991_vm13, %v9909_v13 }
 0x221   : > { %v10041_v0 = vpack.c.b16 %v2692_v48, %v2691_v44  ;;  %v12507_v48 = vld [vmem:[#allocation22_spill] sm:$0xff] }
 0x222   : > { %vm12508_vm1 = vnez %v12507_v48 }
 0x223   : > { %2987 = vrot.lane.b32.xlu1 %v10041_v0, %s8493_s17  ;;  %v2824_v33 = vshrl.u32 %v10041_v0, 16  ;;  %v2827_v59 = vshll.u32 %v10041_v0, 16 }
 0x224   : > { %v3331_v9 = vpop.f32.mrf.mxu0  ;;  %v2394_v36 = vpop.f32.mrf.mxu1 }
 0x225   : > { %v10049_v12 = vrot.slane %v2824_v33, 7  ;;  %v2974_v47 = vpop.permute.xlu0 %2973  ;;  %v10054_v38 = vrot.slane %v2827_v59, 1 }
 0x226   : > { %v10057_v54 = vsel %vm2991_vm13, %v2930_v62, %v2974_v47 }
 0x227   : > { %3274 = vmatmul.bf16.gmra.mxu3 %v10057_v54  ;;  %v10062_v19 = vsel %vm12501_vm5, %v2898_v6, %v10054_v38  ;;  %v2829_v20 = vor.u32 %v2827_v59, %v10049_v12  ;;  %v10098_v59 = vsel %vm12508_vm1, %v9964_v15, 0 }
 0x229   : > { %v10066_v51 = vsel %vm12502_vm14, %v2818_v41, %v2829_v20  ;;  %v10080_v41 = vsel %vm12504_vm3, %v9928_v28, 0  ;;  %v8202_v20 = vld [vmem:[%s12074_s3 + $0xd0] sm:$0xff]  ;;  %vm12522_vm14 = vsmask.f32 7424  ;;  %vm12526_vm3 = vsmask.f32 256 }
 0x22a   : > { %3767 = vmatpush.bf16.msrb.mxu3 %v8202_v20  ;;  %vm12527_vm15 = vmmov %vm12522_vm14 }
 0x22c   : > { %v3334_v21 = vpop.f32.mrf.mxu0 }
 0x22d   : > { %v2978_v62 = vpop.permute.xlu2 %2977 }
 0x22e   : > { %v10114_v29 = vsel %vm2991_vm13, %v2932_v4, %v2978_v62 }
 0x22f   : > { %7201 = vmatmul.msk.bf16.gmra.mxu0 %vm2991_vm13, %v10080_v41  ;;  %7262 = vmatmul.msk.bf16.gmra.mxu2 %vm2991_vm13, %v9937_v42 }
 0x234   : > { %v3336_v45 = vpop.f32.mrf.mxu0 }
 0x235   : > { %v2976_v31 = vpop.permute.xlu1 %2975 }
 0x236   : > { %v10090_v11 = vsel %vm2991_vm13, %v2931_v37, %v2976_v31  ;;  %v2395_v31 = vadd.f32 %v2394_v36, %v10014_v49 }
 0x237   : > { %3279 = vmatmul.bf16.gmra.mxu3 %v10090_v11 }
 0x23a   : > { %v3240_v28 = vpop.f32.mrf.mxu3 }
 0x23b   : > { %v10093_v40 = vadd.f32 %v3329_v35, %v3240_v28 }
 0x23c   : > { %v3339_v44 = vpop.f32.mrf.mxu0 }
 0x23f   : > { %7202 = vmatmul.msk.bf16.gmra.mxu0 %vm2991_vm13, %v10098_v59  ;;  %7263 = vmatmul.msk.bf16.gmra.mxu2 %vm2991_vm13, %v9973_v22 }
 0x242   : > { %v2494_v47 = vpop.f32.mrf.mxu2  ;;  %v3242_v53 = vpop.f32.mrf.mxu3 }
 0x243   : > { %v2529_v35 = vadd.f32 %v2494_v47, %v2393_v26  ;;  %v10105_v6 = vadd.f32 %v3331_v9, %v3242_v53  ;;  %v8178_v9 = vld [vmem:[%s12074_s3 + $0x10] sm:$0xff] }
 0x244   : > { %v3341_v15 = vpop.f32.mrf.mxu0  ;;  %3489 = vmatpush.bf16.msrb.mxu1 %v8178_v9  ;;  %v12511_v47 = vld [vmem:[#allocation21_spill] sm:$0xff] }
 0x245   : > { %v2565_v7 = vadd.f32 %v9952_v61, %v2529_v35  ;;  %vm12512_vm8 = vnez %v12511_v47 }
 0x246   : > { %v10128_v53 = vsel %vm12512_vm8, %v9995_v56, 0 }
 0x247   : > { %3284 = vmatmul.bf16.gmra.mxu3 %v10114_v29  ;;  %v2597_v28 = vmax.f32 %v2565_v7, 0.0  ;;  %v12513_v7 = vld [vmem:[#allocation30_spill] sm:$0xff] }
 0x248   : > { %vm12514_vm10 = vnez %v12513_v7  ;;  %v12519_v7 = vld [vmem:[#allocation25_spill] sm:$0xff] }
 0x249   : > { %v2629_v62 = vpack.c.bf16 %v2597_v28, %v2597_v28  ;;  %v2933_v56 = vsel %vm12514_vm10, %v9932_v32, 0  ;;  %v12515_v28 = vld [vmem:[#allocation23_spill] sm:$0xff]  ;;  %vm12520_vm5 = vnez %v12519_v7  ;;  %v12523_v7 = vld [vmem:[#allocation24_spill] sm:$0xff] }
 0x24a   : > { %v2496_v3 = vpop.f32.mrf.mxu2  ;;  %v3245_v37 = vpop.f32.mrf.mxu3  ;;  %vm12516_vm12 = vnez %v12515_v28 }
 0x24b   : > { %v2530_v52 = vadd.f32 %v2496_v3, %v2395_v31  ;;  %v10122_v24 = vadd.f32 %v3334_v21, %v3245_v37  ;;  %v2693_v21 = vunpack.c.l.b16 %v2629_v62 }
 0x24c   : > { %v3344_v48 = vpop.f32.mrf.mxu0 }
 0x24d   : > { %v2566_v26 = vadd.f32 %v9952_v61, %v2530_v52  ;;  %v10152_v52 = vsel %vm12516_vm12, %v10024_v43, 0 }
 0x24f   : > { %v2598_v35 = vmax.f32 %v2566_v26, 0.0  ;;  %7203 = vmatmul.msk.bf16.gmra.mxu0 %vm2991_vm13, %v10128_v53  ;;  %7264 = vmatmul.msk.bf16.gmra.mxu2 %vm2991_vm13, %v10006_v55 }
 0x251   : > { %v2630_v49 = vpack.c.bf16 %v2598_v35, %v2598_v35  ;;  %v12517_v35 = vld [vmem:[#allocation31_spill] sm:$0xff] }
 0x252   : > { %v3247_v20 = vpop.f32.mrf.mxu3  ;;  %vm12518_vm4 = vnez %v12517_v35  ;;  %v2935_v35 = vsel %vm9539_vm2, %v9999_v16, 0  ;;  %vm12524_vm2 = vnez %v12523_v7 }
 0x253   : > { %v2694_v14 = vunpack.c.l.b16 %v2630_v49  ;;  %v10134_v4 = vadd.f32 %v3336_v45, %v3247_v20  ;;  %v2934_v43 = vsel %vm12518_vm4, %v9968_v39, 0  ;;  %v8208_v20 = vld [vmem:[%s12074_s3 + $0x100] sm:$0xff] }
 0x254   : > { %v3346_v61 = vpop.f32.mrf.mxu0  ;;  %3858 = vmatpush.bf16.msra.mxu0 %v8208_v20  ;;  %v8176_v39 = vld [vmem:[%s12074_s3] sm:$0xff]  ;;  %v10205_v20 = vpop.f32.mrf.mxu2 }
 0x255   : > { %v2980_v36 = vpop.permute.xlu0 %2979  ;;  %v10139_v9 = vpack.c.b16 %v2694_v14, %v2693_v21 }
 0x256   : > { %v10142_v31 = vsel %vm2991_vm13, %v2933_v56, %v2980_v36  ;;  %v10184_v56 = vsel %vm12520_vm5, %v10062_v19, 0  ;;  %vm4391_vm5 = vcmask 1043456  }
 0x257   : > { %3289 = vmatmul.bf16.gmra.mxu3 %v10142_v31  ;;  %2989 = vrot.lane.b32.xlu2 %v10139_v9, %s8493_s17  ;;  %v2832_v0 = vshrl.u32 %v10139_v9, 16  ;;  %s6857_s17 = sshll.u32 %s405_s19, 4  ;;  %s6858_s17 = int_to_ptr.vmem [resolvable:$true] %s6857_s17 }
 0x25a   : > { %v3250_v3 = vpop.f32.mrf.mxu3 }
 0x25b   : > { %v10147_v37 = vadd.f32 %v3339_v44, %v3250_v3  ;;  %v8201_v44 = vld [vmem:[%s12074_s3 + $0xc8] sm:$0xff] }
 0x25c   : > { %v3349_v45 = vpop.f32.mrf.mxu0  ;;  %3768 = vmatpush.bf16.msrb.mxu3 %v8201_v44 }
 0x25d   : > { %v2984_v28 = vpop.permute.xlu2 %2983 }
 0x25e   : > { %v10197_v19 = vsel %vm2991_vm13, %v2935_v35, %v2984_v28  ;;  %v10224_v28 = vpop.f32.mrf.mxu2 }
 0x25f   : > { %7204 = vmatmul.msk.bf16.gmra.mxu0 %vm2991_vm13, %v10152_v52  ;;  %7265 = vmatmul.msk.bf16.gmra.mxu2 %vm2991_vm13, %v10035_v25 }
 0x262   : > { %v3252_v32 = vpop.f32.mrf.mxu3 }
 0x263   : > { %v10158_v26 = vadd.f32 %v3341_v15, %v3252_v32  ;;  %v8177_v15 = vld [vmem:[%s12074_s3 + $0x8] sm:$0xff] }
 0x264   : > { %v3351_v47 = vpop.f32.mrf.mxu0  ;;  %3490 = vmatpush.bf16.msrb.mxu1 %v8177_v15  ;;  %v2901_v15 = vor.u32 %v10054_v38, %v2824_v33 }
 0x265   : > { %v2982_v62 = vpop.permute.xlu1 %2981 }
 0x266   : > { %v10167_v49 = vsel %vm2991_vm13, %v2934_v43, %v2982_v62 }
 0x267   : > { %3294 = vmatmul.bf16.gmra.mxu3 %v10167_v49 }
 0x268   : > { %3491 = vmatpush.bf16.msrb.mxu1 %v8176_v39 }
 0x26a   : > { %v3255_v21 = vpop.f32.mrf.mxu3 }
 0x26b   : > { %v10176_v14 = vadd.f32 %v3344_v48, %v3255_v21  ;;  %v12188_v48 = vshll.u32 %v10139_v9, 16 }
 0x26c   : > { %v3354_v36 = vpop.f32.mrf.mxu0 }
 0x26d   : > { %v2902_v43 = vrot.slane %v12188_v48, 1 }
 0x26f   : > { %7205 = vmatmul.msk.bf16.gmra.mxu0 %vm2991_vm13, %v10184_v56  ;;  %7266 = vmatmul.msk.bf16.gmra.mxu2 %vm2991_vm13, %v10080_v41  ;;  %v2903_v39 = vsel %vm12522_vm14, %v2901_v15, %v2902_v43 }
 0x272   : > { %v3257_v3 = vpop.f32.mrf.mxu3 }
 0x273   : > { %v10191_v32 = vadd.f32 %v3346_v61, %v3257_v3  ;;  %v10212_v3 = vsel %vm12524_vm2, %v2903_v39, 0  ;;  %v2834_v39 = vrot.slane %v2832_v0, 7 }
 0x274   : > { %v3356_v44 = vpop.f32.mrf.mxu0 }
 0x275   : > { %v2839_v48 = vsel %vm12526_vm3, %v2834_v39, %v9013_v50 }
 0x277   : > { %3299 = vmatmul.bf16.gmra.mxu3 %v10197_v19 }
 0x27a   : > { %v3260_v61 = vpop.f32.mrf.mxu3 }
 0x27b   : > { %v10207_v21 = vadd.f32 %v3349_v45, %v3260_v61  ;;  %v8200_v45 = vld [vmem:[%s12074_s3 + $0xc0] sm:$0xff]  ;;  %v2936_v61 = vsel %vm9590_vm7, %v10028_v63, 0  ;;  %v2939_v63 = vsel %vm9829_vm9, %v2839_v48, 0 }
 0x27c   : > { %v3359_v16 = vpop.f32.mrf.mxu0  ;;  %3769 = vmatpush.bf16.msrb.mxu3 %v8200_v45  ;;  %v10241_v45 = vpop.f32.mrf.mxu2 }
 0x27f   : > { %7206 = vmatmul.msk.bf16.gmra.mxu0 %vm2991_vm13, %v10212_v3  ;;  %7267 = vmatmul.msk.bf16.gmra.mxu2 %vm2991_vm13, %v10098_v59 }
 0x282   : > { %v3262_v33 = vpop.f32.mrf.mxu3 }
 0x283   : > { %v10219_v38 = vadd.f32 %v3351_v47, %v3262_v33  ;;  %v2904_v47 = vor.u32 %v2902_v43, %v2832_v0  ;;  %v12529_v43 = vld [vmem:[#allocation27_spill] sm:$0xff] }
 0x284   : > { %v3361_v62 = vpop.f32.mrf.mxu0  ;;  %vm12530_vm7 = vnez %v12529_v43 }
 0x285   : > { %v2986_v35 = vpop.permute.xlu0 %2985  ;;  %v2905_v18 = vsel %vm12527_vm15, %v2904_v47, %v8735_v60  ;;  %v12533_v47 = vshll.u32 %v10139_v9, 16 }
 0x286   : > { %v10230_v7 = vsel %vm2991_vm13, %v2936_v61, %v2986_v35  ;;  %v12528_v35 = vld [vmem:[#allocation20_spill] sm:$0xff]  ;;  %v10247_v0 = vsel %vm12530_vm7, %v2905_v18, 0  ;;  %v2937_v18 = vsel %vm9635_vm6, %v10066_v51, 0  ;;  %vm12534_vm6 = vmmov %vm12526_vm3 }
 0x287   : > { %3304 = vmatmul.bf16.gmra.mxu3 %v10230_v7 }
 0x28a   : > { %v3265_v33 = vpop.f32.mrf.mxu3 }
 0x28b   : > { %v10235_v1 = vadd.f32 %v3354_v36, %v3265_v33 }
 0x28c   : > { %v3364_v8 = vpop.f32.mrf.mxu0 }
 0x28d   : > { %v2958_v15 = vpop.permute.xlu0 %2957 }
 0x28e   : > { %v2993_v61 = vsel %vm2991_vm13, %v12528_v35, %v2958_v15  ;;  %v10250_v50 = vsel %vm2991_vm13, %v2939_v63, %v2958_v15  ;;  %v10265_v15 = vpop.f32.mrf.mxu2 }
 0x28f   : > { %7207 = vmatmul.msk.bf16.gmra.mxu0 %vm2991_vm13, %v10247_v0  ;;  %3492 = vmatmul.bf16.vlgmr.msrb.gmra.mxu1 %v2993_v61 }
 0x290   : > { %7268 = vmatmul.msk.bf16.gmra.mxu2 %vm2991_vm13, %v10128_v53 }
 0x292   : > { %v3267_v60 = vpop.f32.mrf.mxu3 }
 0x293   : > { %v10256_v34 = vadd.f32 %v3356_v44, %v3267_v60 }
 0x294   : > { %v3366_v36 = vpop.f32.mrf.mxu0 }
 0x295   : > { %v2988_v48 = vpop.permute.xlu1 %2987 }
 0x296   : > { %v10262_v33 = vsel %vm2991_vm13, %v2937_v18, %v2988_v48  ;;  %v10274_v51 = vpop.f32.mrf.mxu2 }
 0x297   : > { %3309 = vmatmul.bf16.gmra.mxu3 %v10262_v33 }
 0x29a   : > { %v3270_v63 = vpop.f32.mrf.mxu3 }
 0x29b   : > { %v10267_v35 = vadd.f32 %v3359_v16, %v3270_v63  ;;  %v2837_v16 = vor.u32 %v12533_v47, %v2834_v39 }
 0x29c   : > { %v3369_v61 = vpop.f32.mrf.mxu0 }
 0x29e   : > { %v10282_v63 = vpop.f32.mrf.mxu2 }
 0x29f   : > { %3497 = vmatmul.bf16.gmra.mxu1 %v9822_v58  ;;  %7344 = vmatmul.msk.bf16.vlgmr.msra.gmra.mxu0 %vm2991_vm13, %v9804_v5  ;;  %v2838_v5 = vsel %vm12534_vm6, %v10049_v12, %v2837_v16 }
 0x2a0   : > { %7269 = vmatmul.msk.bf16.gmra.mxu2 %vm2991_vm13, %v10152_v52  ;;  %v2938_v9 = vsel %vm9680_vm0, %v2838_v5, 0 }
 0x2a2   : > { %v3272_v44 = vpop.f32.mrf.mxu3 }
 0x2a3   : > { %v10276_v43 = vadd.f32 %v3361_v62, %v3272_v44 }
 0x2a4   : > { %v3371_v60 = vpop.f32.mrf.mxu0 }
 0x2a5   : > { %12532 = vst [vmem:[#allocation16_spill] sm:$0xff] %v10276_v43 }
 0x2a6   : > { %v10299_v47 = vpop.f32.mrf.mxu2 }
 0x2aa   : > { %v3275_v48 = vpop.f32.mrf.mxu3 }
 0x2ab   : > { %v10280_v18 = vadd.f32 %v3364_v8, %v3275_v48 }
 0x2ac   : > { %v3374_v58 = vpop.f32.mrf.mxu0 }
 0x2ae   : > { %v10306_v5 = vpop.f32.mrf.mxu2 }
 0x2af   : > { %3502 = vmatmul.bf16.gmra.mxu1 %v9861_v10  ;;  %7345 = vmatmul.msk.bf16.gmra.mxu0 %vm2991_vm13, %v9850_v30 }
 0x2b0   : > { %7270 = vmatmul.msk.bf16.gmra.mxu2 %vm2991_vm13, %v10184_v56 }
 0x2b1   : > { %v2990_v62 = vpop.permute.xlu2 %2989 }
 0x2b2   : > { %v3277_v8 = vpop.f32.mrf.mxu3  ;;  %v10294_v39 = vsel %vm2991_vm13, %v2938_v9, %v2990_v62 }
 0x2b3   : > { %v10296_v48 = vadd.f32 %v3366_v36, %v3277_v8  ;;  %3314 = vmatmul.bf16.gmra.mxu3 %v10294_v39 }
 0x2b4   : > { %v3376_v12 = vpop.f32.mrf.mxu0 }
 0x2ba   : > { %v3280_v16 = vpop.f32.mrf.mxu3 }
 0x2bb   : > { %v10301_v30 = vadd.f32 %v3369_v61, %v3280_v16 }
 0x2bc   : > { %v3379_v43 = vpop.f32.mrf.mxu0 }
 0x2bd   : > { %12536 = vst [vmem:[#allocation26_spill] sm:$0xff] %v10301_v30 }
 0x2bf   : > { %3507 = vmatmul.bf16.gmra.mxu1 %v9896_v23  ;;  %7346 = vmatmul.msk.bf16.gmra.mxu0 %vm2991_vm13, %v9880_v17 }
 0x2c0   : > { %7271 = vmatmul.msk.bf16.gmra.mxu2 %vm2991_vm13, %v10212_v3 }
 0x2c2   : > { %v3282_v36 = vpop.f32.mrf.mxu3 }
 0x2c3   : > { %v10310_v62 = vadd.f32 %v3371_v60, %v3282_v36  ;;  %3770 = vmatmul.bf16.vlgmr.msrb.gmra.mxu3 %v9861_v10 }
 0x2c4   : > { %v3381_v44 = vpop.f32.mrf.mxu0 }
 0x2ca   : > { %v3285_v9 = vpop.f32.mrf.mxu3 }
 0x2cb   : > { %v10313_v61 = vadd.f32 %v3374_v58, %v3285_v9 }
 0x2cc   : > { %v3384_v8 = vpop.f32.mrf.mxu0 }
 0x2cf   : > { %3512 = vmatmul.bf16.gmra.mxu1 %v9921_v2  ;;  %7347 = vmatmul.msk.bf16.gmra.mxu0 %vm2991_vm13, %v9909_v13 }
 0x2d2   : > { %v3287_v17 = vpop.f32.mrf.mxu3 }
 0x2d3   : > { %v10318_v16 = vadd.f32 %v3376_v12, %v3287_v17  ;;  %3775 = vmatmul.bf16.gmra.mxu3 %v9896_v23 }
 0x2d4   : > { %v3386_v30 = vpop.f32.mrf.mxu0 }
 0x2d5   : > { %12537 = vst [vmem:[#allocation17_spill] sm:$0xff] %v10318_v16 }
 0x2da   : > { %v3290_v60 = vpop.f32.mrf.mxu3 }
 0x2db   : > { %v10321_v36 = vadd.f32 %v3379_v43, %v3290_v60 }
 0x2dc   : > { %v3389_v10 = vpop.f32.mrf.mxu0 }
 0x2dd   : > { %12538 = vst [vmem:[#allocation28_spill] sm:$0xff] %v10321_v36 }
 0x2df   : > { %3517 = vmatmul.bf16.gmra.mxu1 %v9960_v46  ;;  %7348 = vmatmul.msk.bf16.gmra.mxu0 %vm2991_vm13, %v9937_v42 }
 0x2e2   : > { %v3292_v58 = vpop.f32.mrf.mxu3 }
 0x2e3   : > { %v10326_v9 = vadd.f32 %v3381_v44, %v3292_v58  ;;  %3780 = vmatmul.bf16.gmra.mxu3 %v9921_v2 }
 0x2e4   : > { %v3391_v13 = vpop.f32.mrf.mxu0 }
 0x2e5   : > { %12539 = vst [vmem:[#allocation22_spill] sm:$0xff] %v10326_v9 }
 0x2ea   : > { %v3295_v12 = vpop.f32.mrf.mxu3 }
 0x2eb   : > { %v10329_v17 = vadd.f32 %v3384_v8, %v3295_v12 }
 0x2ec   : > { %v3394_v23 = vpop.f32.mrf.mxu0 }
 0x2ed   : > { %12540 = vst [vmem:[#allocation29_spill] sm:$0xff] %v10329_v17  ;;  %v10420_v17 = vpop.f32.mrf.mxu2 }
 0x2ef   : > { %3522 = vmatmul.bf16.gmra.mxu1 %v9988_v57  ;;  %7349 = vmatmul.msk.bf16.gmra.mxu0 %vm2991_vm13, %v9973_v22 }
 0x2f2   : > { %v3297_v43 = vpop.f32.mrf.mxu3 }
 0x2f3   : > { %v10334_v60 = vadd.f32 %v3386_v30, %v3297_v43  ;;  %3785 = vmatmul.bf16.gmra.mxu3 %v9960_v46 }
 0x2f4   : > { %v3396_v42 = vpop.f32.mrf.mxu0 }
 0x2f5   : > { %12541 = vst [vmem:[#allocation21_spill] sm:$0xff] %v10334_v60 }
 0x2fa   : > { %v3300_v44 = vpop.f32.mrf.mxu3 }
 0x2fb   : > { %v10337_v58 = vadd.f32 %v3389_v10, %v3300_v44 }
 0x2fc   : > { %v3399_v2 = vpop.f32.mrf.mxu0 }
 0x2fd   : > { %12542 = vst [vmem:[#allocation30_spill] sm:$0xff] %v10337_v58 }
 0x2ff   : > { %3527 = vmatmul.bf16.gmra.mxu1 %v10020_v27  ;;  %7350 = vmatmul.msk.bf16.gmra.mxu0 %vm2991_vm13, %v10006_v55 }
 0x302   : > { %v3302_v8 = vpop.f32.mrf.mxu3 }
 0x303   : > { %v10342_v12 = vadd.f32 %v3391_v13, %v3302_v8  ;;  %3790 = vmatmul.bf16.gmra.mxu3 %v9988_v57 }
 0x304   : > { %v3401_v22 = vpop.f32.mrf.mxu0 }
 0x305   : > { %12543 = vst [vmem:[#allocation23_spill] sm:$0xff] %v10342_v12 }
 0x30a   : > { %v3305_v30 = vpop.f32.mrf.mxu3 }
 0x30b   : > { %v10345_v43 = vadd.f32 %v3394_v23, %v3305_v30 }
 0x30c   : > { %v3404_v46 = vpop.f32.mrf.mxu0  ;;  %v3493_v60 = vpop.f32.mrf.mxu1 }
 0x30d   : > { %12544 = vst [vmem:[#allocation31_spill] sm:$0xff] %v10345_v43 }
 0x30f   : > { %3532 = vmatmul.bf16.gmra.mxu1 %v10057_v54  ;;  %7351 = vmatmul.msk.bf16.gmra.mxu0 %vm2991_vm13, %v10035_v25 }
 0x312   : > { %v3307_v10 = vpop.f32.mrf.mxu3 }
 0x313   : > { %v10350_v44 = vadd.f32 %v3396_v42, %v3307_v10  ;;  %3795 = vmatmul.bf16.gmra.mxu3 %v10020_v27 }
 0x314   : > { %v3406_v55 = vpop.f32.mrf.mxu0  ;;  %v3495_v13 = vpop.f32.mrf.mxu1 }
 0x315   : > { %12545 = vst [vmem:[#allocation25_spill] sm:$0xff] %v10350_v44 }
 0x31a   : > { %v3310_v8 = vpop.f32.mrf.mxu3 }
 0x31b   : > { %v10353_v57 = vadd.f32 %v3399_v2, %v3310_v8  ;;  %v8251_v2 = vld [vmem:[%s12077_s6 + $0x138] sm:$0xff] }
 0x31c   : > { %v3498_v12 = vpop.f32.mrf.mxu1  ;;  %v3860_v23 = vpop.f32.mrf.mxu0  ;;  %5113 = vmatpush.bf16.msra.mxu2 %v8251_v2 }
 0x31d   : > { %12546 = vst [vmem:[#allocation33_spill] sm:$0xff] %v10353_v57 }
 0x31f   : > { %3537 = vmatmul.bf16.gmra.mxu1 %v10090_v11  ;;  %7352 = vmatmul.msk.bf16.gmra.mxu0 %vm2991_vm13, %v10080_v41  ;;  %v8259_v41 = vld [vmem:[%s12077_s6 + $0x178] sm:$0xff] }
 0x320   : > { %5142 = vmatpush.bf16.msra.mxu3 %v8259_v41 }
 0x322   : > { %v3312_v30 = vpop.f32.mrf.mxu3 }
 0x323   : > { %v10358_v43 = vadd.f32 %v3401_v22, %v3312_v30  ;;  %3800 = vmatmul.bf16.gmra.mxu3 %v10057_v54  ;;  %v8243_v54 = vld [vmem:[%s12077_s6 + $0xf8] sm:$0xff] }
 0x324   : > { %v3500_v25 = vpop.f32.mrf.mxu1  ;;  %v3862_v42 = vpop.f32.mrf.mxu0  ;;  %5084 = vmatpush.bf16.msra.mxu1 %v8243_v54 }
 0x325   : > { %12547 = vst [vmem:[#allocation24_spill] sm:$0xff] %v10358_v43 }
 0x32c   : > { %v10361_v27 = vpop.f32.mrf.mxu1  ;;  %v3865_v10 = vpop.f32.mrf.mxu0 }
 0x32f   : > { %3542 = vmatmul.bf16.gmra.mxu1 %v10114_v29  ;;  %7353 = vmatmul.msk.bf16.gmra.mxu0 %vm2991_vm13, %v10098_v59 }
 0x333   : > { %3805 = vmatmul.bf16.gmra.mxu3 %v10090_v11 }
 0x334   : > { %v10376_v22 = vpop.f32.mrf.mxu1  ;;  %v3867_v59 = vpop.f32.mrf.mxu0 }
 0x336   : > { %v3315_v8 = vpop.f32.mrf.mxu3 }
 0x337   : > { %v10378_v30 = vadd.f32 %v3404_v46, %v3315_v8  ;;  %v3494_v46 = vadd.f32 %v3493_v60, %v10093_v40  ;;  %v8258_v40 = vld [vmem:[%s12077_s6 + $0x170] sm:$0xff] }
 0x338   : > { %v8242_v60 = vld [vmem:[%s12077_s6 + $0xf0] sm:$0xff]  ;;  %5143 = vmatpush.bf16.msra.mxu3 %v8258_v40 }
 0x339   : > { %12548 = vst [vmem:[#allocation35_spill] sm:$0xff] %v10378_v30  ;;  %v8494_v30 = vmov 1966171168   ;;  %5085 = vmatpush.bf16.msra.mxu1 %v8242_v60 }
 0x33c   : > { %v10380_v43 = vpop.f32.mrf.mxu0  ;;  %v10382_v57 = vpop.f32.mrf.mxu1 }
 0x33e   : > { %v3317_v44 = vpop.f32.mrf.mxu3 }
 0x33f   : > { %v10384_v58 = vadd.f32 %v3406_v55, %v3317_v44  ;;  %3547 = vmatmul.bf16.gmra.mxu1 %v10142_v31  ;;  %7354 = vmatmul.msk.bf16.gmra.mxu0 %vm2991_vm13, %v10128_v53  ;;  %v3973_v44 = vunpack.c.l.s4 %v8494_v30 }
 0x341   : > { %12549 = vst [vmem:[#allocation20_spill] sm:$0xff] %v10384_v58  ;;  %v8250_v58 = vld [vmem:[%s12077_s6 + $0x130] sm:$0xff]  ;;  %v10412_v30 = vunpack.c.0.s8 %v3973_v44 }
 0x342   : > { %5114 = vmatpush.bf16.msra.mxu2 %v8250_v58 }
 0x343   : > { %3810 = vmatmul.bf16.gmra.mxu3 %v10114_v29  ;;  %v3583_v29 = vadd.f32 %v10205_v20, %v3494_v46 }
 0x344   : > { %v10390_v11 = vpop.f32.mrf.mxu0  ;;  %v10392_v41 = vpop.f32.mrf.mxu1 }
 0x346   : > { %v3771_v2 = vpop.f32.mrf.mxu3 }
 0x347   : > { %v3861_v8 = vadd.f32 %v3860_v23, %v3771_v2  ;;  %v3496_v2 = vadd.f32 %v3495_v13, %v10105_v6 }
 0x349   : > { %v3940_v23 = vadd.f32 %v3861_v8, %v3583_v29 }
 0x34b   : > { %v3975_v46 = vperm.slane %v3940_v23, %v10412_v30 }
 0x34c   : > { %v10395_v54 = vpop.f32.mrf.mxu0  ;;  %v10401_v53 = vpop.f32.mrf.mxu1 }
 0x34d   : > { %v4116_v58 = vrot.slane %v3975_v46, 4 }
 0x34e   : > { %v3773_v55 = vpop.f32.mrf.mxu3 }
 0x34f   : > { %3552 = vmatmul.bf16.gmra.mxu1 %v10167_v49  ;;  %7355 = vmatmul.msk.bf16.gmra.mxu0 %vm2991_vm13, %v10152_v52  ;;  %v3499_v52 = vadd.f32 %v3498_v12, %v10122_v24  ;;  %v3863_v44 = vadd.f32 %v3862_v42, %v3773_v55  ;;  %v3585_v24 = vadd.f32 %v10224_v28, %v3496_v2 }
 0x350   : > { %v4148_v16 = vmax.f32 %v3975_v46, %v4116_v58 }
 0x351   : > { %v3588_v8 = vadd.f32 %v10241_v45, %v3499_v52  ;;  %v3941_v36 = vadd.f32 %v3863_v44, %v3585_v24 }
 0x353   : > { %3815 = vmatmul.bf16.gmra.mxu3 %v10142_v31  ;;  %v3501_v31 = vadd.f32 %v3500_v25, %v10134_v4  ;;  %v10435_v4 = vld [vmem:[%s12075_s4] ss:$0 sm:$0xff]  ;;  %v10440_v25 = vpop.f32.mrf.mxu2 }
 0x354   : > { %v10416_v20 = vpop.f32.mrf.mxu0  ;;  %v10425_v40 = vpop.f32.mrf.mxu1 }
 0x355   : > { %v3590_v23 = vadd.f32 %v10265_v15, %v3501_v31  ;;  %v10445_v15 = vld [vmem:[%s12076_s5] ss:$0 sm:$0xff] }
 0x356   : > { %v3776_v9 = vpop.f32.mrf.mxu3  ;;  %v10464_v31 = vrot.slane %v10445_v15, 4 }
 0x357   : > { %v3866_v29 = vadd.f32 %v3865_v10, %v3776_v9  ;;  %v3979_v9 = vperm.slane %v3941_v36, %v10412_v30 }
 0x359   : > { %v3942_v12 = vadd.f32 %v3866_v29, %v3588_v8  ;;  %v4117_v55 = vrot.slane %v3979_v9, 4 }
 0x35b   : > { %v3983_v6 = vperm.slane %v3942_v12, %v10412_v30  ;;  %v4149_v44 = vmax.f32 %v3979_v9, %v4117_v55  ;;  %v10459_v12 = vrot.slane %v10435_v4, 4  ;;  %v10466_v58 = vpop.f32.mrf.mxu2 }
 0x35c   : > { %v10428_v13 = vpop.f32.mrf.mxu0  ;;  %v10455_v46 = vpop.f32.mrf.mxu1 }
 0x35d   : > { %v4180_v60 = vrot.slane %v3983_v6, 4 }
 0x35e   : > { %v3778_v45 = vpop.f32.mrf.mxu3 }
 0x35f   : > { %v4212_v42 = vmax.f32 %v3983_v6, %v4180_v60  ;;  %v3868_v28 = vadd.f32 %v3867_v59, %v3778_v45  ;;  %3557 = vmatmul.bf16.gmra.mxu1 %v10197_v19  ;;  %7356 = vmatmul.msk.bf16.gmra.mxu0 %vm2991_vm13, %v10184_v56  ;;  %v3504_v60 = vadd.f32 %v10361_v27, %v10147_v37  ;;  %v8249_v37 = vld [vmem:[%s12077_s6 + $0x128] sm:$0xff] }
 0x360   : > { %v8241_v27 = vld [vmem:[%s12077_s6 + $0xe8] sm:$0xff]  ;;  %5115 = vmatpush.bf16.msra.mxu2 %v8249_v37 }
 0x361   : > { %v4228_v10 = vmax.f32 %v4148_v16, %v4212_v42  ;;  %v3943_v36 = vadd.f32 %v3868_v28, %v3590_v23  ;;  %5086 = vmatpush.bf16.msra.mxu1 %v8241_v27 }
 0x363   : > { %v4250_v52 = vmul.f32 %v10435_v4, %v4228_v10  ;;  %v3987_v2 = vperm.slane %v3943_v36, %v10412_v30  ;;  %3820 = vmatmul.bf16.gmra.mxu3 %v10167_v49  ;;  %v3593_v36 = vadd.f32 %v10274_v51, %v3504_v60  ;;  %v10498_v51 = vpop.f32.mrf.mxu2 }
 0x364   : > { %v10450_v59 = vpop.f32.mrf.mxu0  ;;  %v10478_v10 = vpop.f32.mrf.mxu1 }
 0x365   : > { %v10453_v56 = vadd.f32 %v10445_v15, %v4250_v52  ;;  %v4181_v16 = vrot.slane %v3987_v2, 4  ;;  %v3506_v52 = vadd.f32 %v10376_v22, %v10158_v26 }
 0x366   : > { %v3781_v8 = vpop.f32.mrf.mxu3 }
 0x367   : > { %v12199_v29 = vmax.f32 %v10453_v56, 0.0  ;;  %v4213_v24 = vmax.f32 %v3987_v2, %v4181_v16  ;;  %v3871_v45 = vadd.f32 %v10380_v43, %v3781_v8  ;;  %v8257_v43 = vld [vmem:[%s12077_s6 + $0x168] sm:$0xff] }
 0x368   : > { %5144 = vmatpush.bf16.msra.mxu3 %v8257_v43 }
 0x369   : > { %4320 = vst [vmem:[#allocation1] ss:$2 sm:$0xff] %v12199_v29  ;;  %v4229_v49 = vmax.f32 %v4149_v44, %v4213_v24  ;;  %v3944_v55 = vadd.f32 %v3871_v45, %v3593_v36 }
 0x36b   : > { %v4251_v6 = vmul.f32 %v10459_v12, %v4229_v49  ;;  %v3991_v2 = vperm.slane %v3944_v55, %v10412_v30 }
 0x36c   : > { %v10475_v9 = vpop.f32.mrf.mxu0 }
 0x36d   : > { %v10472_v23 = vadd.f32 %v10464_v31, %v4251_v6  ;;  %v3511_v6 = vadd.f32 %v10392_v41, %v10191_v32  ;;  %v4118_v26 = vrot.slane %v3991_v2, 4 }
 0x36e   : > { %v3783_v42 = vpop.f32.mrf.mxu3 }
 0x36f   : > { %v12198_v28 = vmax.f32 %v10472_v23, 0.0  ;;  %3562 = vmatmul.bf16.gmra.mxu1 %v10230_v7  ;;  %7357 = vmatmul.msk.bf16.gmra.mxu0 %vm2991_vm13, %v10212_v3  ;;  %v3509_v3 = vadd.f32 %v10382_v57, %v10176_v14  ;;  %v3873_v44 = vadd.f32 %v10390_v11, %v3783_v42  ;;  %v10509_v57 = vpop.f32.mrf.mxu1  ;;  %v4150_v11 = vmax.f32 %v3991_v2, %v4118_v26 }
 0x371   : > { %4322 = vst [vmem:[#allocation1 + $0x1] ss:$2 sm:$0xff] %v12198_v28  ;;  %v3598_v8 = vadd.f32 %v10299_v47, %v3509_v3  ;;  %v3600_v47 = vadd.f32 %v10306_v5, %v3511_v6 }
 0x373   : > { %3825 = vmatmul.bf16.gmra.mxu3 %v10197_v19  ;;  %v3595_v19 = vadd.f32 %v10282_v63, %v3506_v52 }
 0x374   : > { %v10506_v14 = vpop.f32.mrf.mxu0 }
 0x375   : > { %v3945_v22 = vadd.f32 %v3873_v44, %v3595_v19 }
 0x376   : > { %v3786_v16 = vpop.f32.mrf.mxu3 }
 0x377   : > { %v3876_v24 = vadd.f32 %v10395_v54, %v3786_v16  ;;  %v10515_v54 = vpop.f32.mrf.mxu2  ;;  %v3995_v36 = vperm.slane %v3945_v22, %v10412_v30  ;;  %v10524_v5 = vpop.f32.mrf.mxu1 }
 0x379   : > { %v3946_v49 = vadd.f32 %v3876_v24, %v3598_v8  ;;  %v4119_v27 = vrot.slane %v3995_v36, 4 }
 0x37b   : > { %v3999_v60 = vperm.slane %v3946_v49, %v10412_v30  ;;  %v4151_v16 = vmax.f32 %v3995_v36, %v4119_v27  ;;  %v8256_v36 = vld [vmem:[%s12077_s6 + $0x160] sm:$0xff]  ;;  %v3516_v27 = vadd.f32 %v10425_v40, %v10219_v38 }
 0x37c   : > { %v10522_v43 = vpop.f32.mrf.mxu0  ;;  %5145 = vmatpush.bf16.msra.mxu3 %v8256_v36 }
 0x37d   : > { %v4182_v45 = vrot.slane %v3999_v60, 4  ;;  %v3605_v38 = vadd.f32 %v10440_v25, %v3516_v27 }
 0x37e   : > { %v3788_v42 = vpop.f32.mrf.mxu3 }
 0x37f   : > { %v4214_v63 = vmax.f32 %v3999_v60, %v4182_v45  ;;  %v3878_v37 = vadd.f32 %v10416_v20, %v3788_v42  ;;  %3567 = vmatmul.bf16.gmra.mxu1 %v10262_v33  ;;  %7358 = vmatmul.msk.bf16.gmra.mxu0 %vm2991_vm13, %v10247_v0  ;;  %v10533_v44 = vpop.f32.mrf.mxu2  ;;  %v10542_v6 = vpop.f32.mrf.mxu1  ;;  %v8248_v60 = vld [vmem:[%s12077_s6 + $0x120] sm:$0xff] }
 0x380   : > { %5116 = vmatpush.bf16.msra.mxu2 %v8248_v60  ;;  %v12551_v42 = vld [vmem:[#allocation7_spill] sm:$0xff] }
 0x381   : > { %v4230_v32 = vmax.f32 %v4150_v11, %v4214_v63  ;;  %v3947_v41 = vadd.f32 %v3878_v37, %v3600_v47  ;;  %v12550_v11 = vld [vmem:[#allocation34_spill] sm:$0xff]  ;;  %v8240_v63 = vld [vmem:[%s12077_s6 + $0xe0] sm:$0xff] }
 0x382   : > { %5087 = vmatpush.bf16.msra.mxu1 %v8240_v63  ;;  %v8238_v63 = vld [vmem:[%s12077_s6 + $0xd0] sm:$0xff] }
 0x383   : > { %v4252_v55 = vmul.f32 %v10435_v4, %v4230_v32  ;;  %v4003_v3 = vperm.slane %v3947_v41, %v10412_v30  ;;  %3830 = vmatmul.bf16.gmra.mxu3 %v10230_v7  ;;  %v3514_v7 = vadd.f32 %v10401_v53, %v10207_v21  ;;  %v4486_v21 = vand.u32 7, %v12551_v42 }
 0x384   : > { %v10538_v49 = vpop.f32.mrf.mxu0 }
 0x385   : > { %v10530_v20 = vadd.f32 %v10445_v15, %v4252_v55  ;;  %v4183_v52 = vrot.slane %v4003_v3, 4  ;;  %v3603_v53 = vadd.f32 %v10420_v17, %v3514_v7  ;;  %v3519_v17 = vadd.f32 %v10455_v46, %v10235_v1  ;;  %v12554_v55 = vld [vmem:[#allocation14_spill] sm:$0xff] }
 0x386   : > { %v3791_v2 = vpop.f32.mrf.mxu3  ;;  %vm10574_vm0 = vcmp.ne.s32.totalorder %v4486_v21, 0  ;;  %v12557_v7 = vmov 0  }
 0x387   : > { %v12197_v0 = vmax.f32 %v10530_v20, 0.0  ;;  %v4215_v8 = vmax.f32 %v4003_v3, %v4183_v52  ;;  %v3881_v47 = vadd.f32 %v10428_v13, %v3791_v2  ;;  %v8247_v13 = vld [vmem:[%s12077_s6 + $0x118] sm:$0xff]  ;;  %v10567_v37 = vpop.f32.mrf.mxu2  ;;  %v4479_v3 = vand.u32 7, %v12554_v55  ;;  %v10587_v2 = vpop.f32.mrf.mxu1 }
 0x388   : > { %5117 = vmatpush.bf16.msra.mxu2 %v8247_v13  ;;  %v3608_v46 = vadd.f32 %v10466_v58, %v3519_v17  ;;  %v8244_v13 = vld [vmem:[%s12077_s6 + $0x100] sm:$0xff] }
 0x389   : > { %4324 = vst [vmem:[#allocation1 + $0x10] ss:$2 sm:$0xff] %v12197_v0  ;;  %v4231_v24 = vmax.f32 %v4151_v16, %v4215_v8  ;;  %v3948_v32 = vadd.f32 %v3881_v47, %v3603_v53  ;;  %vm10598_vm9 = vcmp.ne.s32.totalorder %v4479_v3, 0 }
 0x38a   : > { %vm4613_vm1 = vmpackc.low %vm10598_vm9, %vm10598_vm9 }
 0x38b   : > { %v4253_v19 = vmul.f32 %v10459_v12, %v4231_v24  ;;  %v4007_v16 = vperm.slane %v3948_v32, %v10412_v30 }
 0x38c   : > { %v10581_v52 = vpop.f32.mrf.mxu0 }
 0x38d   : > { %v10545_v26 = vadd.f32 %v10464_v31, %v4253_v19  ;;  %v3521_v19 = vadd.f32 %v10478_v10, %v10256_v34 }
 0x38e   : > { %v3793_v22 = vpop.f32.mrf.mxu3 }
 0x38f   : > { %v12196_v45 = vmax.f32 %v10545_v26, 0.0  ;;  %7359 = vmatmul.msk.bf16.gmra.mxu0 %vm2991_vm13, %v12550_v11  ;;  %v3883_v8 = vadd.f32 %v10450_v59, %v3793_v22  ;;  %vm4614_vm13 = vmpackc.low %vm10574_vm0, %vm10574_vm0  ;;  %v8239_v59 = vld [vmem:[%s12077_s6 + $0xd8] sm:$0xff]  ;;  %v4120_v22 = vrot.slane %v4007_v16, 4  ;;  %v10615_v34 = vpop.f32.mrf.mxu2  ;;  %v3610_v53 = vadd.f32 %v10498_v51, %v3521_v19 }
 0x390   : > { %v4624_v25 = vsel %vm4614_vm13, 65537, %v12557_v7  ;;  %5088 = vmatpush.bf16.msra.mxu1 %v8239_v59  ;;  %v4623_v51 = vsel %vm4613_vm1, 65537, %v12557_v7  ;;  %v4335_v59 = vld.sshfl [vmem:[#allocation1] sm:$0xff pattern:$0x75316420]  ;;  %vm4689_vm13 = vcmp.ne.s32.totalorder %v4486_v21, 7 }
 0x391   : > { %4326 = vst [vmem:[#allocation1 + $0x11] ss:$2 sm:$0xff] %v12196_v45  ;;  %v3949_v60 = vadd.f32 %v3883_v8, %v3605_v38  ;;  %v4634_v11 = vunpack.c.l.b16 %v4624_v25  ;;  %v4152_v17 = vmax.f32 %v4007_v16, %v4120_v22  ;;  %v8237_v16 = vld [vmem:[%s12077_s6 + $0xc8] sm:$0xff]  ;;  %vm12573_vm0 = vsmask.f32 256  ;;  %vm4719_vm9 = vmpackc.low %vm4689_vm13, %vm4689_vm13  ;;  %v12575_v21 = vld [vmem:[#allocation6_spill] sm:$0xff] }
 0x392   : > { %v12558_v22 = vld [vmem:[#allocation9_spill] sm:$0xff]  ;;  %vm10816_vm1 = vcmp.ne.s32.totalorder %v4479_v3, 7 }
 0x393   : > { %3835 = vmatmul.bf16.gmra.mxu3 %v10262_v33  ;;  %v8246_v33 = vld [vmem:[%s12077_s6 + $0x110] sm:$0xff]  ;;  %v4011_v32 = vperm.slane %v3949_v60, %v10412_v30  ;;  %v7363_v38 = vunpack.i.l.s16 %v4634_v11 }
 0x394   : > { %5118 = vmatpush.bf16.msra.mxu2 %v8246_v33  ;;  %5089 = vmatpush.bf16.msra.mxu1 %v8238_v63  ;;  %v10629_v33 = vpop.f32.mrf.mxu1  ;;  %v4359_v63 = vpack.c.bf16 %v4335_v59, %v4335_v59 }
 0x396   : > { %v3796_v1 = vpop.f32.mrf.mxu3 }
 0x397   : > { %v3886_v24 = vadd.f32 %v10475_v9, %v3796_v1  ;;  %v8245_v9 = vld [vmem:[%s12077_s6 + $0x108] sm:$0xff]  ;;  %v10626_v1 = vpop.f32.mrf.mxu0  ;;  %v10645_v11 = vpop.f32.mrf.mxu2 }
 0x398   : > { %5119 = vmatpush.bf16.msra.mxu2 %v8245_v9  ;;  %5090 = vmatpush.bf16.msra.mxu1 %v8237_v16  ;;  %v3524_v16 = vadd.f32 %v10509_v57, %v10267_v35 }
 0x399   : > { %v3950_v40 = vadd.f32 %v3886_v24, %v3608_v46  ;;  %v4633_v24 = vunpack.c.l.b16 %v4623_v51 }
 0x39a   : > { %v3613_v57 = vadd.f32 %v10515_v54, %v3524_v16  ;;  %v3529_v54 = vadd.f32 %v10542_v6, %v10280_v18 }
 0x39b   : > { %v4015_v47 = vperm.slane %v3950_v40, %v10412_v30  ;;  %v4121_v40 = vrot.slane %v4011_v32, 4  ;;  %v7362_v19 = vunpack.i.l.s16 %v4633_v24  ;;  %v12563_v24 = vld [vmem:[#allocation5_spill] sm:$0xff] }
 0x39c   : > { %5120 = vmatpush.bf16.msra.mxu2 %v8244_v13  ;;  %v8339_v13 = vld [vmem:[%s12079_s8 + $0x1b8] sm:$0xff] }
 0x39d   : > { %v4184_v10 = vrot.slane %v4015_v47, 4  ;;  %vm4657_vm11 = vcmp.ne.s32.totalorder %v7362_v19, %v12558_v22 }
 0x39e   : > { %v3798_v36 = vpop.f32.mrf.mxu3 }
 0x39f   : > { %v4216_v41 = vmax.f32 %v4015_v47, %v4184_v10  ;;  %v3888_v27 = vadd.f32 %v10506_v14, %v3798_v36  ;;  %v8236_v47 = vld [vmem:[%s12077_s6 + $0xc0] sm:$0xff]  ;;  %v12559_v10 = vld [vmem:[#allocation10_spill] sm:$0xff]  ;;  %v10655_v51 = vpop.f32.mrf.mxu0 }
 0x3a0   : > { %vm4658_vm8 = vcmp.ne.s32.totalorder %v7363_v38, %v12559_v10  ;;  %5091 = vmatpush.bf16.msra.mxu1 %v8236_v47  ;;  %v4465_v38 = vand.u32 7, %v12563_v24  ;;  %v10686_v47 = vpop.f32.mrf.mxu2 }
 0x3a1   : > { %v4232_v46 = vmax.f32 %v4152_v17, %v4216_v41  ;;  %v3951_v8 = vadd.f32 %v3888_v27, %v3610_v53  ;;  %v4153_v53 = vmax.f32 %v4011_v32, %v4121_v40  ;;  %vm10648_vm10 = vmpackc.low %vm4658_vm8, %vm4657_vm11  ;;  %v12562_v41 = vld [vmem:[#allocation11_spill] sm:$0xff] }
 0x3a2   : > { %v4472_v27 = vand.u32 7, %v12562_v41  ;;  %vm10678_vm4 = vcmp.ne.s32.totalorder %v4465_v38, 0  ;;  %vm4718_vm11 = vmpackc.low %vm10816_vm1, %vm10816_vm1  ;;  %vm4686_vm1 = vcmp.ne.s32.totalorder %v4465_v38, 7 }
 0x3a3   : > { %v4254_v58 = vmul.f32 %v10435_v4, %v4232_v46  ;;  %v4019_v14 = vperm.slane %v3951_v8, %v10412_v30  ;;  %3840 = vmatmul.bf16.gmra.mxu3 %v10294_v39  ;;  %v10657_v46 = vpop.f32.mrf.mxu1  ;;  %v4375_v8 = vunpack.c.l.b16 %v4359_v63  ;;  %vm4611_vm2 = vmpackc.low %vm10678_vm4, %vm10678_vm4  ;;  %v4336_v63 = vld.sshfl [vmem:[#allocation1 + $0x10] sm:$0xff pattern:$0x75316420] }
 0x3a4   : > { %vm10668_vm12 = vcmp.ne.s32.totalorder %v4472_v27, 0 }
 0x3a5   : > { %v10638_v9 = vadd.f32 %v10445_v15, %v4254_v58  ;;  %v4185_v25 = vrot.slane %v4019_v14, 4  ;;  %vm4612_vm14 = vmpackc.low %vm10668_vm12, %vm10668_vm12  ;;  %v4621_v58 = vsel %vm4611_vm2, 65537, %v12557_v7 }
 0x3a6   : > { %v3801_v60 = vpop.f32.mrf.mxu3 }
 0x3a7   : > { %v12195_v39 = vmax.f32 %v10638_v9, 0.0  ;;  %v4217_v36 = vmax.f32 %v4019_v14, %v4185_v25  ;;  %v3891_v14 = vadd.f32 %v10522_v43, %v3801_v60  ;;  %v10674_v25 = vpack.c.b16 %v4375_v8, %v4375_v8  ;;  %v8255_v43 = vld [vmem:[%s12077_s6 + $0x158] sm:$0xff] }
 0x3a8   : > { %5146 = vmatpush.bf16.msra.mxu3 %v8255_v43  ;;  %v4360_v43 = vpack.c.bf16 %v4336_v63, %v4336_v63 }
 0x3a9   : > { %4328 = vst [vmem:[#allocation1 + $0x20] ss:$2 sm:$0xff] %v12195_v39  ;;  %v4233_v17 = vmax.f32 %v4153_v53, %v4217_v36  ;;  %v3952_v60 = vadd.f32 %v3891_v14, %v3613_v57  ;;  %v10701_v53 = vsel %vm4391_vm5, 0, %v10674_v25  ;;  %v10703_v36 = vpop.f32.mrf.mxu0  ;;  %v3618_v14 = vadd.f32 %v10567_v37, %v3529_v54  ;;  %v10721_v37 = vpop.f32.mrf.mxu2 }
 0x3aa   : > { %v12209_v6 = vshrl.u32 %v10701_v53, 16  ;;  %v4631_v39 = vunpack.c.l.b16 %v4621_v58  ;;  %v4401_v63 = vshll.u32 %v10701_v53, 16 }
 0x3ab   : > { %v4255_v32 = vmul.f32 %v10459_v12, %v4233_v17  ;;  %v4622_v17 = vsel %vm4612_vm14, 65537, %v12557_v7  ;;  %v10708_v16 = vpop.f32.mrf.mxu1  ;;  %v4023_v18 = vperm.slane %v3952_v60, %v10412_v30  ;;  %v3531_v60 = vadd.f32 %v10587_v2, %v10296_v48 }
 0x3ac   : > { %v4632_v45 = vunpack.c.l.b16 %v4622_v17  ;;  %v4400_v29 = vrot.slane %v12209_v6, 7  ;;  %v7360_v17 = vunpack.i.l.s16 %v4631_v39  ;;  %v12589_v6 = vmax.f32 %v10453_v56, 0.0 }
 0x3ad   : > { %v10664_v40 = vadd.f32 %v10464_v31, %v4255_v32  ;;  %v12568_v32 = vld [vmem:[#allocation16_spill] sm:$0xff]  ;;  %v4122_v28 = vrot.slane %v4023_v18, 4  ;;  %v3620_v48 = vadd.f32 %v10615_v34, %v3531_v60 }
 0x3ae   : > { %v3803_v19 = vpop.f32.mrf.mxu3  ;;  %v3526_v8 = vadd.f32 %v10524_v5, %v12568_v32  ;;  %vm4650_vm3 = vcmp.ne.s32.totalorder %v7360_v17, %v12558_v22  ;;  %v8298_v17 = vld [vmem:[%s12079_s8 + $0x70] sm:$0xff] }
 0x3af   : > { %v12194_v59 = vmax.f32 %v10664_v40, 0.0  ;;  %v3893_v35 = vadd.f32 %v10538_v49, %v3803_v19  ;;  %v4376_v19 = vunpack.c.l.b16 %v4360_v43  ;;  %v4154_v2 = vmax.f32 %v4023_v18, %v4122_v28 }
 0x3b0   : > { %v3615_v5 = vadd.f32 %v10533_v44, %v3526_v8  ;;  %v7361_v44 = vunpack.i.l.s16 %v4632_v45 }
 0x3b1   : > { %4330 = vst [vmem:[#allocation1 + $0x21] ss:$2 sm:$0xff] %v12194_v59  ;;  %v10728_v58 = vpop.f32.mrf.mxu0 }
 0x3b2   : > { %v3953_v49 = vadd.f32 %v3893_v35, %v3615_v5  ;;  %v4403_v35 = vor.u32 %v4401_v63, %v4400_v29  ;;  %vm4651_vm15 = vcmp.ne.s32.totalorder %v7361_v44, %v12559_v10 }
 0x3b3   : > { %3845 = vmatmul.bf16.gmra.mxu3 %v10250_v50  ;;  %vm10753_vm6 = vmpackc.low %vm4651_vm15, %vm4650_vm3 }
 0x3b6   : > { %v3806_v50 = vpop.f32.mrf.mxu3 }
 0x3b7   : > { %v3896_v57 = vadd.f32 %v10581_v52, %v3806_v50 }
 0x3b8   : > { %v4337_v59 = vld.sshfl [vmem:[#allocation1 + $0x20] sm:$0xff pattern:$0x75316420] }
 0x3b9   : > { %v3954_v32 = vadd.f32 %v3896_v57, %v3618_v14  ;;  %v4361_v0 = vpack.c.bf16 %v4337_v59, %v4337_v59  ;;  %v4904_v14 = vrot.slane %v10701_v53, 4  ;;  %v10733_v57 = vpop.f32.mrf.mxu1 }
 0x3bb   : > { %v4031_v52 = vperm.slane %v3954_v32, %v10412_v30  ;;  %v4377_v54 = vunpack.c.l.b16 %v4361_v0  ;;  %v4027_v0 = vperm.slane %v3953_v49, %v10412_v30 }
 0x3bd   : > { %v4186_v8 = vrot.slane %v4031_v52, 4  ;;  %v10725_v59 = vpack.c.b16 %v4377_v54, %v4376_v19  ;;  %v4123_v60 = vrot.slane %v4027_v0, 4  ;;  %v12569_v19 = vld [vmem:[#allocation19_spill] sm:$0xff] }
 0x3be   : > { %v3808_v50 = vpop.f32.mrf.mxu3  ;;  %vm12570_vm7 = vnez %v12569_v19 }
 0x3bf   : > { %v4218_v39 = vmax.f32 %v4031_v52, %v4186_v8  ;;  %v3898_v45 = vadd.f32 %v10626_v1, %v3808_v50  ;;  %v12208_v43 = vrot.slane %v10725_v59, 4  ;;  %v12200_v34 = vshrl.u32 %v10725_v59, 16  ;;  %v3629_v8 = vpop.f32.mrf.mxu2 }
 0x3c0   : > { %v4408_v1 = vshll.u32 %v10725_v59, 16  ;;  %v4440_v54 = vsel %vm12570_vm7, 0, %v4403_v35  ;;  %v4155_v35 = vmax.f32 %v4027_v0, %v4123_v60 }
 0x3c1   : > { %v4234_v28 = vmax.f32 %v4154_v2, %v4218_v39  ;;  %v3955_v18 = vadd.f32 %v3898_v45, %v3620_v48  ;;  %v4906_v5 = vsel %vm4391_vm5, %v4904_v14, %v12208_v43  ;;  %v10746_v32 = vrot.slane %v12200_v34, 7  ;;  %v10773_v34 = vpop.f32.mrf.mxu1 }
 0x3c2   : > { %5121 = vmatmul.bf16.vlgmr.msra.gmra.mxu2 %v4906_v5  ;;  %v10766_v39 = vsel %vm10753_vm6, %v4440_v54, 0 }
 0x3c3   : > { %v4256_v49 = vmul.f32 %v10435_v4, %v4234_v28  ;;  %v4035_v52 = vperm.slane %v3955_v18, %v10412_v30  ;;  %v4410_v44 = vor.u32 %v4408_v1, %v10746_v32  ;;  %v3907_v18 = vpop.f32.mrf.mxu0 }
 0x3c5   : > { %v10761_v48 = vadd.f32 %v10445_v15, %v4256_v49  ;;  %v4187_v2 = vrot.slane %v4035_v52, 4  ;;  %v4411_v14 = vsel %vm12573_vm0, %v4400_v29, %v4410_v44  ;;  %v4901_v29 = vrot.slane %v10766_v39, 4 }
 0x3c6   : > { %v3811_v50 = vpop.f32.mrf.mxu3  ;;  %v10771_v5 = vsel %vm10648_vm10, %v4411_v14, 0 }
 0x3c7   : > { %v12201_v45 = vmax.f32 %v10761_v48, 0.0  ;;  %v4219_v28 = vmax.f32 %v4035_v52, %v4187_v2  ;;  %v12204_v54 = vrot.slane %v10771_v5, 4  ;;  %v12574_v52 = vld [vmem:[#allocation26_spill] sm:$0xff]  ;;  %v3901_v14 = vadd.f32 %v10655_v51, %v3811_v50 }
 0x3c8   : > { %v3534_v44 = vadd.f32 %v10629_v33, %v12574_v52  ;;  %v8254_v33 = vld [vmem:[%s12077_s6 + $0x150] sm:$0xff]  ;;  %v3539_v51 = vadd.f32 %v10708_v16, %v10313_v61  ;;  %v4729_v61 = vsel %vm4719_vm9, 65537, %v12557_v7 }
 0x3c9   : > { %4332 = vst [vmem:[#allocation1 + $0x30] ss:$2 sm:$0xff] %v12201_v45  ;;  %v4235_v49 = vmax.f32 %v4155_v35, %v4219_v28  ;;  %v4903_v60 = vsel %vm4391_vm5, %v4901_v29, %v12204_v54  ;;  %v10789_v28 = vpop.f32.mrf.mxu2  ;;  %v10804_v50 = vpop.f32.mrf.mxu1  ;;  %5147 = vmatpush.bf16.msra.mxu3 %v8254_v33 }
 0x3ca   : > { %5092 = vmatmul.bf16.vlgmr.msra.gmra.mxu1 %v4903_v60 }
 0x3cb   : > { %v4257_v0 = vmul.f32 %v10459_v12, %v4235_v49  ;;  %v3623_v49 = vadd.f32 %v10645_v11, %v3534_v44  ;;  %v10798_v29 = vpop.f32.mrf.mxu0  ;;  %v3536_v11 = vadd.f32 %v10657_v46, %v10310_v62  ;;  %v3628_v44 = vadd.f32 %v10721_v37, %v3539_v51  ;;  %v12578_v37 = vld [vmem:[#allocation17_spill] sm:$0xff] }
 0x3cc   : > { %v4739_v51 = vunpack.c.l.b16 %v4729_v61 }
 0x3cd   : > { %v10786_v2 = vadd.f32 %v10464_v31, %v4257_v0  ;;  %v3956_v0 = vadd.f32 %v3901_v14, %v3623_v49  ;;  %v12203_v49 = vand.u32 7, %v12575_v21  ;;  %v3625_v46 = vadd.f32 %v10686_v47, %v3536_v11 }
 0x3ce   : > { %v3813_v35 = vpop.f32.mrf.mxu3 }
 0x3cf   : > { %v12202_v45 = vmax.f32 %v10786_v2, 0.0  ;;  %v4039_v60 = vperm.slane %v3956_v0, %v10412_v30  ;;  %v3903_v14 = vadd.f32 %v10703_v36, %v3813_v35  ;;  %v3541_v36 = vadd.f32 %v10733_v57, %v12578_v37 }
 0x3d0   : > { %vm10834_vm8 = vcmp.ne.s32.totalorder %v12203_v49, 0 }
 0x3d1   : > { %4334 = vst [vmem:[#allocation1 + $0x31] ss:$2 sm:$0xff] %v12202_v45  ;;  %v10820_v62 = vpop.f32.mrf.mxu2  ;;  %v4124_v35 = vrot.slane %v4039_v60, 4  ;;  %v10838_v47 = vpop.f32.mrf.mxu1  ;;  %v3630_v11 = vadd.f32 %v3629_v8, %v3541_v36  ;;  %vm4616_vm4 = vmpackc.low %vm10834_vm8, %vm10834_vm8  ;;  %v8253_v8 = vld [vmem:[%s12077_s6 + $0x148] sm:$0xff] }
 0x3d2   : > { %5148 = vmatpush.bf16.msra.mxu3 %v8253_v8  ;;  %vm4716_vm8 = vmpackc.low %vm4686_vm1, %vm4686_vm1 }
 0x3d3   : > { %v10830_v55 = vpop.f32.mrf.mxu0  ;;  %v4726_v41 = vsel %vm4716_vm8, 65537, %v12557_v7 }
 0x3d6   : > { %v3816_v52 = vpop.f32.mrf.mxu3 }
 0x3d7   : > { %v3906_v42 = vadd.f32 %v10728_v58, %v3816_v52  ;;  %v3957_v58 = vadd.f32 %v3903_v14, %v3625_v46  ;;  %v12579_v52 = vld [vmem:[#allocation13_spill] sm:$0xff]  ;;  %v4728_v46 = vsel %vm4718_vm11, 65537, %v12557_v7  ;;  %vm4687_vm11 = vcmp.ne.s32.totalorder %v4472_v27, 7 }
 0x3d8   : > { %v12205_v45 = vand.u32 7, %v12579_v52  ;;  %v4738_v37 = vunpack.c.l.b16 %v4728_v46 }
 0x3d9   : > { %v3958_v33 = vadd.f32 %v3906_v42, %v3628_v44  ;;  %v4156_v44 = vmax.f32 %v4039_v60, %v4124_v35  ;;  %v4043_v42 = vperm.slane %v3957_v58, %v10412_v30  ;;  %v3637_v58 = vpop.f32.mrf.mxu2 }
 0x3da   : > { %vm4585_vm12 = vcmp.ne.s32.totalorder %v12205_v45, 0  ;;  %v7372_v60 = vunpack.i.l.s16 %v4738_v37  ;;  %v3550_v37 = vpop.f32.mrf.mxu1 }
 0x3db   : > { %v4047_v0 = vperm.slane %v3958_v33, %v10412_v30  ;;  %v7373_v33 = vunpack.i.l.s16 %v4739_v51  ;;  %vm4615_vm14 = vmpackc.low %vm4585_vm12, %vm4585_vm12 }
 0x3dc   : > { %v4625_v36 = vsel %vm4615_vm14, 65537, %v12557_v7  ;;  %vm4762_vm2 = vcmp.ne.s32.totalorder %v7372_v60, %v12558_v22  ;;  %vm4717_vm12 = vmpackc.low %vm4687_vm11, %vm4687_vm11 }
 0x3dd   : > { %v4188_v57 = vrot.slane %v4047_v0, 4  ;;  %vm4763_vm3 = vcmp.ne.s32.totalorder %v7373_v33, %v12559_v10  ;;  %v4727_v27 = vsel %vm4717_vm12, 65537, %v12557_v7 }
 0x3de   : > { %v3818_v14 = vpop.f32.mrf.mxu3  ;;  %vm10862_vm15 = vmpackc.low %vm4763_vm3, %vm4762_vm2  ;;  %vm12593_vm2 = vsmask.f32 7424 }
 0x3df   : > { %v4220_v61 = vmax.f32 %v4047_v0, %v4188_v57  ;;  %v3908_v16 = vadd.f32 %v3907_v18, %v3818_v14  ;;  %v4626_v18 = vsel %vm4616_vm4, 65537, %v12557_v7  ;;  %v4125_v0 = vrot.slane %v4043_v42, 4 }
 0x3e0   : > { %v4636_v35 = vunpack.c.l.b16 %v4626_v18  ;;  %v4635_v57 = vunpack.c.l.b16 %v4625_v36 }
 0x3e1   : > { %v4236_v49 = vmax.f32 %v4156_v44, %v4220_v61  ;;  %v3959_v54 = vadd.f32 %v3908_v16, %v3630_v11  ;;  %v8252_v61 = vld [vmem:[%s12077_s6 + $0x140] sm:$0xff]  ;;  %v4157_v33 = vmax.f32 %v4043_v42, %v4125_v0 }
 0x3e2   : > { %v7365_v11 = vunpack.i.l.s16 %v4636_v35  ;;  %5149 = vmatpush.bf16.msra.mxu3 %v8252_v61  ;;  %v12586_v42 = vld [vmem:[#allocation28_spill] sm:$0xff]  ;;  %v10888_v61 = vpop.f32.mrf.mxu1 }
 0x3e3   : > { %v4258_v51 = vmul.f32 %v10435_v4, %v4236_v49  ;;  %v4051_v3 = vperm.slane %v3959_v54, %v10412_v30  ;;  %v7364_v54 = vunpack.i.l.s16 %v4635_v57  ;;  %v3915_v49 = vpop.f32.mrf.mxu0  ;;  %v3544_v0 = vadd.f32 %v10773_v34, %v12586_v42 }
 0x3e4   : > { %vm4665_vm0 = vcmp.ne.s32.totalorder %v7365_v11, %v12559_v10 }
 0x3e5   : > { %v10857_v44 = vadd.f32 %v10445_v15, %v4258_v51  ;;  %v4189_v14 = vrot.slane %v4051_v3, 4  ;;  %vm4664_vm13 = vcmp.ne.s32.totalorder %v7364_v54, %v12558_v22  ;;  %v3639_v51 = vpop.f32.mrf.mxu2  ;;  %v3633_v24 = vadd.f32 %v10789_v28, %v3544_v0  ;;  %v12587_v54 = vld [vmem:[#allocation29_spill] sm:$0xff] }
 0x3e6   : > { %v3821_v46 = vpop.f32.mrf.mxu3  ;;  %vm10871_vm9 = vmpackc.low %vm4665_vm0, %vm4664_vm13  ;;  %v4737_v28 = vunpack.c.l.b16 %v4727_v27  ;;  %v4441_v27 = vrot.slane %v4401_v63, 1  ;;  %vm12602_vm13 = vsmask.f32 256 }
 0x3e7   : > { %v12207_v8 = vmax.f32 %v10857_v44, 0.0  ;;  %v4221_v18 = vmax.f32 %v4051_v3, %v4189_v14  ;;  %v3911_v57 = vadd.f32 %v10798_v29, %v3821_v46  ;;  %v3549_v29 = vadd.f32 %v10838_v47, %v12587_v54  ;;  %v4338_v46 = vld.sshfl [vmem:[#allocation1 + $0x30] sm:$0xff pattern:$0x75316420]  ;;  %vm12601_vm0 = vmmov %vm12593_vm2 }
 0x3e8   : > { %v4362_v43 = vpack.c.bf16 %v4338_v46, %v4338_v46 }
 0x3e9   : > { %4339 = vst [vmem:[#allocation1] ss:$2 sm:$0xff] %v12207_v8  ;;  %v4237_v60 = vmax.f32 %v4157_v33, %v4221_v18  ;;  %v3960_v34 = vadd.f32 %v3911_v57, %v3633_v24  ;;  %v4736_v33 = vunpack.c.l.b16 %v4726_v41  ;;  %v12588_v18 = vld [vmem:[#allocation22_spill] sm:$0xff]  ;;  %v3638_v45 = vadd.f32 %v3637_v58, %v3549_v29 }
 0x3eb   : > { %v4259_v35 = vmul.f32 %v10459_v12, %v4237_v60  ;;  %v3917_v38 = vpop.f32.mrf.mxu0  ;;  %v3546_v60 = vadd.f32 %v10804_v50, %v12588_v18  ;;  %v7370_v24 = vunpack.i.l.s16 %v4736_v33  ;;  %v7371_v50 = vunpack.i.l.s16 %v4737_v28 }
 0x3ec   : > { %v12592_v33 = vshrl.u32 %v10701_v53, 16 }
 0x3ed   : > { %v10883_v3 = vadd.f32 %v10464_v31, %v4259_v35  ;;  %v4055_v35 = vperm.slane %v3960_v34, %v10412_v30  ;;  %v10899_v0 = vpop.f32.mrf.mxu2  ;;  %v3635_v47 = vadd.f32 %v10820_v62, %v3546_v60  ;;  %v12590_v34 = vld [vmem:[#allocation21_spill] sm:$0xff]  ;;  %vm4755_vm4 = vcmp.ne.s32.totalorder %v7370_v24, %v12558_v22 }
 0x3ee   : > { %v3823_v11 = vpop.f32.mrf.mxu3  ;;  %v3551_v18 = vadd.f32 %v3550_v37, %v12590_v34  ;;  %vm4756_vm14 = vcmp.ne.s32.totalorder %v7371_v50, %v12559_v10  ;;  %v12598_v50 = vshrl.u32 %v10725_v59, 16 }
 0x3ef   : > { %v12206_v14 = vmax.f32 %v10883_v3, 0.0  ;;  %vm10927_vm3 = vmpackc.low %vm4756_vm14, %vm4755_vm4 }
 0x3f0   : > { %v3640_v37 = vadd.f32 %v3639_v51, %v3551_v18 }
 0x3f1   : > { %4340 = vst [vmem:[#allocation1 + $0x1] ss:$2 sm:$0xff] %v12206_v14  ;;  %v3913_v14 = vadd.f32 %v10830_v55, %v3823_v11  ;;  %v4126_v55 = vrot.slane %v4055_v35, 4  ;;  %v10912_v11 = vpop.f32.mrf.mxu1 }
 0x3f3   : > { %v10908_v58 = vpop.f32.mrf.mxu0  ;;  %v3961_v62 = vadd.f32 %v3913_v14, %v3635_v47  ;;  %v4442_v14 = vor.u32 %v4441_v27, %v12592_v33 }
 0x3f5   : > { %v4059_v60 = vperm.slane %v3961_v62, %v10412_v30 }
 0x3f6   : > { %v3826_v42 = vpop.f32.mrf.mxu3 }
 0x3f7   : > { %v3916_v8 = vadd.f32 %v3915_v49, %v3826_v42  ;;  %v12591_v49 = vmax.f32 %v10472_v23, 0.0  ;;  %v4158_v23 = vmax.f32 %v4055_v35, %v4126_v55  ;;  %v3644_v35 = vpop.f32.mrf.mxu2  ;;  %v12599_v55 = vmax.f32 %v10857_v44, 0.0 }
 0x3f8   : > { %v4347_v57 = vld.sshfl [vmem:[#allocation1] sm:$0xff pattern:$0x75316420] }
 0x3f9   : > { %v3962_v54 = vadd.f32 %v3916_v8, %v3638_v45  ;;  %v4363_v41 = vpack.c.bf16 %v4347_v57, %v4347_v57  ;;  %6739 = vst [vmem:[#allocation1] ss:$2 sm:$0xff] %v12589_v6  ;;  %v4378_v8 = vunpack.c.l.b16 %v4362_v43  ;;  %v4443_v6 = vrot.slane %v4408_v1, 1  ;;  %v3558_v44 = vpop.f32.mrf.mxu1 }
 0x3fa   : > { %6741 = vst [vmem:[#allocation1 + $0x1] ss:$2 sm:$0xff] %v12591_v49  ;;  %v4127_v49 = vrot.slane %v4059_v60, 4 }
 0x3fb   : > { %v4063_v45 = vperm.slane %v3962_v54, %v10412_v30  ;;  %v4379_v56 = vunpack.c.l.b16 %v4363_v41  ;;  %v4444_v57 = vsel %vm12593_vm2, %v4442_v14, %v4443_v6  ;;  %v12596_v54 = vrot.slane %v10725_v59, 4 }
 0x3fc   : > { %v4445_v27 = vor.u32 %v4443_v6, %v12598_v50  ;;  %v3922_v6 = vpop.f32.mrf.mxu0 }
 0x3fd   : > { %v4190_v29 = vrot.slane %v4063_v45, 4  ;;  %v10917_v63 = vpack.c.b16 %v4379_v56, %v4378_v8  ;;  %v10953_v8 = vsel %vm10927_vm3, %v4444_v57, 0  ;;  %v12600_v56 = vmax.f32 %v10883_v3, 0.0 }
 0x3fe   : > { %v3828_v46 = vpop.f32.mrf.mxu3  ;;  %v4907_v14 = vrot.slane %v10953_v8, 4 }
 0x3ff   : > { %v4222_v43 = vmax.f32 %v4063_v45, %v4190_v29  ;;  %v3918_v28 = vadd.f32 %v3917_v38, %v3828_v46  ;;  %v4912_v42 = vrot.slane %v10917_v63, 4  ;;  %v4416_v1 = vshll.u32 %v10917_v63, 16 }
 0x400   : > { %v4413_v51 = vshrl.u32 %v10917_v63, 16 }
 0x401   : > { %v4238_v47 = vmax.f32 %v4158_v23, %v4222_v43  ;;  %v3963_v53 = vadd.f32 %v3918_v28, %v3640_v37  ;;  %v4913_v38 = vsel %vm4391_vm5, %v12596_v54, %v4912_v42  ;;  %v10937_v41 = vld.sshfl [vmem:[#allocation1] sm:$0xff pattern:$0x75316420]  ;;  %v10941_v34 = vrot.slane %v4416_v1, 1 }
 0x402   : > { %12597 = vst [vmem:[#allocation27_spill] sm:$0xff] %v10937_v41  ;;  %5126 = vmatmul.bf16.gmra.mxu2 %v4913_v38  ;;  %v10945_v18 = vrot.slane %v4413_v51, 7  ;;  %v4159_v28 = vmax.f32 %v4059_v60, %v4127_v49  ;;  %v12603_v38 = vrot.slane %v10771_v5, 4  ;;  %v11615_v41 = vld [vmem:[%s12078_s7] ss:$0 sm:$0xff] }
 0x403   : > { %6758 = vst [vmem:[#allocation1] ss:$2 sm:$0xff] %v12599_v55  ;;  %v4260_v62 = vmul.f32 %v10435_v4, %v4238_v47  ;;  %v4067_v45 = vperm.slane %v3963_v53, %v10412_v30  ;;  %v4447_v29 = vsel %vm12601_vm0, %v4445_v27, %v10941_v34  ;;  %v12604_v27 = vld [vmem:[#allocation30_spill] sm:$0xff] }
 0x404   : > { %6759 = vst [vmem:[#allocation1 + $0x1] ss:$2 sm:$0xff] %v12600_v56  ;;  %v4418_v37 = vor.u32 %v4416_v1, %v10945_v18  ;;  %v10965_v46 = vsel %vm10862_vm15, %v4447_v29, 0  ;;  %v3554_v55 = vadd.f32 %v10888_v61, %v12604_v27  ;;  %v3560_v29 = vpop.f32.mrf.mxu1 }
 0x405   : > { %v10961_v23 = vadd.f32 %v10445_v15, %v4260_v62  ;;  %v4191_v4 = vrot.slane %v4067_v45, 4  ;;  %v12211_v3 = vrot.slane %v10965_v46, 4  ;;  %v3925_v62 = vpop.f32.mrf.mxu0 }
 0x406   : > { %v3831_v33 = vpop.f32.mrf.mxu3  ;;  %v4419_v43 = vsel %vm12602_vm13, %v10746_v32, %v4418_v37  ;;  %v3647_v32 = vpop.f32.mrf.mxu2 }
 0x407   : > { %v4298_v1 = vmax.f32 %v10961_v23, 0.0  ;;  %v4223_v57 = vmax.f32 %v4067_v45, %v4191_v4  ;;  %v4909_v15 = vsel %vm4391_vm5, %v4907_v14, %v12211_v3  ;;  %v10977_v47 = vsel %vm10871_vm9, %v4419_v43, 0  ;;  %v12605_v43 = vld [vmem:[#allocation31_spill] sm:$0xff] }
 0x408   : > { %5150 = vmatmul.bf16.vlgmr.msra.gmra.mxu3 %v4909_v15  ;;  %v12210_v54 = vrot.slane %v10977_v47, 4  ;;  %v3921_v45 = vadd.f32 %v10908_v58, %v3831_v33  ;;  %v3643_v4 = vadd.f32 %v10899_v0, %v3554_v55  ;;  %v12607_v55 = vmax.f32 %v10530_v20, 0.0  ;;  %v11054_v23 = vld [vmem:[%s12076_s5] ss:$0 sm:$0xff] }
 0x409   : > { %4341 = vst [vmem:[#allocation1 + $0x10] ss:$2 sm:$0xff] %v4298_v1  ;;  %v4239_v53 = vmax.f32 %v4159_v28, %v4223_v57  ;;  %v3559_v28 = vadd.f32 %v3558_v44, %v12605_v43  ;;  %v12606_v57 = vld [vmem:[#allocation23_spill] sm:$0xff]  ;;  %v12608_v44 = vld [vmem:[#allocation12_spill] sm:$0xff] }
 0x40a   : > { %v4911_v50 = vsel %vm4391_vm5, %v12603_v38, %v12210_v54  ;;  %v3964_v14 = vadd.f32 %v3921_v45, %v3643_v4  ;;  %v3556_v61 = vadd.f32 %v10912_v11, %v12606_v57  ;;  %v4514_v45 = vand.u32 7, %v12608_v44  ;;  %v12609_v11 = vld [vmem:[#allocation25_spill] sm:$0xff] }
 0x40b   : > { %v4261_v60 = vmul.f32 %v10459_v12, %v4239_v53  ;;  %5097 = vmatmul.bf16.gmra.mxu1 %v4911_v50  ;;  %v3648_v50 = vadd.f32 %v3647_v32, %v3559_v28  ;;  %v3561_v4 = vadd.f32 %v3560_v29, %v12609_v11  ;;  %v12611_v32 = vld [vmem:[#allocation15_spill] sm:$0xff]  ;;  %v12615_v57 = vand.u32 7, %v12579_v52 }
 0x40c   : > { %v4071_v53 = vperm.slane %v3964_v14, %v10412_v30  ;;  %v3645_v33 = vadd.f32 %v3644_v35, %v3556_v61  ;;  %v4507_v35 = vand.u32 7, %v12611_v32  ;;  %vm11022_vm8 = vcmp.ne.s32.totalorder %v4514_v45, 0  ;;  %v11046_v28 = vld [vmem:[%s12075_s4] ss:$0 sm:$0xff] }
 0x40d   : > { %v10991_v49 = vadd.f32 %v10464_v31, %v4261_v60  ;;  %v3927_v27 = vpop.f32.mrf.mxu0  ;;  %vm4690_vm11 = vcmp.ne.s32.totalorder %v12615_v57, 7  ;;  %vm4618_vm0 = vmpackc.low %vm11022_vm8, %vm11022_vm8 }
 0x40e   : > { %v3833_v56 = vpop.f32.mrf.mxu3  ;;  %v3649_v15 = vpop.f32.mrf.mxu2  ;;  %v4128_v43 = vrot.slane %v4071_v53, 4  ;;  %vm4720_vm12 = vmpackc.low %vm4690_vm11, %vm4690_vm11  ;;  %vm4587_vm14 = vcmp.ne.s32.totalorder %v4507_v35, 0 }
 0x40f   : > { %v4299_v37 = vmax.f32 %v10991_v49, 0.0  ;;  %v3923_v60 = vadd.f32 %v3922_v6, %v3833_v56  ;;  %v11002_v49 = vpop.f32.mrf.mxu1  ;;  %v12610_v6 = vmax.f32 %v10545_v26, 0.0  ;;  %v12612_v56 = vand.u32 7, %v12575_v21  ;;  %vm4617_vm2 = vmpackc.low %vm4587_vm14, %vm4587_vm14 }
 0x410   : > { %v3650_v26 = vadd.f32 %v3649_v15, %v3561_v4  ;;  %v4160_v61 = vmax.f32 %v4071_v53, %v4128_v43  ;;  %v4730_v52 = vsel %vm4720_vm12, 65537, %v12557_v7  ;;  %vm11131_vm14 = vcmp.ne.s32.totalorder %v4514_v45, 7 }
 0x411   : > { %4342 = vst [vmem:[#allocation1 + $0x11] ss:$2 sm:$0xff] %v4299_v37  ;;  %v3965_v14 = vadd.f32 %v3923_v60, %v3645_v33  ;;  %vm11014_vm1 = vcmp.ne.s32.totalorder %v12612_v56, 7  ;;  %v4740_v15 = vunpack.c.l.b16 %v4730_v52 }
 0x412   : > { %vm4721_vm4 = vmpackc.low %vm11014_vm1, %vm11014_vm1 }
 0x413   : > { %v4075_v60 = vperm.slane %v3965_v14, %v10412_v30  ;;  %v4731_v33 = vsel %vm4721_vm4, 65537, %v12557_v7  ;;  %v7374_v14 = vunpack.i.l.s16 %v4740_v15 }
 0x415   : > { %v3930_v4 = vpop.f32.mrf.mxu0  ;;  %v4129_v43 = vrot.slane %v4075_v60, 4  ;;  %vm4769_vm13 = vcmp.ne.s32.totalorder %v7374_v14, %v12558_v22  ;;  %v12623_v14 = vld [vmem:[#allocation33_spill] sm:$0xff] }
 0x416   : > { %v3836_v38 = vpop.f32.mrf.mxu3  ;;  %v3652_v21 = vpop.f32.mrf.mxu2 }
 0x417   : > { %v3926_v58 = vadd.f32 %v3925_v62, %v3836_v38  ;;  %v3565_v56 = vpop.f32.mrf.mxu1 }
 0x418   : > { %v11000_v54 = vld.sshfl [vmem:[#allocation1 + $0x10] sm:$0xff pattern:$0x75316420] }
 0x419   : > { %v3966_v0 = vadd.f32 %v3926_v58, %v3648_v50  ;;  %6743 = vst [vmem:[#allocation1 + $0x10] ss:$2 sm:$0xff] %v12607_v55  ;;  %v4741_v55 = vunpack.c.l.b16 %v4731_v33 }
 0x41a   : > { %6745 = vst [vmem:[#allocation1 + $0x11] ss:$2 sm:$0xff] %v12610_v6  ;;  %v4628_v6 = vsel %vm4618_vm0, 65537, %v12557_v7 }
 0x41b   : > { %v4079_v62 = vperm.slane %v3966_v0, %v10412_v30  ;;  %v7375_v29 = vunpack.i.l.s16 %v4741_v55 }
 0x41d   : > { %v4192_v20 = vrot.slane %v4079_v62, 4  ;;  %vm4770_vm1 = vcmp.ne.s32.totalorder %v7375_v29, %v12559_v10 }
 0x41e   : > { %v3838_v38 = vpop.f32.mrf.mxu3  ;;  %vm11060_vm11 = vmpackc.low %vm4770_vm1, %vm4769_vm13 }
 0x41f   : > { %v4224_v50 = vmax.f32 %v4079_v62, %v4192_v20  ;;  %v3928_v58 = vadd.f32 %v3927_v27, %v3838_v38  ;;  %v4627_v27 = vsel %vm4617_vm2, 65537, %v12557_v7  ;;  %vm4692_vm2 = vcmp.ne.s32.totalorder %v4507_v35, 7  ;;  %vm4723_vm13 = vmpackc.low %vm11131_vm14, %vm11131_vm14 }
 0x420   : > { %v4637_v62 = vunpack.c.l.b16 %v4627_v27  ;;  %vm4722_vm0 = vmpackc.low %vm4692_vm2, %vm4692_vm2  ;;  %vm12638_vm2 = vsmask.f32 7424 }
 0x421   : > { %v4240_v53 = vmax.f32 %v4160_v61, %v4224_v50  ;;  %v3967_v0 = vadd.f32 %v3928_v58, %v3650_v26  ;;  %v11038_v11 = vld.sshfl [vmem:[#allocation1 + $0x10] sm:$0xff pattern:$0x75316420]  ;;  %v4638_v26 = vunpack.c.l.b16 %v4628_v6  ;;  %v3564_v6 = vadd.f32 %v11002_v49, %v12623_v14  ;;  %v8235_v49 = vld [vmem:[%s12077_s6 + $0xb8] sm:$0xff] }
 0x422   : > { %12618 = vst [vmem:[#allocation36_spill] sm:$0xff] %v11038_v11  ;;  %v7366_v61 = vunpack.i.l.s16 %v4637_v62  ;;  %5373 = vmatpush.bf16.msrb.mxu3 %v8235_v49  ;;  %v4364_v49 = vpack.c.bf16 %v11000_v54, %v11000_v54  ;;  %v12626_v54 = vmax.f32 %v10638_v9, 0.0  ;;  %v8232_v9 = vld [vmem:[%s12077_s6 + $0xa0] sm:$0xff] }
 0x423   : > { %6760 = vst [vmem:[#allocation1 + $0x10] ss:$2 sm:$0xff] %v4298_v1  ;;  %v4262_v20 = vmul.f32 %v11046_v28, %v4240_v53  ;;  %v4083_v57 = vperm.slane %v3967_v0, %v10412_v30  ;;  %v7367_v50 = vunpack.i.l.s16 %v4638_v26  ;;  %v3654_v0 = vpop.f32.mrf.mxu2  ;;  %v3653_v26 = vadd.f32 %v3652_v21, %v3564_v6 }
 0x424   : > { %6761 = vst [vmem:[#allocation1 + $0x11] ss:$2 sm:$0xff] %v4299_v37  ;;  %vm4671_vm8 = vcmp.ne.s32.totalorder %v7366_v61, %v12558_v22  ;;  %v4161_v37 = vmax.f32 %v4075_v60, %v4129_v43  ;;  %v3932_v60 = vpop.f32.mrf.mxu0  ;;  %v3568_v43 = vpop.f32.mrf.mxu1  ;;  %v12624_v61 = vld [vmem:[#allocation24_spill] sm:$0xff] }
 0x425   : > { %v11057_v1 = vadd.f32 %v11054_v23, %v4262_v20  ;;  %v4193_v38 = vrot.slane %v4083_v57, 4  ;;  %vm4672_vm12 = vcmp.ne.s32.totalorder %v7367_v50, %v12559_v10  ;;  %v8227_v50 = vld [vmem:[%s12077_s6 + $0x78] sm:$0xff] }
 0x426   : > { %v3841_v58 = vpop.f32.mrf.mxu3  ;;  %vm11067_vm4 = vmpackc.low %vm4672_vm12, %vm4671_vm8  ;;  %5344 = vmatpush.bf16.msrb.mxu2 %v8227_v50 }
 0x427   : > { %v4300_v33 = vmax.f32 %v11057_v1, 0.0  ;;  %v4225_v15 = vmax.f32 %v4083_v57, %v4193_v38  ;;  %v3931_v20 = vadd.f32 %v3930_v4, %v3841_v58  ;;  %v3566_v38 = vadd.f32 %v3565_v56, %v12624_v61  ;;  %v8219_v4 = vld [vmem:[%s12077_s6 + $0x38] sm:$0xff] }
 0x428   : > { %5315 = vmatpush.bf16.msrb.mxu1 %v8219_v4 }
 0x429   : > { %4343 = vst [vmem:[#allocation1 + $0x20] ss:$2 sm:$0xff] %v4300_v33  ;;  %v4241_v55 = vmax.f32 %v4161_v37, %v4225_v15  ;;  %v3968_v58 = vadd.f32 %v3931_v20, %v3653_v26  ;;  %v12625_v15 = vld [vmem:[#allocation35_spill] sm:$0xff]  ;;  %v3655_v14 = vadd.f32 %v3654_v0, %v3566_v38  ;;  %v8225_v0 = vld [vmem:[%s12077_s6 + $0x68] sm:$0xff] }
 0x42a   : > { %v3569_v56 = vadd.f32 %v3568_v43, %v12625_v15  ;;  %v8233_v38 = vld [vmem:[%s12077_s6 + $0xa8] sm:$0xff] }
 0x42b   : > { %v4263_v27 = vmul.f32 %v10459_v12, %v4241_v55  ;;  %v3657_v21 = vpop.f32.mrf.mxu2  ;;  %v8226_v55 = vld [vmem:[%s12077_s6 + $0x70] sm:$0xff]  ;;  %v4087_v20 = vperm.slane %v3968_v58, %v10412_v30  ;;  %v8217_v58 = vld [vmem:[%s12077_s6 + $0x28] sm:$0xff] }
 0x42c   : > { %v3935_v6 = vpop.f32.mrf.mxu0  ;;  %v3658_v26 = vadd.f32 %v3657_v21, %v3569_v56  ;;  %v3570_v61 = vpop.f32.mrf.mxu1  ;;  %5345 = vmatpush.bf16.msrb.mxu2 %v8226_v55  ;;  %v12627_v15 = vld [vmem:[#allocation20_spill] sm:$0xff] }
 0x42d   : > { %v11077_v62 = vadd.f32 %v10464_v31, %v4263_v27  ;;  %v8234_v27 = vld [vmem:[%s12077_s6 + $0xb0] sm:$0xff]  ;;  %v3571_v56 = vadd.f32 %v3570_v61, %v12627_v15  ;;  %v4130_v55 = vrot.slane %v4087_v20, 4  ;;  %v12629_v61 = vld [vmem:[#allocation8_spill] sm:$0xff] }
 0x42e   : > { %v3843_v57 = vpop.f32.mrf.mxu3  ;;  %5374 = vmatpush.bf16.msrb.mxu3 %v8234_v27 }
 0x42f   : > { %v12212_v29 = vmax.f32 %v11077_v62, 0.0  ;;  %v3933_v37 = vadd.f32 %v3932_v60, %v3843_v57  ;;  %v8218_v60 = vld [vmem:[%s12077_s6 + $0x30] sm:$0xff]  ;;  %v12639_v1 = vmax.f32 %v11077_v62, 0.0 }
 0x430   : > { %5316 = vmatpush.bf16.msrb.mxu1 %v8218_v60  ;;  %v4380_v60 = vunpack.c.l.b16 %v4364_v49  ;;  %5346 = vmatpush.bf16.msrb.mxu2 %v8225_v0  ;;  %v8222_v62 = vld [vmem:[%s12077_s6 + $0x50] sm:$0xff] }
 0x431   : > { %4344 = vst [vmem:[#allocation1 + $0x21] ss:$2 sm:$0xff] %v12212_v29  ;;  %v3969_v43 = vadd.f32 %v3933_v37, %v3655_v14  ;;  %v12628_v14 = vmax.f32 %v10664_v40, 0.0 }
 0x432   : > { %5375 = vmatpush.bf16.msrb.mxu3 %v8233_v38 }
 0x433   : > { %v4091_v27 = vperm.slane %v3969_v43, %v10412_v30  ;;  %v12630_v43 = vld [vmem:[#allocation18_spill] sm:$0xff]  ;;  %v3659_v49 = vpop.f32.mrf.mxu2 }
 0x434   : > { %5317 = vmatpush.bf16.msrb.mxu1 %v8217_v58 }
 0x435   : > { %v4131_v15 = vrot.slane %v4091_v27, 4 }
 0x436   : > { %v3846_v57 = vpop.f32.mrf.mxu3  ;;  %5376 = vmatpush.bf16.msrb.mxu3 %v8232_v9 }
 0x437   : > { %v3936_v50 = vadd.f32 %v3935_v6, %v3846_v57 }
 0x438   : > { %v4349_v4 = vld.sshfl [vmem:[#allocation1 + $0x20] sm:$0xff pattern:$0x75316420] }
 0x439   : > { %v3970_v37 = vadd.f32 %v3936_v50, %v3658_v26  ;;  %v4365_v21 = vpack.c.bf16 %v4349_v4, %v4349_v4  ;;  %6747 = vst [vmem:[#allocation1 + $0x20] ss:$2 sm:$0xff] %v12626_v54  ;;  %v8224_v26 = vld [vmem:[%s12077_s6 + $0x60] sm:$0xff]  ;;  %v4528_v50 = vand.u32 7, %v12629_v61  ;;  %v4521_v4 = vand.u32 7, %v12630_v43  ;;  %v8215_v43 = vld [vmem:[%s12077_s6 + $0x18] sm:$0xff] }
 0x43a   : > { %6749 = vst [vmem:[#allocation1 + $0x21] ss:$2 sm:$0xff] %v12628_v14  ;;  %v4162_v54 = vmax.f32 %v4087_v20, %v4130_v55  ;;  %v3937_v14 = vpop.f32.mrf.mxu0  ;;  %5347 = vmatpush.bf16.msrb.mxu2 %v8224_v26  ;;  %v4733_v26 = vsel %vm4723_vm13, 65537, %v12557_v7  ;;  %v8214_v61 = vld [vmem:[%s12077_s6 + $0x10] sm:$0xff] }
 0x43b   : > { %v4095_v6 = vperm.slane %v3970_v37, %v10412_v30  ;;  %v4381_v57 = vunpack.c.l.b16 %v4365_v21  ;;  %v4448_v37 = vor.u32 %v10941_v34, %v4413_v51  ;;  %v3660_v21 = vadd.f32 %v3659_v49, %v3571_v56  ;;  %v8223_v49 = vld [vmem:[%s12077_s6 + $0x58] sm:$0xff] }
 0x43c   : > { %v4732_v51 = vsel %vm4722_vm0, 65537, %v12557_v7  ;;  %vm11151_vm1 = vcmp.ne.s32.totalorder %v4521_v4, 0  ;;  %vm11157_vm8 = vcmp.ne.s32.totalorder %v4528_v50, 0  ;;  %vm12640_vm0 = vsmask.f32 256 }
 0x43d   : > { %v4194_v0 = vrot.slane %v4095_v6, 4  ;;  %v11135_v38 = vpack.c.b16 %v4381_v57, %v4380_v60  ;;  %vm4619_vm12 = vmpackc.low %vm11151_vm1, %vm11151_vm1  ;;  %v4742_v9 = vunpack.c.l.b16 %v4732_v51 }
 0x43e   : > { %v3848_v3 = vpop.f32.mrf.mxu3  ;;  %vm4620_vm14 = vmpackc.low %vm11157_vm8, %vm11157_vm8  ;;  %5348 = vmatpush.bf16.msrb.mxu2 %v8223_v49  ;;  %v8231_v49 = vld [vmem:[%s12077_s6 + $0x98] sm:$0xff] }
 0x43f   : > { %v4226_v44 = vmax.f32 %v4095_v6, %v4194_v0  ;;  %v3938_v45 = vadd.f32 %v3937_v14, %v3848_v3  ;;  %v4918_v58 = vrot.slane %v11135_v38, 4  ;;  %v4424_v29 = vshll.u32 %v11135_v38, 16  ;;  %v8216_v0 = vld [vmem:[%s12077_s6 + $0x20] sm:$0xff]  ;;  %5377 = vmatpush.bf16.msrb.mxu3 %v8231_v49 }
 0x440   : > { %v4421_v60 = vshrl.u32 %v11135_v38, 16  ;;  %v4163_v6 = vmax.f32 %v4091_v27, %v4131_v15  ;;  %5318 = vmatpush.bf16.msrb.mxu1 %v8216_v0 }
 0x441   : > { %v4242_v32 = vmax.f32 %v4162_v54, %v4226_v44  ;;  %v3971_v35 = vadd.f32 %v3938_v45, %v3660_v21  ;;  %v4919_v20 = vsel %vm4391_vm5, %v4912_v42, %v4918_v58  ;;  %v11166_v56 = vrot.slane %v4424_v29, 1  ;;  %v11171_v55 = vld.sshfl [vmem:[#allocation1 + $0x20] sm:$0xff pattern:$0x75316420] }
 0x442   : > { %12637 = vst [vmem:[#allocation37_spill] sm:$0xff] %v11171_v55  ;;  %5131 = vmatmul.bf16.gmra.mxu2 %v4919_v20  ;;  %v11175_v57 = vrot.slane %v4421_v60, 7  ;;  %v4629_v21 = vsel %vm4619_vm12, 65537, %v12557_v7  ;;  %vm4694_vm12 = vcmp.ne.s32.totalorder %v4521_v4, 7  ;;  %v8221_v4 = vld [vmem:[%s12077_s6 + $0x48] sm:$0xff] }
 0x443   : > { %6762 = vst [vmem:[#allocation1 + $0x20] ss:$2 sm:$0xff] %v4300_v33  ;;  %v4264_v42 = vmul.f32 %v11046_v28, %v4242_v32  ;;  %v4099_v40 = vperm.slane %v3971_v35, %v10412_v30  ;;  %v4450_v27 = vsel %vm12638_vm2, %v4448_v37, %v11166_v56  ;;  %v4743_v33 = vunpack.c.l.b16 %v4733_v26  ;;  %5349 = vmatpush.bf16.msrb.mxu2 %v8222_v62  ;;  %vm4724_vm2 = vmpackc.low %vm4694_vm12, %vm4694_vm12 }
 0x444   : > { %6763 = vst [vmem:[#allocation1 + $0x21] ss:$2 sm:$0xff] %v12639_v1  ;;  %v11198_v28 = vsel %vm11060_vm11, %v4450_v27, 0  ;;  %v4426_v30 = vor.u32 %v4424_v29, %v11175_v57  ;;  %v7376_v37 = vunpack.i.l.s16 %v4742_v9  ;;  %v4630_v29 = vsel %vm4620_vm14, 65537, %v12557_v7  ;;  %5319 = vmatpush.bf16.msrb.mxu1 %v8215_v43  ;;  %v8332_v27 = vld [vmem:[%s12079_s8 + $0x180] sm:$0xff] }
 0x445   : > { %v11202_v54 = vadd.f32 %v11054_v23, %v4264_v42  ;;  %v4195_v15 = vrot.slane %v4099_v40, 4  ;;  %v4914_v14 = vrot.slane %v11198_v28, 4  ;;  %v7377_v44 = vunpack.i.l.s16 %v4743_v33  ;;  %v5122_v42 = vpop.f32.mrf.mxu2 }
 0x446   : > { %v4427_v23 = vsel %vm12640_vm0, %v10945_v18, %v4426_v30  ;;  %vm4776_vm13 = vcmp.ne.s32.totalorder %v7376_v37, %v12558_v22  ;;  %v4639_v45 = vunpack.c.l.b16 %v4629_v21  ;;  %v12641_v32 = vrot.slane %v10965_v46, 4 }
 0x447   : > { %v4302_v51 = vmax.f32 %v11202_v54, 0.0  ;;  %v4227_v34 = vmax.f32 %v4099_v40, %v4195_v15  ;;  %v11225_v3 = vsel %vm11067_vm4, %v4427_v23, 0  ;;  %vm4777_vm1 = vcmp.ne.s32.totalorder %v7377_v44, %v12559_v10  ;;  %v5093_v40 = vpop.f32.mrf.mxu1  ;;  %5350 = vmatpush.bf16.msrb.mxu2 %v8221_v4 }
 0x448   : > { %v4915_v35 = vsel %vm4391_vm5, %v12641_v32, %v4914_v14  ;;  %v4916_v18 = vrot.slane %v11225_v3, 4  ;;  %v4640_v20 = vunpack.c.l.b16 %v4630_v29  ;;  %v7368_v26 = vunpack.i.l.s16 %v4639_v45  ;;  %vm11233_vm8 = vmpackc.low %vm4777_vm1, %vm4776_vm13  ;;  %5320 = vmatpush.bf16.msrb.mxu1 %v8214_v61  ;;  %v8213_v32 = vld [vmem:[%s12077_s6 + $0x8] sm:$0xff] }
 0x449   : > { %5155 = vmatmul.bf16.gmra.mxu3 %v4915_v35  ;;  %4345 = vst [vmem:[#allocation1 + $0x30] ss:$2 sm:$0xff] %v4302_v51  ;;  %v4243_v9 = vmax.f32 %v4163_v6, %v4227_v34  ;;  %v11242_v0 = vadd.f32 %v5122_v42, %v5093_v40  ;;  %v12644_v6 = vrot.slane %v10977_v47, 4  ;;  %vm11259_vm0 = vcmp.ne.s32.totalorder %v4528_v50, 7  ;;  %v8220_v50 = vld [vmem:[%s12077_s6 + $0x40] sm:$0xff]  ;;  %v8353_v29 = vld [vmem:[%s12079_s8 + $0x228] sm:$0xff] }
 0x44a   : > { %v7369_v1 = vunpack.i.l.s16 %v4640_v20  ;;  %vm4678_vm14 = vcmp.ne.s32.totalorder %v7368_v26, %v12558_v22  ;;  %v4734_v37 = vsel %vm4724_vm2, 65537, %v12557_v7  ;;  %vm4725_vm12 = vmpackc.low %vm11259_vm0, %vm11259_vm0  ;;  %v8212_v35 = vld [vmem:[%s12077_s6] sm:$0xff]  ;;  %v4451_v33 = vor.u32 %v11166_v56, %v4421_v60 }
 0x44b   : > { %v4917_v21 = vsel %vm4391_vm5, %v12644_v6, %v4916_v18  ;;  %v4265_v30 = vmul.f32 %v10459_v12, %v4243_v9  ;;  %v8230_v12 = vld [vmem:[%s12077_s6 + $0x90] sm:$0xff]  ;;  %v4744_v15 = vunpack.c.l.b16 %v4734_v37  ;;  %v4735_v44 = vsel %vm4725_vm12, 65537, %v12557_v7  ;;  %5351 = vmatpush.bf16.msrb.mxu2 %v8220_v50  ;;  %v8228_v40 = vld [vmem:[%s12077_s6 + $0x80] sm:$0xff]  ;;  %v8283_v50 = vld [vmem:[%s12077_s6 + $0x238] sm:$0xff] }
 0x44c   : > { %5102 = vmatmul.bf16.gmra.mxu1 %v4917_v21  ;;  %vm4679_vm13 = vcmp.ne.s32.totalorder %v7369_v1, %v12559_v10  ;;  %5378 = vmatpush.bf16.msrb.mxu3 %v8230_v12  ;;  %v4745_v45 = vunpack.c.l.b16 %v4735_v44  ;;  %v12651_v9 = vmax.f32 %v10761_v48, 0.0  ;;  %vm12655_vm12 = vsmask.f32 256  ;;  %v8351_v7 = vld [vmem:[%s12079_s8 + $0x218] sm:$0xff] }
 0x44d   : > { %v4287_v62 = vadd.f32 %v10464_v31, %v4265_v30  ;;  %vm11269_vm1 = vmpackc.low %vm4679_vm13, %vm4678_vm14  ;;  %v7378_v23 = vunpack.i.l.s16 %v4744_v15  ;;  %5321 = vmatpush.bf16.msrb.mxu1 %v8213_v32  ;;  %vm12654_vm13 = vsmask.f32 7424 }
 0x44e   : > { %v7379_v34 = vunpack.i.l.s16 %v4745_v45  ;;  %v8274_v45 = vld [vmem:[%s12077_s6 + $0x1f0] sm:$0xff] }
 0x44f   : > { %v4303_v31 = vmax.f32 %v4287_v62, 0.0  ;;  %vm4783_vm14 = vcmp.ne.s32.totalorder %v7378_v23, %v12558_v22  ;;  %v8229_v22 = vld [vmem:[%s12077_s6 + $0x88] sm:$0xff] }
 0x450   : > { %vm4784_vm2 = vcmp.ne.s32.totalorder %v7379_v34, %v12559_v10  ;;  %v12652_v10 = vmax.f32 %v10786_v2, 0.0  ;;  %5379 = vmatpush.bf16.msrb.mxu3 %v8229_v22  ;;  %v12656_v23 = vld [vmem:[#allocation32_spill] sm:$0xff]  ;;  %v8282_v34 = vld [vmem:[%s12077_s6 + $0x230] sm:$0xff] }
 0x451   : > { %4346 = vst [vmem:[#allocation1 + $0x31] ss:$2 sm:$0xff] %v4303_v31  ;;  %vm11291_vm0 = vmpackc.low %vm4784_vm2, %vm4783_vm14  ;;  %5322 = vmatpush.bf16.msrb.mxu1 %v8212_v35  ;;  %vm12657_vm14 = vnez %v12656_v23  ;;  %v8266_v35 = vld [vmem:[%s12077_s6 + $0x1b0] sm:$0xff]  ;;  %v8272_v22 = vld [vmem:[%s12077_s6 + $0x1e0] sm:$0xff] }
 0x452   : > { %vm11350_vm2 = vmneg %vm4391_vm5 }
 0x454   : > { %5380 = vmatpush.bf16.msrb.mxu3 %v8228_v40  ;;  %v11390_v40 = vpop.f32.mrf.mxu1 }
 0x458   : > { %v4350_v20 = vld.sshfl [vmem:[#allocation1 + $0x30] sm:$0xff pattern:$0x75316420]  ;;  %5653 = vmatpush.bf16.msra.mxu3 %v8283_v50 }
 0x459   : > { %v4366_v26 = vpack.c.bf16 %v4350_v20, %v4350_v20  ;;  %6751 = vst [vmem:[#allocation1 + $0x30] ss:$2 sm:$0xff] %v12651_v9  ;;  %v8273_v20 = vld [vmem:[%s12077_s6 + $0x1e8] sm:$0xff] }
 0x45a   : > { %6753 = vst [vmem:[#allocation1 + $0x31] ss:$2 sm:$0xff] %v12652_v10  ;;  %v8265_v9 = vld [vmem:[%s12077_s6 + $0x1a8] sm:$0xff]  ;;  %v8280_v10 = vld [vmem:[%s12077_s6 + $0x220] sm:$0xff] }
 0x45b   : > { %v4382_v42 = vunpack.c.l.b16 %v4366_v26 }
 0x45c   : > { %5654 = vmatpush.bf16.msra.mxu3 %v8282_v34 }
 0x45d   : > { %v11305_v49 = vpack.c.b16 %v4382_v42, %v4382_v42  ;;  %v11388_v42 = vpop.f32.mrf.mxu2 }
 0x45f   : > { %v4396_v48 = vsel %vm4391_vm5, %v11305_v49, 0 }
 0x460   : > { %v4428_v6 = vshrl.u32 %v4396_v48, 16  ;;  %v4431_v21 = vshll.u32 %v4396_v48, 16  ;;  %v4924_v1 = vrot.slane %v4396_v48, 4  ;;  %v8264_v48 = vld [vmem:[%s12077_s6 + $0x1a0] sm:$0xff] }
 0x461   : > { %v11309_v30 = vld.sshfl [vmem:[#allocation1 + $0x30] sm:$0xff pattern:$0x75316420] }
 0x462   : > { %12653 = vst [vmem:[#allocation34_spill] sm:$0xff] %v11309_v30  ;;  %v4430_v43 = vrot.slane %v4428_v6, 7  ;;  %v4452_v2 = vrot.slane %v4431_v21, 1  ;;  %v4925_v4 = vsel %vm4391_vm5, %v4918_v58, %v4924_v1 }
 0x463   : > { %6764 = vst [vmem:[#allocation1 + $0x30] ss:$2 sm:$0xff] %v4302_v51  ;;  %5136 = vmatmul.bf16.gmra.mxu2 %v4925_v4  ;;  %v8263_v4 = vld [vmem:[%s12077_s6 + $0x198] sm:$0xff] }
 0x464   : > { %6765 = vst [vmem:[#allocation1 + $0x31] ss:$2 sm:$0xff] %v4303_v31  ;;  %v4453_v37 = vsel %vm12654_vm13, %v4451_v33, %v4452_v2  ;;  %v4433_v12 = vor.u32 %v4431_v21, %v4430_v43  ;;  %v4454_v61 = vor.u32 %v4452_v2, %v4428_v6  ;;  %v8270_v6 = vld [vmem:[%s12077_s6 + $0x1d0] sm:$0xff]  ;;  %v8279_v43 = vld [vmem:[%s12077_s6 + $0x218] sm:$0xff]  ;;  %v8269_v33 = vld [vmem:[%s12077_s6 + $0x1c8] sm:$0xff] }
 0x465   : > { %v11322_v15 = vsel %vm11233_vm8, %v4453_v37, 0 }
 0x466   : > { %v4920_v62 = vrot.slane %v11322_v15, 4  ;;  %v4434_v58 = vsel %vm12655_vm12, %v11175_v57, %v4433_v12  ;;  %v8275_v57 = vld [vmem:[%s12077_s6 + $0x1f8] sm:$0xff]  ;;  %v4460_v31 = vsel %vm12657_vm14, %v4454_v61, 0 }
 0x467   : > { %v11329_v60 = vsel %vm11269_vm1, %v4434_v58, 0  ;;  %5624 = vmatpush.bf16.msra.mxu2 %v8275_v57  ;;  %v11356_v44 = vsel %vm11291_vm0, %v4460_v31, 0  ;;  %v8268_v58 = vld [vmem:[%s12077_s6 + $0x1c0] sm:$0xff]  ;;  %v11443_v61 = vld [vmem:[%s12079_s8 + $0x38] sm:$0xff] }
 0x468   : > { %v4921_v56 = vsel %vm4391_vm5, %v4914_v14, %v4920_v62  ;;  %v4922_v54 = vrot.slane %v11329_v60, 4  ;;  %v8267_v14 = vld [vmem:[%s12077_s6 + $0x1b8] sm:$0xff]  ;;  %v4926_v32 = vrot.slane %v11356_v44, 4  ;;  %6344 = vmatpush.bf16.msrb.mxu0 %v11443_v61 }
 0x469   : > { %5160 = vmatmul.bf16.gmra.mxu3 %v4921_v56  ;;  %5595 = vmatpush.bf16.msra.mxu1 %v8267_v14  ;;  %v8261_v56 = vld [vmem:[%s12077_s6 + $0x188] sm:$0xff] }
 0x46a   : > { %v4923_v51 = vsel %vm4391_vm5, %v4916_v18, %v4922_v54  ;;  %v4927_v26 = vsel %vm4391_vm5, %v4920_v62, %v4926_v32  ;;  %v8262_v62 = vld [vmem:[%s12077_s6 + $0x190] sm:$0xff]  ;;  %v8277_v54 = vld [vmem:[%s12077_s6 + $0x208] sm:$0xff] }
 0x46b   : > { %5107 = vmatmul.bf16.gmra.mxu1 %v4923_v51  ;;  %5625 = vmatpush.bf16.msra.mxu2 %v8274_v45  ;;  %v8276_v51 = vld [vmem:[%s12077_s6 + $0x200] sm:$0xff]  ;;  %v8349_v18 = vld [vmem:[%s12079_s8 + $0x208] sm:$0xff] }
 0x46d   : > { %5596 = vmatpush.bf16.msra.mxu1 %v8266_v35 }
 0x46f   : > { %5626 = vmatpush.bf16.msra.mxu2 %v8273_v20 }
 0x471   : > { %5597 = vmatpush.bf16.msra.mxu1 %v8265_v9 }
 0x473   : > { %7621 = vmatmul.msk.bf16.vlgmr.msrb.gmra.mxu2 %vm11350_vm2, %v10674_v25  ;;  %v8281_v25 = vld [vmem:[%s12077_s6 + $0x228] sm:$0xff] }
 0x474   : > { %5655 = vmatpush.bf16.msra.mxu3 %v8281_v25  ;;  %5627 = vmatpush.bf16.msra.mxu2 %v8272_v22 }
 0x475   : > { %5598 = vmatpush.bf16.msra.mxu1 %v8264_v48 }
 0x478   : > { %5656 = vmatpush.bf16.msra.mxu3 %v8280_v10 }
 0x479   : > { %5165 = vmatmul.bf16.gmra.mxu3 %v4927_v26  ;;  %5599 = vmatpush.bf16.msra.mxu1 %v8263_v4 }
 0x47b   : > { %5323 = vmatmul.bf16.vlgmr.msrb.gmra.mxu1 %v10766_v39  ;;  %v8271_v39 = vld [vmem:[%s12077_s6 + $0x1d8] sm:$0xff] }
 0x47c   : > { %5628 = vmatpush.bf16.msra.mxu2 %v8271_v39  ;;  %5657 = vmatpush.bf16.msra.mxu3 %v8279_v43 }
 0x47d   : > { %5600 = vmatpush.bf16.msra.mxu1 %v8262_v62 }
 0x480   : > { %5629 = vmatpush.bf16.msra.mxu2 %v8270_v6 }
 0x481   : > { %5601 = vmatpush.bf16.msra.mxu1 %v8261_v56 }
 0x483   : > { %5357 = vmatmul.bf16.gmra.mxu2 %v10725_v59 }
 0x484   : > { %5630 = vmatpush.bf16.msra.mxu2 %v8269_v33  ;;  %v11500_v33 = vld [vmem:[%s12079_s8 + $0x20] sm:$0xff] }
 0x485   : > { %v5127_v21 = vpop.f32.mrf.mxu2 }
 0x488   : > { %v5098_v1 = vpop.f32.mrf.mxu1  ;;  %5631 = vmatpush.bf16.msra.mxu2 %v8268_v58 }
 0x489   : > { %5381 = vmatmul.bf16.vlgmr.msrb.gmra.mxu3 %v10953_v8  ;;  %v5128_v2 = vadd.f32 %v5127_v21, %v5098_v1  ;;  %v8278_v8 = vld [vmem:[%s12077_s6 + $0x210] sm:$0xff] }
 0x48a   : > { %5658 = vmatpush.bf16.msra.mxu3 %v8278_v8 }
 0x48b   : > { %5328 = vmatmul.bf16.gmra.mxu1 %v10771_v5  ;;  %v5151_v37 = vpop.f32.mrf.mxu3 }
 0x48c   : > { %v5152_v12 = vadd.f32 %v5151_v37, %v11242_v0  ;;  %v8260_v0 = vld [vmem:[%s12077_s6 + $0x180] sm:$0xff] }
 0x48d   : > { %5602 = vmatpush.bf16.msra.mxu1 %v8260_v0  ;;  %v11450_v57 = vpop.f32.mrf.mxu2  ;;  %v8315_v0 = vld [vmem:[%s12079_s8 + $0xf8] sm:$0xff] }
 0x48e   : > { %5659 = vmatpush.bf16.msra.mxu3 %v8277_v54 }
 0x490   : > { %v11452_v50 = vpop.f32.mrf.mxu1 }
 0x491   : > { %6113 = vmatpush.bf16.msrb.mxu1 %v8315_v0  ;;  %v11554_v0 = vld [vmem:[%s12079_s8 + $0x10] sm:$0xff] }
 0x492   : > { %5660 = vmatpush.bf16.msra.mxu3 %v8276_v51 }
 0x493   : > { %5362 = vmatmul.bf16.gmra.mxu2 %v10917_v63  ;;  %v11454_v14 = vpop.f32.mrf.mxu3 }
 0x499   : > { %5386 = vmatmul.bf16.gmra.mxu3 %v10965_v46 }
 0x49b   : > { %5333 = vmatmul.bf16.gmra.mxu1 %v10977_v47 }
 0x4a3   : > { %5367 = vmatmul.bf16.gmra.mxu2 %v11135_v38 }
 0x4a9   : > { %5391 = vmatmul.bf16.gmra.mxu3 %v11198_v28 }
 0x4ab   : > { %5338 = vmatmul.bf16.gmra.mxu1 %v11225_v3 }
 0x4b3   : > { %5632 = vmatmul.bf16.vlgmr.msra.gmra.mxu2 %v10725_v59  ;;  %v11461_v59 = vld [vmem:[%s12079_s8 + $0x30] sm:$0xff] }
 0x4b4   : > { %6345 = vmatpush.bf16.msrb.mxu0 %v11461_v59 }
 0x4b9   : > { %5396 = vmatmul.bf16.gmra.mxu3 %v11322_v15 }
 0x4bb   : > { %5603 = vmatmul.bf16.vlgmr.msra.gmra.mxu1 %v10771_v5 }
 0x4c3   : > { %5637 = vmatmul.bf16.gmra.mxu2 %v10917_v63 }
 0x4c5   : > { %v5132_v31 = vpop.f32.mrf.mxu2 }
 0x4c9   : > { %v5103_v45 = vpop.f32.mrf.mxu1  ;;  %5661 = vmatmul.bf16.vlgmr.msra.gmra.mxu3 %v10965_v46 }
 0x4ca   : > { %v5133_v34 = vadd.f32 %v5132_v31, %v5103_v45 }
 0x4cb   : > { %5608 = vmatmul.bf16.gmra.mxu1 %v10977_v47 }
 0x4cc   : > { %v5156_v32 = vpop.f32.mrf.mxu3 }
 0x4cd   : > { %v5157_v5 = vadd.f32 %v5156_v32, %v5128_v2  ;;  %v11468_v63 = vpop.f32.mrf.mxu2 }
 0x4d1   : > { %v11470_v46 = vpop.f32.mrf.mxu1 }
 0x4d3   : > { %5642 = vmatmul.bf16.gmra.mxu2 %v11135_v38  ;;  %v11480_v38 = vld [vmem:[%s12079_s8 + $0x28] sm:$0xff] }
 0x4d4   : > { %v11474_v35 = vpop.f32.mrf.mxu3  ;;  %6346 = vmatpush.bf16.msrb.mxu0 %v11480_v38 }
 0x4d8   : > { %6347 = vmatpush.bf16.msrb.mxu0 %v11500_v33 }
 0x4d9   : > { %5666 = vmatmul.bf16.gmra.mxu3 %v11198_v28 }
 0x4db   : > { %5613 = vmatmul.bf16.gmra.mxu1 %v11225_v3 }
 0x4e3   : > { %7766 = vmatmul.msk.bf16.gmra.mxu2 %vm4391_vm5, %v11305_v49 }
 0x4e6   : > { %v5137_v20 = vpop.f32.mrf.mxu2 }
 0x4e8   : > { %v5108_v47 = vpop.f32.mrf.mxu1 }
 0x4e9   : > { %v5138_v26 = vadd.f32 %v5137_v20, %v5108_v47  ;;  %5671 = vmatmul.bf16.gmra.mxu3 %v11322_v15 }
 0x4eb   : > { %5618 = vmatmul.bf16.gmra.mxu1 %v11329_v60 }
 0x4ec   : > { %v5161_v28 = vpop.f32.mrf.mxu3 }
 0x4ed   : > { %v5162_v3 = vadd.f32 %v5161_v28, %v5133_v34  ;;  %v8313_v28 = vld [vmem:[%s12079_s8 + $0xe8] sm:$0xff] }
 0x4ee   : > { %v11484_v25 = vpop.f32.mrf.mxu2 }
 0x4f0   : > { %v11486_v49 = vpop.f32.mrf.mxu1 }
 0x4f4   : > { %v11488_v9 = vpop.f32.mrf.mxu3 }
 0x4f6   : > { %v5353_v22 = vpop.f32.mrf.mxu2 }
 0x4f8   : > { %v5324_v10 = vpop.f32.mrf.mxu1 }
 0x4f9   : > { %v5325_v15 = vadd.f32 %v5324_v10, %v5152_v12  ;;  %5676 = vmatmul.bf16.gmra.mxu3 %v11356_v44 }
 0x4fb   : > { %v5354_v39 = vadd.f32 %v5353_v22, %v5325_v15  ;;  %v11534_v15 = vld [vmem:[%s12079_s8 + $0x18] sm:$0xff] }
 0x4fc   : > { %v5166_v48 = vpop.f32.mrf.mxu3  ;;  %6348 = vmatpush.bf16.msrb.mxu0 %v11534_v15 }
 0x4fd   : > { %v5167_v6 = vadd.f32 %v5166_v48, %v5138_v26  ;;  %v8323_v26 = vld [vmem:[%s12079_s8 + $0x138] sm:$0xff] }
 0x4fe   : > { %v11491_v21 = vpop.f32.mrf.mxu2  ;;  %6142 = vmatpush.bf16.msrb.mxu2 %v8323_v26  ;;  %v11568_v26 = vld [vmem:[%s12079_s8 + $0x8] sm:$0xff] }
 0x500   : > { %v11493_v60 = vpop.f32.mrf.mxu1  ;;  %6349 = vmatpush.bf16.msrb.mxu0 %v11554_v0 }
 0x504   : > { %v11495_v1 = vpop.f32.mrf.mxu3  ;;  %6350 = vmatpush.bf16.msrb.mxu0 %v11568_v26 }
 0x506   : > { %v5358_v43 = vpop.f32.mrf.mxu2 }
 0x508   : > { %v5329_v2 = vpop.f32.mrf.mxu1 }
 0x509   : > { %v5330_v4 = vadd.f32 %v5329_v2, %v5157_v5  ;;  %v8314_v5 = vld [vmem:[%s12079_s8 + $0xf0] sm:$0xff] }
 0x50a   : > { %6114 = vmatpush.bf16.msrb.mxu1 %v8314_v5 }
 0x50b   : > { %v5359_v37 = vadd.f32 %v5358_v43, %v5330_v4 }
 0x50c   : > { %v5382_v44 = vpop.f32.mrf.mxu3 }
 0x50d   : > { %v11503_v8 = vadd.f32 %v5382_v44, %v5354_v39  ;;  %v8321_v44 = vld [vmem:[%s12079_s8 + $0x128] sm:$0xff] }
 0x50e   : > { %v11505_v12 = vpop.f32.mrf.mxu2  ;;  %6115 = vmatpush.bf16.msrb.mxu1 %v8313_v28  ;;  %v8331_v28 = vld [vmem:[%s12079_s8 + $0x178] sm:$0xff] }
 0x50f   : > { %6171 = vmatpush.bf16.msrb.mxu3 %v8331_v28  ;;  %v8310_v28 = vld [vmem:[%s12079_s8 + $0xd0] sm:$0xff] }
 0x510   : > { %v11507_v62 = vpop.f32.mrf.mxu1 }
 0x514   : > { %v11509_v58 = vpop.f32.mrf.mxu3 }
 0x516   : > { %v5363_v56 = vpop.f32.mrf.mxu2 }
 0x518   : > { %v5334_v54 = vpop.f32.mrf.mxu1 }
 0x519   : > { %v5335_v51 = vadd.f32 %v5334_v54, %v5162_v3 }
 0x51b   : > { %v5364_v31 = vadd.f32 %v5363_v56, %v5335_v51  ;;  %v8320_v51 = vld [vmem:[%s12079_s8 + $0x120] sm:$0xff] }
 0x51c   : > { %v5387_v45 = vpop.f32.mrf.mxu3 }
 0x51d   : > { %v11514_v34 = vadd.f32 %v5387_v45, %v5359_v37  ;;  %v8322_v37 = vld [vmem:[%s12079_s8 + $0x130] sm:$0xff]  ;;  %v8312_v45 = vld [vmem:[%s12079_s8 + $0xe0] sm:$0xff] }
 0x51e   : > { %v11516_v32 = vpop.f32.mrf.mxu2  ;;  %6143 = vmatpush.bf16.msrb.mxu2 %v8322_v37  ;;  %6116 = vmatpush.bf16.msrb.mxu1 %v8312_v45  ;;  %v8330_v45 = vld [vmem:[%s12079_s8 + $0x170] sm:$0xff] }
 0x51f   : > { %6172 = vmatpush.bf16.msrb.mxu3 %v8330_v45 }
 0x520   : > { %v11521_v20 = vpop.f32.mrf.mxu1 }
 0x522   : > { %6144 = vmatpush.bf16.msrb.mxu2 %v8321_v44 }
 0x524   : > { %v11523_v47 = vpop.f32.mrf.mxu3 }
 0x526   : > { %v5368_v3 = vpop.f32.mrf.mxu2  ;;  %6145 = vmatpush.bf16.msrb.mxu2 %v8320_v51  ;;  %v8347_v51 = vld [vmem:[%s12079_s8 + $0x1f8] sm:$0xff] }
 0x528   : > { %v5339_v22 = vpop.f32.mrf.mxu1 }
 0x529   : > { %v5340_v10 = vadd.f32 %v5339_v22, %v5167_v6  ;;  %v8319_v22 = vld [vmem:[%s12079_s8 + $0x118] sm:$0xff] }
 0x52a   : > { %6146 = vmatpush.bf16.msrb.mxu2 %v8319_v22  ;;  %v5125_v22 = vadd.f32 %v11388_v42, %v11390_v40  ;;  %v8329_v42 = vld [vmem:[%s12079_s8 + $0x168] sm:$0xff] }
 0x52b   : > { %v5369_v39 = vadd.f32 %v5368_v3, %v5340_v10  ;;  %v8311_v3 = vld [vmem:[%s12079_s8 + $0xd8] sm:$0xff]  ;;  %v11583_v10 = vld [vmem:[%s12079_s8] sm:$0xff]  ;;  %v8345_v40 = vld [vmem:[%s12079_s8 + $0x1e8] sm:$0xff]  ;;  %6173 = vmatpush.bf16.msrb.mxu3 %v8329_v42 }
 0x52c   : > { %v5392_v48 = vpop.f32.mrf.mxu3  ;;  %6117 = vmatpush.bf16.msrb.mxu1 %v8311_v3  ;;  %6351 = vmatpush.bf16.msrb.mxu0 %v11583_v10  ;;  %v8346_v3 = vld [vmem:[%s12079_s8 + $0x1f0] sm:$0xff]  ;;  %v5154_v55 = vadd.f32 %v11454_v14, %v5125_v22 }
 0x52d   : > { %v11537_v43 = vadd.f32 %v5392_v48, %v5364_v31  ;;  %v8318_v48 = vld [vmem:[%s12079_s8 + $0x110] sm:$0xff] }
 0x52e   : > { %v11541_v4 = vpop.f32.mrf.mxu2  ;;  %6147 = vmatpush.bf16.msrb.mxu2 %v8318_v48  ;;  %v5327_v14 = vadd.f32 %v11493_v60, %v5154_v55  ;;  %v8344_v55 = vld [vmem:[%s12079_s8 + $0x1e0] sm:$0xff] }
 0x530   : > { %v11539_v2 = vpop.f32.mrf.mxu1  ;;  %6653 = vmatpush.bf16.msra.mxu0 %v8347_v51  ;;  %6118 = vmatpush.bf16.msrb.mxu1 %v8310_v28  ;;  %v8316_v51 = vld [vmem:[%s12079_s8 + $0x100] sm:$0xff] }
 0x531   : > { %v8328_v28 = vld [vmem:[%s12079_s8 + $0x160] sm:$0xff] }
 0x532   : > { %6174 = vmatpush.bf16.msrb.mxu3 %v8328_v28 }
 0x534   : > { %v11546_v6 = vpop.f32.mrf.mxu3  ;;  %6654 = vmatpush.bf16.msra.mxu0 %v8346_v3  ;;  %v8308_v3 = vld [vmem:[%s12079_s8 + $0xc0] sm:$0xff] }
 0x536   : > { %v5633_v54 = vpop.f32.mrf.mxu2 }
 0x538   : > { %v5604_v56 = vpop.f32.mrf.mxu1  ;;  %6655 = vmatpush.bf16.msra.mxu0 %v8345_v40 }
 0x539   : > { %v5634_v48 = vadd.f32 %v5633_v54, %v5604_v56  ;;  %v8309_v54 = vld [vmem:[%s12079_s8 + $0xc8] sm:$0xff] }
 0x53a   : > { %6119 = vmatpush.bf16.msrb.mxu1 %v8309_v54  ;;  %v5130_v54 = vadd.f32 %v11450_v57, %v11452_v50  ;;  %v8325_v57 = vld [vmem:[%s12079_s8 + $0x148] sm:$0xff] }
 0x53c   : > { %v5397_v31 = vpop.f32.mrf.mxu3  ;;  %6656 = vmatpush.bf16.msra.mxu0 %v8344_v55  ;;  %v5159_v55 = vadd.f32 %v11474_v35, %v5130_v54 }
 0x53d   : > { %v11563_v5 = vadd.f32 %v5397_v31, %v5369_v39  ;;  %v8317_v31 = vld [vmem:[%s12079_s8 + $0x108] sm:$0xff] }
 0x53e   : > { %v5635_v44 = vpop.f32.mrf.mxu2  ;;  %6148 = vmatpush.bf16.msrb.mxu2 %v8317_v31  ;;  %6120 = vmatpush.bf16.msrb.mxu1 %v8308_v3  ;;  %v5332_v50 = vadd.f32 %v11507_v62, %v5159_v55 }
 0x540   : > { %v5606_v39 = vpop.f32.mrf.mxu1 }
 0x541   : > { %v5636_v60 = vadd.f32 %v5635_v44, %v5606_v39 }
 0x542   : > { %6149 = vmatpush.bf16.msrb.mxu2 %v8316_v51 }
 0x544   : > { %v11589_v37 = vpop.f32.mrf.mxu3 }
 0x546   : > { %8356 = vmatpush.bf16.msra.mxu2 %v11443_v61  ;;  %v5638_v56 = vpop.f32.mrf.mxu2  ;;  %v5356_v61 = vadd.f32 %v11491_v21, %v5327_v14  ;;  %v8343_v21 = vld [vmem:[%s12079_s8 + $0x1d8] sm:$0xff]  ;;  %v8326_v14 = vld [vmem:[%s12079_s8 + $0x150] sm:$0xff] }
 0x547   : > { %6657 = vmatpush.bf16.msra.mxu0 %v8343_v21 }
 0x548   : > { %v5609_v11 = vpop.f32.mrf.mxu1 }
 0x54a   : > { %8357 = vmatpush.bf16.msra.mxu2 %v11461_v59  ;;  %v8327_v59 = vld [vmem:[%s12079_s8 + $0x158] sm:$0xff] }
 0x54b   : > { %6175 = vmatpush.bf16.msrb.mxu3 %v8327_v59 }
 0x54c   : > { %v5662_v30 = vpop.f32.mrf.mxu3 }
 0x54d   : > { %v5663_v31 = vadd.f32 %v5662_v30, %v5634_v48  ;;  %v5385_v48 = vadd.f32 %v11509_v58, %v5356_v61 }
 0x54e   : > { %8358 = vmatpush.bf16.msra.mxu2 %v11480_v38  ;;  %v5640_v58 = vpop.f32.mrf.mxu2  ;;  %v5639_v38 = vadd.f32 %v5638_v56, %v5609_v11  ;;  %v8341_v11 = vld [vmem:[%s12079_s8 + $0x1c8] sm:$0xff] }
 0x54f   : > { %v5682_v30 = vadd.f32 %v5663_v31, %v11503_v8  ;;  %6176 = vmatpush.bf16.msrb.mxu3 %v8326_v14 }
 0x550   : > { %v5611_v44 = vpop.f32.mrf.mxu1 }
 0x551   : > { %v5694_v45 = vadd.f32 %v11615_v41, %v5682_v30  ;;  %v8342_v30 = vld [vmem:[%s12079_s8 + $0x1d0] sm:$0xff]  ;;  %v5641_v21 = vadd.f32 %v5640_v58, %v5611_v44  ;;  %v5135_v58 = vadd.f32 %v11468_v63, %v11470_v46 }
 0x552   : > { %8359 = vmatpush.bf16.msra.mxu2 %v11500_v33  ;;  %6658 = vmatpush.bf16.msra.mxu0 %v8342_v30 }
 0x553   : > { %v5702_v8 = vmax.f32 %v5694_v45, 0.0  ;;  %6177 = vmatpush.bf16.msrb.mxu3 %v8325_v57 }
 0x554   : > { %v5664_v22 = vpop.f32.mrf.mxu3 }
 0x555   : > { %v5710_v51 = vpack.c.bf16 %v5702_v8, %v5702_v8  ;;  %v5665_v31 = vadd.f32 %v5664_v22, %v5636_v60  ;;  %v8299_v22 = vld [vmem:[%s12079_s8 + $0x78] sm:$0xff] }
 0x556   : > { %8360 = vmatpush.bf16.msra.mxu2 %v11534_v15  ;;  %6659 = vmatpush.bf16.msra.mxu0 %v8341_v11  ;;  %v8324_v15 = vld [vmem:[%s12079_s8 + $0x140] sm:$0xff] }
 0x557   : > { %v5726_v39 = vunpack.c.l.b16 %v5710_v51  ;;  %v5683_v42 = vadd.f32 %v5665_v31, %v5385_v48  ;;  %6373 = vmatpush.bf16.msra.mxu1 %v8299_v22  ;;  %v5361_v31 = vadd.f32 %v11505_v12, %v5332_v50  ;;  %6178 = vmatpush.bf16.msrb.mxu3 %v8324_v15  ;;  %v5164_v50 = vadd.f32 %v11488_v9, %v5135_v58 }
 0x558   : > { %v5614_v62 = vpop.f32.mrf.mxu1 }
 0x559   : > { %v11649_v40 = vpack.c.b16 %v5726_v39, %v5726_v39  ;;  %v5695_v28 = vadd.f32 %v11615_v41, %v5683_v42  ;;  %v5643_v42 = vpop.f32.mrf.mxu2 }
 0x55a   : > { %8361 = vmatpush.bf16.msra.mxu2 %v11554_v0 }
 0x55b   : > { %v11662_v45 = vsel %vm4391_vm5, 0, %v11649_v40  ;;  %v5703_v56 = vmax.f32 %v5695_v28, 0.0  ;;  %6374 = vmatpush.bf16.msra.mxu1 %v8298_v17  ;;  %6624 = vmatpush.bf16.msra.mxu3 %v8339_v13 }
 0x55c   : > { %v5748_v61 = vshrl.u32 %v11662_v45, 16  ;;  %v5667_v60 = vpop.f32.mrf.mxu3  ;;  %v5751_v35 = vshll.u32 %v11662_v45, 16 }
 0x55d   : > { %v5668_v8 = vadd.f32 %v5667_v60, %v5639_v38  ;;  %v5711_v39 = vpack.c.bf16 %v5703_v56, %v5703_v56  ;;  %v5390_v38 = vadd.f32 %v11523_v47, %v5361_v31  ;;  %v5644_v60 = vadd.f32 %v5643_v42, %v5614_v62  ;;  %v8297_v31 = vld [vmem:[%s12079_s8 + $0x68] sm:$0xff] }
 0x55e   : > { %v5750_v33 = vrot.slane %v5748_v61, 7  ;;  %8362 = vmatpush.bf16.msra.mxu2 %v11568_v26  ;;  %v5933_v26 = vrot.slane %v11662_v45, 4 }
 0x55f   : > { %v5684_v3 = vadd.f32 %v5668_v8, %v11514_v34  ;;  %v8340_v34 = vld [vmem:[%s12079_s8 + $0x1c0] sm:$0xff]  ;;  %v5727_v19 = vunpack.c.l.b16 %v5711_v39  ;;  %6375 = vmatpush.bf16.msra.mxu1 %v8297_v31 }
 0x560   : > { %v5753_v48 = vor.u32 %v5751_v35, %v5750_v33  ;;  %6660 = vmatpush.bf16.msra.mxu0 %v8340_v34  ;;  %v5616_v47 = vpop.f32.mrf.mxu1 }
 0x561   : > { %v5696_v51 = vadd.f32 %v11615_v41, %v5684_v3  ;;  %v5645_v3 = vpop.f32.mrf.mxu2 }
 0x562   : > { %v5790_v59 = vsel %vm12570_vm7, 0, %v5753_v48  ;;  %8363 = vmatpush.bf16.msra.mxu2 %v11583_v10  ;;  %v5337_v48 = vadd.f32 %v11521_v20, %v5164_v50  ;;  %vm12660_vm7 = vmmov %vm12655_vm12 }
 0x563   : > { %v5704_v14 = vmax.f32 %v5696_v51, 0.0  ;;  %v5811_v30 = vsel %vm10753_vm6, %v5790_v59, 0 }
 0x564   : > { %v5669_v54 = vpop.f32.mrf.mxu3  ;;  %6352 = vmatmul.bf16.vlgmr.msrb.gmra.mxu0 %v5811_v30  ;;  %v5366_v59 = vadd.f32 %v11516_v32, %v5337_v48  ;;  %v5930_v42 = vrot.slane %v5811_v30, 4 }
 0x565   : > { %v5712_v28 = vpack.c.bf16 %v5704_v14, %v5704_v14  ;;  %v5670_v55 = vadd.f32 %v5669_v54, %v5641_v21  ;;  %v5646_v21 = vadd.f32 %v5645_v3, %v5616_v47  ;;  %v5791_v54 = vrot.slane %v5751_v35, 1 }
 0x566   : > { %v5395_v32 = vadd.f32 %v11546_v6, %v5366_v59  ;;  %v8338_v6 = vld [vmem:[%s12079_s8 + $0x1b0] sm:$0xff] }
 0x567   : > { %v5728_v12 = vunpack.c.l.b16 %v5712_v28  ;;  %v5685_v0 = vadd.f32 %v5670_v55, %v5390_v38  ;;  %v5792_v47 = vor.u32 %v5791_v54, %v5748_v61  ;;  %6625 = vmatpush.bf16.msra.mxu3 %v8338_v6 }
 0x568   : > { %v5619_v30 = vpop.f32.mrf.mxu1 }
 0x569   : > { %v11699_v44 = vpack.c.b16 %v5728_v12, %v5727_v19  ;;  %v5697_v8 = vadd.f32 %v11615_v41, %v5685_v0  ;;  %v5648_v0 = vpop.f32.mrf.mxu2 }
 0x56a   : > { %v5649_v50 = vadd.f32 %v5648_v0, %v5619_v30  ;;  %v8293_v0 = vld [vmem:[%s12079_s8 + $0x48] sm:$0xff] }
 0x56b   : > { %v5934_v57 = vrot.slane %v11699_v44, 4  ;;  %v5755_v11 = vshrl.u32 %v11699_v44, 16  ;;  %v5758_v10 = vshll.u32 %v11699_v44, 16  ;;  %v5705_v62 = vmax.f32 %v5697_v8, 0.0 }
 0x56c   : > { %v5672_v56 = vpop.f32.mrf.mxu3 }
 0x56d   : > { %v5673_v22 = vadd.f32 %v5672_v56, %v5644_v60  ;;  %v5935_v63 = vsel %vm4391_vm5, %v5933_v26, %v5934_v57  ;;  %v11713_v46 = vrot.slane %v5755_v11, 7  ;;  %v5713_v39 = vpack.c.bf16 %v5705_v62, %v5705_v62  ;;  %v8295_v60 = vld [vmem:[%s12079_s8 + $0x58] sm:$0xff] }
 0x56e   : > { %6150 = vmatmul.bf16.vlgmr.msrb.gmra.mxu2 %v5935_v63  ;;  %v5793_v12 = vrot.slane %v5758_v10, 1  ;;  %v5140_v26 = vadd.f32 %v11484_v25, %v11486_v49 }
 0x56f   : > { %v5686_v51 = vadd.f32 %v5673_v22, %v11537_v43  ;;  %v5760_v15 = vor.u32 %v5758_v10, %v11713_v46  ;;  %v5729_v35 = vunpack.c.l.b16 %v5713_v39 }
 0x570   : > { %v5169_v45 = vadd.f32 %v11495_v1, %v5140_v26  ;;  %v5795_v48 = vor.u32 %v5793_v12, %v5755_v11  ;;  %v5621_v31 = vpop.f32.mrf.mxu1 }
 0x571   : > { %v5698_v34 = vadd.f32 %v11615_v41, %v5686_v51  ;;  %v5761_v9 = vsel %vm12660_vm7, %v5750_v33, %v5760_v15  ;;  %v8296_v33 = vld [vmem:[%s12079_s8 + $0x60] sm:$0xff]  ;;  %v5650_v24 = vpop.f32.mrf.mxu2 }
 0x572   : > { %v11727_v20 = vsel %vm10648_vm10, %v5761_v9, 0  ;;  %6376 = vmatpush.bf16.msra.mxu1 %v8296_v33  ;;  %vm12661_vm10 = vmmov %vm12654_vm13  ;;  %v5342_v51 = vadd.f32 %v11539_v2, %v5169_v45  ;;  %v8294_v9 = vld [vmem:[%s12079_s8 + $0x50] sm:$0xff]  ;;  %v5651_v33 = vadd.f32 %v5650_v24, %v5621_v31  ;;  %v8307_v45 = vld [vmem:[%s12079_s8 + $0xb8] sm:$0xff] }
 0x573   : > { %v5706_v43 = vmax.f32 %v5698_v34, 0.0  ;;  %v5931_v14 = vrot.slane %v11727_v20, 4  ;;  %v5794_v56 = vsel %vm12661_vm10, %v5792_v47, %v5793_v12  ;;  %vm12662_vm6 = vmmov %vm12661_vm10  ;;  %6402 = vmatpush.bf16.msrb.mxu2 %v8307_v45 }
 0x574   : > { %v5674_v38 = vpop.f32.mrf.mxu3  ;;  %6357 = vmatmul.bf16.gmra.mxu0 %v11727_v20  ;;  %v11765_v15 = vsel %vm10927_vm3, %v5794_v56, 0  ;;  %vm12663_vm3 = vmmov %vm12660_vm7 }
 0x575   : > { %v5714_v28 = vpack.c.bf16 %v5706_v43, %v5706_v43  ;;  %v5675_v55 = vadd.f32 %v5674_v38, %v5646_v21  ;;  %v5932_v19 = vsel %vm4391_vm5, %v5930_v42, %v5931_v14  ;;  %v5936_v39 = vrot.slane %v11765_v15, 4 }
 0x576   : > { %6121 = vmatmul.bf16.vlgmr.msrb.gmra.mxu1 %v5932_v19  ;;  %v5371_v43 = vadd.f32 %v11541_v4, %v5342_v51  ;;  %v8337_v4 = vld [vmem:[%s12079_s8 + $0x1a8] sm:$0xff]  ;;  %v8306_v51 = vld [vmem:[%s12079_s8 + $0xb0] sm:$0xff] }
 0x577   : > { %v5730_v17 = vunpack.c.l.b16 %v5714_v28  ;;  %v5687_v58 = vadd.f32 %v5675_v55, %v5395_v32  ;;  %6377 = vmatpush.bf16.msra.mxu1 %v8295_v60  ;;  %6626 = vmatpush.bf16.msra.mxu3 %v8337_v4 }
 0x578   : > { %6403 = vmatpush.bf16.msrb.mxu2 %v8306_v51 }
 0x579   : > { %v11751_v8 = vpack.c.b16 %v5730_v17, %v5729_v35  ;;  %v5699_v3 = vadd.f32 %v11615_v41, %v5687_v58  ;;  %v8336_v17 = vld [vmem:[%s12079_s8 + $0x1a0] sm:$0xff] }
 0x57b   : > { %v5941_v22 = vrot.slane %v11751_v8, 4  ;;  %v5766_v63 = vshll.u32 %v11751_v8, 16  ;;  %v5763_v10 = vshrl.u32 %v11751_v8, 16  ;;  %v5707_v1 = vmax.f32 %v5699_v3, 0.0  ;;  %6378 = vmatpush.bf16.msra.mxu1 %v8294_v9  ;;  %6627 = vmatpush.bf16.msra.mxu3 %v8336_v17 }
 0x57c   : > { %v5677_v61 = vpop.f32.mrf.mxu3 }
 0x57d   : > { %v5678_v62 = vadd.f32 %v5677_v61, %v5649_v50  ;;  %v5942_v25 = vsel %vm4391_vm5, %v5934_v57, %v5941_v22  ;;  %v5796_v49 = vrot.slane %v5766_v63, 1  ;;  %v5765_v34 = vrot.slane %v5763_v10, 7 }
 0x57e   : > { %6155 = vmatmul.bf16.gmra.mxu2 %v5942_v25  ;;  %v5715_v54 = vpack.c.bf16 %v5707_v1, %v5707_v1 }
 0x57f   : > { %v5688_v11 = vadd.f32 %v5678_v62, %v11563_v5  ;;  %v5797_v59 = vsel %vm12662_vm6, %v5795_v48, %v5796_v49  ;;  %v5768_v2 = vor.u32 %v5766_v63, %v5765_v34  ;;  %6379 = vmatpush.bf16.msra.mxu1 %v8293_v0  ;;  %v5798_v26 = vor.u32 %v5796_v49, %v5763_v10 }
 0x580   : > { %v11774_v57 = vsel %vm10862_vm15, %v5797_v59, 0  ;;  %v5731_v19 = vunpack.c.l.b16 %v5715_v54  ;;  %vm12664_vm15 = vmmov %vm12662_vm6  ;;  %v8335_v59 = vld [vmem:[%s12079_s8 + $0x198] sm:$0xff] }
 0x581   : > { %v5700_v21 = vadd.f32 %v11615_v41, %v5688_v11  ;;  %v5937_v42 = vrot.slane %v11774_v57, 4  ;;  %v5769_v5 = vsel %vm12663_vm3, %v11713_v46, %v5768_v2  ;;  %v5400_v46 = vadd.f32 %v11589_v37, %v5371_v43  ;;  %6628 = vmatpush.bf16.msra.mxu3 %v8335_v59  ;;  %v8334_v43 = vld [vmem:[%s12079_s8 + $0x190] sm:$0xff] }
 0x582   : > { %v11785_v13 = vsel %vm10871_vm9, %v5769_v5, 0  ;;  %vm12665_vm9 = vmmov %vm12663_vm3 }
 0x583   : > { %v5708_v38 = vmax.f32 %v5700_v21, 0.0  ;;  %v5938_v16 = vsel %vm4391_vm5, %v5936_v39, %v5937_v42  ;;  %v5939_v30 = vrot.slane %v11785_v13, 4  ;;  %v8355_v39 = vld [vmem:[%s12079_s8 + $0x238] sm:$0xff] }
 0x584   : > { %v5679_v32 = vpop.f32.mrf.mxu3  ;;  %6179 = vmatmul.bf16.vlgmr.msrb.gmra.mxu3 %v5938_v16  ;;  %6661 = vmatmul.bf16.vlgmr.msra.gmra.mxu0 %v11699_v44  ;;  %v8333_v16 = vld [vmem:[%s12079_s8 + $0x188] sm:$0xff] }
 0x585   : > { %v5716_v28 = vpack.c.bf16 %v5708_v38, %v5708_v38  ;;  %v5680_v55 = vadd.f32 %v5679_v32, %v5651_v33  ;;  %v5940_v36 = vsel %vm4391_vm5, %v5931_v14, %v5939_v30  ;;  %v8304_v38 = vld [vmem:[%s12079_s8 + $0xa0] sm:$0xff]  ;;  %6629 = vmatpush.bf16.msra.mxu3 %v8334_v43 }
 0x586   : > { %6126 = vmatmul.bf16.gmra.mxu1 %v5940_v36 }
 0x587   : > { %v5732_v12 = vunpack.c.l.b16 %v5716_v28  ;;  %v5689_v35 = vadd.f32 %v5680_v55, %v5400_v46  ;;  %v8354_v46 = vld [vmem:[%s12079_s8 + $0x230] sm:$0xff]  ;;  %v8303_v28 = vld [vmem:[%s12079_s8 + $0x98] sm:$0xff] }
 0x589   : > { %v11802_v37 = vpack.c.b16 %v5732_v12, %v5731_v19  ;;  %v5701_v58 = vadd.f32 %v11615_v41, %v5689_v35  ;;  %v8292_v41 = vld [vmem:[%s12079_s8 + $0x40] sm:$0xff]  ;;  %6630 = vmatpush.bf16.msra.mxu3 %v8333_v16  ;;  %v8302_v19 = vld [vmem:[%s12079_s8 + $0x90] sm:$0xff] }
 0x58a   : > { %6380 = vmatpush.bf16.msra.mxu1 %v8292_v41 }
 0x58b   : > { %v5709_v14 = vmax.f32 %v5701_v58, 0.0  ;;  %v5947_v60 = vrot.slane %v11802_v37, 4  ;;  %v5774_v6 = vshll.u32 %v11802_v37, 16  ;;  %v5771_v47 = vshrl.u32 %v11802_v37, 16  ;;  %v8301_v58 = vld [vmem:[%s12079_s8 + $0x88] sm:$0xff] }
 0x58d   : > { %v5717_v50 = vpack.c.bf16 %v5709_v14, %v5709_v14  ;;  %v5948_v56 = vsel %vm4391_vm5, %v5941_v22, %v5947_v60  ;;  %v5799_v3 = vrot.slane %v5774_v6, 1  ;;  %v5773_v63 = vrot.slane %v5771_v47, 7  ;;  %6631 = vmatpush.bf16.msra.mxu3 %v8332_v27 }
 0x58e   : > { %6160 = vmatmul.bf16.gmra.mxu2 %v5948_v56  ;;  %6682 = vmatpush.bf16.msrb.mxu1 %v8355_v39 }
 0x58f   : > { %v5733_v61 = vunpack.c.l.b16 %v5717_v50  ;;  %v5800_v48 = vsel %vm12664_vm15, %v5798_v26, %v5799_v3  ;;  %v5776_v62 = vor.u32 %v5774_v6, %v5773_v63  ;;  %v5801_v21 = vor.u32 %v5799_v3, %v5771_v47  ;;  %v8352_v47 = vld [vmem:[%s12079_s8 + $0x220] sm:$0xff]  ;;  %v8350_v50 = vld [vmem:[%s12079_s8 + $0x210] sm:$0xff] }
 0x590   : > { %v11818_v10 = vsel %vm11060_vm11, %v5800_v48, 0  ;;  %vm12666_vm11 = vmmov %vm12662_vm6 }
 0x591   : > { %v11820_v22 = vpack.c.b16 %v5733_v61, %v5733_v61  ;;  %v5943_v25 = vrot.slane %v11818_v10, 4  ;;  %v5777_v49 = vsel %vm12665_vm9, %v5765_v34, %v5776_v62  ;;  %8364 = vmatpush.bf16.msrb.mxu3 %v8355_v39 }
 0x592   : > { %v11829_v9 = vsel %vm11067_vm4, %v5777_v49, 0  ;;  %vm12667_vm4 = vmmov %vm12663_vm3  ;;  %6683 = vmatpush.bf16.msrb.mxu1 %v8354_v46 }
 0x593   : > { %v5944_v52 = vsel %vm4391_vm5, %v5937_v42, %v5943_v25  ;;  %v5945_v31 = vrot.slane %v11829_v9, 4  ;;  %v5746_v1 = vsel %vm4391_vm5, %v11820_v22, 0  ;;  %v8305_v42 = vld [vmem:[%s12079_s8 + $0xa8] sm:$0xff] }
 0x594   : > { %6184 = vmatmul.bf16.gmra.mxu3 %v5944_v52  ;;  %6666 = vmatmul.bf16.gmra.mxu0 %v11751_v8  ;;  %v5778_v11 = vshrl.u32 %v5746_v1, 16  ;;  %v5781_v34 = vshll.u32 %v5746_v1, 16  ;;  %v5953_v5 = vrot.slane %v5746_v1, 4 }
 0x595   : > { %v5946_v53 = vsel %vm4391_vm5, %v5939_v30, %v5945_v31  ;;  %6404 = vmatpush.bf16.msrb.mxu2 %v8305_v42  ;;  %8365 = vmatpush.bf16.msrb.mxu3 %v8354_v46 }
 0x596   : > { %v5780_v2 = vrot.slane %v5778_v11, 7  ;;  %v5802_v24 = vrot.slane %v5781_v34, 1  ;;  %6131 = vmatmul.bf16.gmra.mxu1 %v5946_v53  ;;  %v5954_v4 = vsel %vm4391_vm5, %v5947_v60, %v5953_v5  ;;  %v8300_v60 = vld [vmem:[%s12079_s8 + $0x80] sm:$0xff] }
 0x597   : > { %6684 = vmatpush.bf16.msrb.mxu1 %v8353_v29 }
 0x598   : > { %v5783_v33 = vor.u32 %v5781_v34, %v5780_v2  ;;  %v5803_v54 = vsel %vm12666_vm11, %v5801_v21, %v5802_v24  ;;  %v5804_v0 = vor.u32 %v5802_v24, %v5778_v11 }
 0x599   : > { %v11858_v32 = vsel %vm11233_vm8, %v5803_v54, 0  ;;  %6405 = vmatpush.bf16.msrb.mxu2 %v8304_v38  ;;  %8366 = vmatpush.bf16.msrb.mxu3 %v8353_v29 }
 0x59a   : > { %v5784_v30 = vsel %vm12667_vm4, %v5773_v63, %v5783_v33  ;;  %v5949_v55 = vrot.slane %v11858_v32, 4  ;;  %v5810_v14 = vsel %vm12657_vm14, %v5804_v0, 0 }
 0x59b   : > { %v5815_v36 = vsel %vm11269_vm1, %v5784_v30, 0  ;;  %v5820_v6 = vsel %vm11291_vm0, %v5810_v14, 0  ;;  %6685 = vmatpush.bf16.msrb.mxu1 %v8352_v47 }
 0x59c   : > { %v5951_v12 = vrot.slane %v5815_v36, 4  ;;  %v5950_v35 = vsel %vm4391_vm5, %v5943_v25, %v5949_v55  ;;  %v5955_v26 = vrot.slane %v5820_v6, 4 }
 0x59d   : > { %6406 = vmatpush.bf16.msrb.mxu2 %v8303_v28  ;;  %8367 = vmatpush.bf16.msrb.mxu3 %v8352_v47 }
 0x59e   : > { %6165 = vmatmul.bf16.gmra.mxu2 %v5954_v4  ;;  %v5952_v17 = vsel %vm4391_vm5, %v5945_v31, %v5951_v12  ;;  %v5956_v23 = vsel %vm4391_vm5, %v5949_v55, %v5955_v26 }
 0x59f   : > { %6686 = vmatpush.bf16.msrb.mxu1 %v8351_v7 }
 0x5a1   : > { %6407 = vmatpush.bf16.msrb.mxu2 %v8302_v19  ;;  %8368 = vmatpush.bf16.msrb.mxu3 %v8351_v7 }
 0x5a3   : > { %6687 = vmatpush.bf16.msrb.mxu1 %v8350_v50 }
 0x5a4   : > { %6189 = vmatmul.bf16.gmra.mxu3 %v5950_v35  ;;  %6671 = vmatmul.bf16.gmra.mxu0 %v11802_v37 }
 0x5a5   : > { %6408 = vmatpush.bf16.msrb.mxu2 %v8301_v58  ;;  %8369 = vmatpush.bf16.msrb.mxu3 %v8350_v50 }
 0x5a6   : > { %6136 = vmatmul.bf16.gmra.mxu1 %v5952_v17 }
 0x5a7   : > { %6688 = vmatpush.bf16.msrb.mxu1 %v8349_v18 }
 0x5a9   : > { %6409 = vmatpush.bf16.msrb.mxu2 %v8300_v60  ;;  %8370 = vmatpush.bf16.msrb.mxu3 %v8349_v18 }
 0x5ae   : > { %6362 = vmatmul.bf16.vlgmr.msra.gmra.mxu2 %v11785_v13 }
 0x5b4   : > { %6194 = vmatmul.bf16.gmra.mxu3 %v5956_v23  ;;  %8153 = vmatmul.msk.bf16.gmra.mxu0 %vm4391_vm5, %v11820_v22 }
 0x5b6   : > { %8008 = vmatmul.msk.bf16.vlgmr.msra.gmra.mxu1 %vm11350_vm2, %v11649_v40  ;;  %v8348_v40 = vld [vmem:[%s12079_s8 + $0x200] sm:$0xff] }
 0x5b7   : > { %6689 = vmatpush.bf16.msrb.mxu1 %v8348_v40  ;;  %8371 = vmatpush.bf16.msrb.mxu3 %v8348_v40 }
 0x5be   : > { %6367 = vmatmul.bf16.gmra.mxu2 %v11829_v9 }
 0x5c4   : > { %6632 = vmatmul.bf16.vlgmr.msra.gmra.mxu3 %v11727_v20 }
 0x5c6   : > { %6386 = vmatmul.bf16.gmra.mxu1 %v11699_v44 }
 0x5ce   : > { %6410 = vmatmul.bf16.vlgmr.msrb.gmra.mxu2 %v11765_v15 }
 0x5d4   : > { %6637 = vmatmul.bf16.gmra.mxu3 %v11785_v13 }
 0x5d6   : > { %6391 = vmatmul.bf16.gmra.mxu1 %v11751_v8 }
 0x5de   : > { %6415 = vmatmul.bf16.gmra.mxu2 %v11774_v57 }
 0x5e1   : > { %v6353_v45 = vpop.f32.mrf.mxu0 }
 0x5e4   : > { %6642 = vmatmul.bf16.gmra.mxu3 %v11829_v9 }
 0x5e6   : > { %6396 = vmatmul.bf16.gmra.mxu1 %v11802_v37 }
 0x5e9   : > { %v6355_v51 = vpop.f32.mrf.mxu0 }
 0x5ee   : > { %6420 = vmatmul.bf16.gmra.mxu2 %v11818_v10 }
 0x5f1   : > { %v6151_v44 = vpop.f32.mrf.mxu2 }
 0x5f3   : > { %v6122_v20 = vpop.f32.mrf.mxu1 }
 0x5f4   : > { %v6152_v15 = vadd.f32 %v6151_v44, %v6122_v20  ;;  %6647 = vmatmul.bf16.gmra.mxu3 %v5815_v36  ;;  %v6358_v36 = vpop.f32.mrf.mxu0 }
 0x5f6   : > { %6690 = vmatmul.bf16.vlgmr.msrb.gmra.mxu1 %v11774_v57 }
 0x5f9   : > { %v6153_v56 = vpop.f32.mrf.mxu2 }
 0x5fb   : > { %v6124_v3 = vpop.f32.mrf.mxu1 }
 0x5fc   : > { %v6154_v63 = vadd.f32 %v6153_v56, %v6124_v3  ;;  %v6360_v60 = vpop.f32.mrf.mxu0 }
 0x5fe   : > { %6425 = vmatmul.bf16.gmra.mxu2 %v11858_v32 }
 0x601   : > { %v6156_v8 = vpop.f32.mrf.mxu2 }
 0x603   : > { %v6127_v13 = vpop.f32.mrf.mxu1 }
 0x604   : > { %6705 = vmatmul.bf16.vlgmr.msrb.gmra.mxu3 %v5820_v6  ;;  %v6157_v41 = vadd.f32 %v6156_v8, %v6127_v13  ;;  %v6662_v40 = vpop.f32.mrf.mxu0 }
 0x606   : > { %6695 = vmatmul.bf16.gmra.mxu1 %v11818_v10 }
 0x607   : > { %v6180_v37 = vpop.f32.mrf.mxu3 }
 0x608   : > { %v6181_v61 = vadd.f32 %v6180_v37, %v6152_v15 }
 0x609   : > { %v6158_v48 = vpop.f32.mrf.mxu2 }
 0x60a   : > { %v6354_v62 = vadd.f32 %v6353_v45, %v6181_v61 }
 0x60b   : > { %v6129_v22 = vpop.f32.mrf.mxu1 }
 0x60c   : > { %v6159_v25 = vadd.f32 %v6158_v48, %v6129_v22  ;;  %v6823_v22 = vld [vmem:[%s12081_s10 + $0x78] sm:$0xff] }
 0x60d   : > { %6825 = vmatpush.msra.mxu2 %v6823_v22 }
 0x60f   : > { %v6182_v49 = vpop.f32.mrf.mxu3 }
 0x610   : > { %v6183_v57 = vadd.f32 %v6182_v49, %v6154_v63  ;;  %v6664_v63 = vpop.f32.mrf.mxu0 }
 0x611   : > { %v6161_v9 = vpop.f32.mrf.mxu2 }
 0x612   : > { %v6356_v52 = vadd.f32 %v6355_v51, %v6183_v57 }
 0x613   : > { %v6132_v31 = vpop.f32.mrf.mxu1 }
 0x614   : > { %v6162_v1 = vadd.f32 %v6161_v9, %v6132_v31  ;;  %v6820_v31 = vld [vmem:[%s12081_s10 + $0x60] sm:$0xff] }
 0x616   : > { %6700 = vmatmul.bf16.gmra.mxu1 %v11858_v32 }
 0x617   : > { %v6185_v11 = vpop.f32.mrf.mxu3 }
 0x618   : > { %v6186_v34 = vadd.f32 %v6185_v11, %v6157_v41  ;;  %v6667_v37 = vpop.f32.mrf.mxu0 }
 0x619   : > { %v6163_v59 = vpop.f32.mrf.mxu2 }
 0x61a   : > { %v6359_v6 = vadd.f32 %v6358_v36, %v6186_v34 }
 0x61b   : > { %v6134_v53 = vpop.f32.mrf.mxu1 }
 0x61c   : > { %v6164_v10 = vadd.f32 %v6163_v59, %v6134_v53 }
 0x61f   : > { %v6187_v2 = vpop.f32.mrf.mxu3 }
 0x620   : > { %v6188_v24 = vadd.f32 %v6187_v2, %v6159_v25  ;;  %v6822_v25 = vld [vmem:[%s12081_s10 + $0x70] sm:$0xff]  ;;  %v6669_v49 = vpop.f32.mrf.mxu0  ;;  %v11968_v2 = vld [vmem:[%s12080_s9] ss:$0 sm:$0xff] }
 0x621   : > { %v6166_v21 = vpop.f32.mrf.mxu2  ;;  %6826 = vmatpush.msra.mxu2 %v6822_v25  ;;  %v12670_v25 = vld [vmem:[#allocation37_spill] sm:$0xff] }
 0x622   : > { %v6361_v50 = vadd.f32 %v6360_v60, %v6188_v24  ;;  %v12669_v60 = vld [vmem:[#allocation36_spill] sm:$0xff] }
 0x623   : > { %v6137_v39 = vpop.f32.mrf.mxu1 }
 0x624   : > { %v6167_v42 = vadd.f32 %v6166_v21, %v6137_v39  ;;  %v6819_v39 = vld [vmem:[%s12081_s10 + $0x58] sm:$0xff] }
 0x627   : > { %v6190_v43 = vpop.f32.mrf.mxu3 }
 0x628   : > { %v6191_v33 = vadd.f32 %v6190_v43, %v6162_v1  ;;  %v6672_v34 = vpop.f32.mrf.mxu0 }
 0x629   : > { %v6168_v5 = vpop.f32.mrf.mxu2 }
 0x62b   : > { %v6139_v54 = vpop.f32.mrf.mxu1 }
 0x62c   : > { %v6169_v38 = vadd.f32 %v6168_v5, %v6139_v54 }
 0x62f   : > { %v6192_v16 = vpop.f32.mrf.mxu3 }
 0x630   : > { %v6193_v30 = vadd.f32 %v6192_v16, %v6164_v10  ;;  %v11977_v16 = vpop.f32.mrf.mxu0 }
 0x631   : > { %v6363_v4 = vpop.f32.mrf.mxu2 }
 0x632   : > { %v6364_v46 = vadd.f32 %v6363_v4, %v6191_v33 }
 0x633   : > { %v6382_v32 = vpop.f32.mrf.mxu1 }
 0x634   : > { %v6383_v28 = vadd.f32 %v6382_v32, %v6354_v62 }
 0x637   : > { %v6195_v27 = vpop.f32.mrf.mxu3 }
 0x638   : > { %v6196_v55 = vadd.f32 %v6195_v27, %v6167_v42  ;;  %v6818_v42 = vld [vmem:[%s12081_s10 + $0x50] sm:$0xff]  ;;  %v6816_v27 = vld [vmem:[%s12081_s10 + $0x40] sm:$0xff] }
 0x639   : > { %v6365_v19 = vpop.f32.mrf.mxu2 }
 0x63a   : > { %v11929_v12 = vadd.f32 %v6365_v19, %v6193_v30  ;;  %v12668_v19 = vld [vmem:[#allocation27_spill] sm:$0xff] }
 0x63b   : > { %v6384_v35 = vpop.f32.mrf.mxu1 }
 0x63c   : > { %v6385_v0 = vadd.f32 %v6384_v35, %v6356_v52  ;;  %v6821_v52 = vld [vmem:[%s12081_s10 + $0x68] sm:$0xff] }
 0x63d   : > { %6827 = vmatpush.msra.mxu2 %v6821_v52 }
 0x63f   : > { %v6197_v17 = vpop.f32.mrf.mxu3  ;;  %6828 = vmatpush.msra.mxu2 %v6820_v31 }
 0x640   : > { %v11931_v29 = vadd.f32 %v6197_v17, %v6169_v38 }
 0x641   : > { %v6368_v58 = vpop.f32.mrf.mxu2  ;;  %6829 = vmatpush.msra.mxu2 %v6819_v39 }
 0x642   : > { %v11933_v14 = vadd.f32 %v6368_v58, %v6196_v55 }
 0x643   : > { %v6387_v47 = vpop.f32.mrf.mxu1  ;;  %6830 = vmatpush.msra.mxu2 %v6818_v42 }
 0x644   : > { %v11935_v26 = vadd.f32 %v6387_v47, %v6359_v6 }
 0x647   : > { %v6633_v23 = vpop.f32.mrf.mxu3 }
 0x648   : > { %v6663_v1 = vadd.f32 %v6662_v40, %v6633_v23  ;;  %v6677_v40 = vpop.f32.mrf.mxu0 }
 0x649   : > { %v11937_v7 = vpop.f32.mrf.mxu2 }
 0x64a   : > { %v6371_v42 = vadd.f32 %v11937_v7, %v11931_v29 }
 0x64b   : > { %v6389_v18 = vpop.f32.mrf.mxu1 }
 0x64c   : > { %v11939_v44 = vadd.f32 %v6389_v18, %v6361_v50 }
 0x64f   : > { %v6635_v20 = vpop.f32.mrf.mxu3 }
 0x650   : > { %v6665_v43 = vadd.f32 %v6664_v63, %v6635_v20 }
 0x651   : > { %v6411_v15 = vpop.f32.mrf.mxu2 }
 0x652   : > { %v6412_v59 = vadd.f32 %v6411_v15, %v6383_v28  ;;  %v6817_v28 = vld [vmem:[%s12081_s10 + $0x48] sm:$0xff] }
 0x653   : > { %v6392_v56 = vpop.f32.mrf.mxu1  ;;  %6831 = vmatpush.msra.mxu2 %v6817_v28 }
 0x654   : > { %v11941_v3 = vadd.f32 %v6392_v56, %v6364_v46 }
 0x655   : > { %6832 = vmatpush.msra.mxu2 %v6816_v27 }
 0x657   : > { %v6638_v8 = vpop.f32.mrf.mxu3 }
 0x658   : > { %v6668_v36 = vadd.f32 %v6667_v37, %v6638_v8 }
 0x659   : > { %v6413_v13 = vpop.f32.mrf.mxu2 }
 0x65a   : > { %v6414_v54 = vadd.f32 %v6413_v13, %v6385_v0 }
 0x65b   : > { %v11943_v41 = vpop.f32.mrf.mxu1 }
 0x65f   : > { %v6640_v45 = vpop.f32.mrf.mxu3 }
 0x660   : > { %v6670_v63 = vadd.f32 %v6669_v49, %v6640_v45 }
 0x661   : > { %v6416_v61 = vpop.f32.mrf.mxu2 }
 0x662   : > { %v6417_v58 = vadd.f32 %v6416_v61, %v11935_v26  ;;  %v6815_v61 = vld [vmem:[%s12081_s10 + $0x38] sm:$0xff] }
 0x663   : > { %v11945_v48 = vpop.f32.mrf.mxu1  ;;  %6833 = vmatpush.msra.mxu2 %v6815_v61 }
 0x667   : > { %v11947_v62 = vpop.f32.mrf.mxu3 }
 0x669   : > { %v6418_v51 = vpop.f32.mrf.mxu2 }
 0x66a   : > { %v6419_v22 = vadd.f32 %v6418_v51, %v11939_v44  ;;  %v6813_v44 = vld [vmem:[%s12081_s10 + $0x28] sm:$0xff]  ;;  %v6812_v51 = vld [vmem:[%s12081_s10 + $0x20] sm:$0xff] }
 0x66b   : > { %v11955_v57 = vpop.f32.mrf.mxu1 }
 0x66f   : > { %v11957_v9 = vpop.f32.mrf.mxu3 }
 0x671   : > { %v6421_v21 = vpop.f32.mrf.mxu2 }
 0x673   : > { %v6691_v11 = vpop.f32.mrf.mxu1 }
 0x674   : > { %v6692_v53 = vadd.f32 %v6691_v11, %v6663_v1  ;;  %v6814_v11 = vld [vmem:[%s12081_s10 + $0x30] sm:$0xff] }
 0x675   : > { %6834 = vmatpush.msra.mxu2 %v6814_v11 }
 0x676   : > { %v6711_v10 = vadd.f32 %v6692_v53, %v6412_v59  ;;  %v6679_v59 = vpop.f32.mrf.mxu0  ;;  %v6673_v53 = vadd.f32 %v6672_v34, %v11947_v62  ;;  %v12671_v62 = vld [vmem:[#allocation34_spill] sm:$0xff] }
 0x677   : > { %v6648_v24 = vpop.f32.mrf.mxu3  ;;  %6835 = vmatpush.msra.mxu2 %v6813_v44 }
 0x678   : > { %v6723_v33 = vadd.f32 %v11968_v2, %v6711_v10  ;;  %v6678_v10 = vadd.f32 %v6677_v40, %v6648_v24 }
 0x679   : > { %v11986_v55 = vpop.f32.mrf.mxu2  ;;  %6836 = vmatpush.msra.mxu2 %v6812_v51 }
 0x67a   : > { %v6731_v30 = vmax.f32 %v6723_v33, 0.0  ;;  %v6422_v33 = vadd.f32 %v6421_v21, %v11941_v3 }
 0x67b   : > { %v6693_v5 = vpop.f32.mrf.mxu1 }
 0x67c   : > { %v6694_v38 = vadd.f32 %v6693_v5, %v6665_v43  ;;  %v6778_v35 = vadd.f32 %v12668_v19, %v6731_v30  ;;  %v6398_v43 = vadd.f32 %v11945_v48, %v11933_v14  ;;  %v6810_v14 = vld [vmem:[%s12081_s10 + $0x10] sm:$0xff] }
 0x67e   : > { %v6712_v4 = vadd.f32 %v6694_v38, %v6414_v54  ;;  %v6786_v23 = vmax.f32 %v6778_v35, 0.0  ;;  %v6811_v38 = vld [vmem:[%s12081_s10 + $0x18] sm:$0xff]  ;;  %v6395_v35 = vadd.f32 %v11943_v41, %v11929_v12 }
 0x67f   : > { %v6650_v46 = vpop.f32.mrf.mxu3  ;;  %6837 = vmatpush.msra.mxu2 %v6811_v38 }
 0x680   : > { %v6724_v32 = vadd.f32 %v11968_v2, %v6712_v4  ;;  %v6680_v30 = vadd.f32 %v6679_v59, %v6650_v46  ;;  %v6809_v46 = vld [vmem:[%s12081_s10 + $0x8] sm:$0xff] }
 0x681   : > { %v6426_v13 = vpop.f32.mrf.mxu2  ;;  %6838 = vmatpush.msra.mxu2 %v6810_v14 }
 0x682   : > { %v6732_v0 = vmax.f32 %v6724_v32, 0.0  ;;  %v6400_v32 = vadd.f32 %v11955_v57, %v6371_v42  ;;  %v6427_v7 = vadd.f32 %v6426_v13, %v6398_v43  ;;  %v6808_v57 = vld [vmem:[%s12081_s10] sm:$0xff] }
 0x683   : > { %v6696_v17 = vpop.f32.mrf.mxu1  ;;  %6839 = vmatpush.msra.mxu2 %v6809_v46 }
 0x684   : > { %v6779_v6 = vadd.f32 %v12669_v60, %v6732_v0  ;;  %v6697_v47 = vadd.f32 %v6696_v17, %v6668_v36  ;;  %v6675_v0 = vadd.f32 %v11977_v16, %v11957_v9  ;;  %v6766_v60 = vld.sshfl [vmem:[#allocation1] sm:$0xff pattern:$0x75316420] }
 0x685   : > { %6840 = vmatpush.msra.mxu2 %v6808_v57 }
 0x686   : > { %v6787_v50 = vmax.f32 %v6779_v6, 0.0  ;;  %v6713_v18 = vadd.f32 %v6697_v47, %v6417_v58  ;;  %v6424_v47 = vadd.f32 %v11986_v55, %v6395_v35  ;;  %v6769_v55 = vld.sshfl [vmem:[#allocation1 + $0x30] sm:$0xff pattern:$0x75316420] }
 0x687   : > { %v6706_v56 = vpop.f32.mrf.mxu3 }
 0x688   : > { %v6794_v20 = vadd.f32 %v6787_v50, %v6786_v23  ;;  %v6725_v15 = vadd.f32 %v11968_v2, %v6713_v18  ;;  %v6707_v4 = vadd.f32 %v6706_v56, %v6678_v10 }
 0x689   : > { %v6428_v29 = vpop.f32.mrf.mxu2 }
 0x68a   : > { %v6733_v8 = vmax.f32 %v6725_v15, 0.0  ;;  %v6717_v28 = vadd.f32 %v6707_v4, %v6427_v7  ;;  %v6429_v27 = vadd.f32 %v6428_v29, %v6400_v32 }
 0x68b   : > { %v6698_v37 = vpop.f32.mrf.mxu1 }
 0x68c   : > { %v6780_v52 = vadd.f32 %v12670_v25, %v6733_v8  ;;  %v6699_v26 = vadd.f32 %v6698_v37, %v6670_v63  ;;  %v6729_v23 = vadd.f32 %v11968_v2, %v6717_v28  ;;  %v6768_v63 = vld.sshfl [vmem:[#allocation1 + $0x20] sm:$0xff pattern:$0x75316420]  ;;  %v6767_v8 = vld.sshfl [vmem:[#allocation1 + $0x10] sm:$0xff pattern:$0x75316420] }
 0x68e   : > { %v6788_v31 = vmax.f32 %v6780_v52, 0.0  ;;  %v6714_v1 = vadd.f32 %v6699_v26, %v6419_v22  ;;  %v6737_v12 = vmax.f32 %v6729_v23, 0.0 }
 0x68f   : > { %v6708_v5 = vpop.f32.mrf.mxu3 }
 0x690   : > { %v6795_v45 = vadd.f32 %v6794_v20, %v6788_v31  ;;  %v6726_v49 = vadd.f32 %v11968_v2, %v6714_v1  ;;  %v6709_v48 = vadd.f32 %v6708_v5, %v6680_v30  ;;  %v6784_v13 = vadd.f32 %v6768_v63, %v6737_v12 }
 0x692   : > { %v6734_v39 = vmax.f32 %v6726_v49, 0.0  ;;  %v6718_v17 = vadd.f32 %v6709_v48, %v6429_v27  ;;  %v6792_v52 = vmax.f32 %v6784_v13, 0.0 }
 0x693   : > { %v6701_v54 = vpop.f32.mrf.mxu1 }
 0x694   : > { %v6781_v34 = vadd.f32 %v12671_v62, %v6734_v39  ;;  %v6702_v24 = vadd.f32 %v6701_v54, %v6673_v53  ;;  %v6730_v40 = vadd.f32 %v11968_v2, %v6718_v17  ;;  %v6824_v53 = vld [vmem:[%s12082_s11] sm:$0x1] }
 0x696   : > { %v6789_v3 = vmax.f32 %v6781_v34, 0.0  ;;  %v6715_v21 = vadd.f32 %v6702_v24, %v6422_v33  ;;  %v6738_v16 = vmax.f32 %v6730_v40, 0.0 }
 0x698   : > { %v6796_v36 = vadd.f32 %v6795_v45, %v6789_v3  ;;  %v6727_v19 = vadd.f32 %v11968_v2, %v6715_v21  ;;  %v6785_v22 = vadd.f32 %v6769_v55, %v6738_v16 }
 0x69a   : > { %v6735_v58 = vmax.f32 %v6727_v19, 0.0  ;;  %v6793_v61 = vmax.f32 %v6785_v22, 0.0 }
 0x69b   : > { %v6703_v6 = vpop.f32.mrf.mxu1 }
 0x69c   : > { %v6782_v50 = vadd.f32 %v6766_v60, %v6735_v58  ;;  %v6704_v18 = vadd.f32 %v6703_v6, %v6675_v0 }
 0x69e   : > { %v6790_v20 = vmax.f32 %v6782_v50, 0.0  ;;  %v6716_v15 = vadd.f32 %v6704_v18, %v6424_v47 }
 0x6a0   : > { %v6797_v41 = vadd.f32 %v6796_v36, %v6790_v20  ;;  %v6728_v9 = vadd.f32 %v11968_v2, %v6716_v15 }
 0x6a2   : > { %v6736_v56 = vmax.f32 %v6728_v9, 0.0 }
 0x6a4   : > { %v6783_v37 = vadd.f32 %v6767_v8, %v6736_v56 }
 0x6a6   : > { %v6791_v25 = vmax.f32 %v6783_v37, 0.0 }
 0x6a8   : > { %v6798_v26 = vadd.f32 %v6797_v41, %v6791_v25 }
 0x6aa   : > { %v6799_v31 = vadd.f32 %v6798_v26, %v6792_v52 }
 0x6ac   : > { %v6800_v1 = vadd.f32 %v6799_v31, %v6793_v61 }
 0x6ae   : > { %v6801_v11 = vrot.slane %v6800_v1, 4 }
 0x6b0   : > { %v6802_v45 = vadd.f32 %v6801_v11, %v6800_v1 }
 0x6b2   : > { %v6803_v49 = vrot.slane %v6802_v45, 2 }
 0x6b4   : > { %v6804_v2 = vadd.f32 %v6803_v49, %v6802_v45 }
 0x6b6   : > { %v6805_v44 = vrot.slane %v6804_v2, 1 }
 0x6b8   : > { %v6806_v51 = vadd.f32 %v6805_v44, %v6804_v2 }
 0x6ba   : > { %v6807_v59 = vmul.f32 0.015625, %v6806_v51 }
 0x6bc   : > { %6841 = vmatmul.f32.vlgmr.msra.gmra.mxu2 %v6807_v59 }
 0x73f   : > { %v6842_v10 = vpop.f32.mrf.mxu2 }
 0x740   : > { %v6843_v39 = vadd.f32 %v6842_v10, %v6824_v53 }
 0x742   : > { %6845 = vst [vmem:[%s405_s19] sm:$0x1] %v6843_v39 }
 0x743   : > { %8452 = shalt.err (!%p8449_p3)
}
 0x744   : > { %8372 = dma.vmem_to_hbm [thread:$0]  (%p8598_p5), %s6858_s17, 16, %s6860_s26, %s6847_s20  }
 0x745 PF: > { %p8378_p4 = scmp.ge.s32.totalorder %s8487_s24, 2  ;;  %s6871_s28 = sand.u32 1, %s8475_s21  }
 0x746   : > { %s6872_s16 = scalar_lea.sflag [#allocation3], %s6871_s28 }
 0x747   : > { %p8375_p7 = pnand %p8378_p4, %p8602_p6 }
 0x749   : > { %p8376_p8 = pneg %p8375_p7 }
 0x74b   : > { %8470 = dma.done.wait (%p8376_p8), %s6872_s16, 16  }
 0x74c   : > { %8472 = vsyncadd (%p8376_p8), %s6872_s16, 4294967280  ;;  %p22_p9 = scmp.ge.s32.totalorder %s8585_s27, 4   ;;  %s12672_s21 = smov %s8479_s22 }
 0x74d   : > { %s12673_s22 = smov %s8483_s23  ;;  %s12674_s23 = smov %s8596_s30 }
 0x74e   : > { %s12675_s24 = smov %s8585_s27  ;;  %24 = sbr.rel (!%p22_p9) target bundleno = 7 (0x7), region = 125 }
 0x753   :  { %6877 = vsyncpa [#allocation3], 1 }
 0x754   :  { %6879 = vsyncpa [#allocation3 + $0x1], 1 }

</bundles_post_ra>
